<compile_context>
chip_gen: v7x
topology: tpu7x:2x2x1
jax: 0.10.0
libtpu: 0.0.40
codegen_flags: <defaults>
</compile_context>

<pallas_src>
import numpy as np
import jax
import jax.numpy as jnp
from jax import lax
from jax.experimental import pallas as pl
from jax.experimental.pallas import tpu as pltpu

se_ratio = 4
bn_eps = 2e-05
group_base = 8
LANES = 128


def _round_up(x, m):
    return ((x + m - 1) // m) * m


# ------------------------------ fused block kernel --------------------------

def _make_block_kernel(Ho, Wo, dim_match):
    HoWo = Ho * Wo
    PAD = _round_up(Wo + 1, 8)            # halo rows in the sep2 scratch

    def _stage1(col_ref, wdw_ref, dws_ref, dwb_ref, dwa_ref,
                wpw_ref, pws_ref, pwb_ref, pwa_ref):
        # grouped 3x3 dw conv as a dense (block-diagonal) matmul on im2col rows
        # + BN + PReLU, then 1x1 pw conv + BN (+ PReLU; alpha==1 <=> no activation).
        acc = jnp.dot(col_ref[...], wdw_ref[...], preferred_element_type=jnp.float32)
        y = acc * dws_ref[...] + dwb_ref[...]
        y = jnp.where(y > 0, y, dwa_ref[...] * y)
        z = jnp.dot(y.astype(jnp.bfloat16), wpw_ref[...],
                    preferred_element_type=jnp.float32)
        z = z * pws_ref[...] + pwb_ref[...]
        return jnp.where(z > 0, z, pwa_ref[...] * z)

    def _stage2(y1, short, mask_ref,
                wdw_ref, dws_ref, dwb_ref, dwa_ref, wpw_ref, pws_ref, pwb_ref,
                w1_ref, b1_ref, a1_ref, w2_ref, b2_ref, a4_ref,
                o_ref, pad_ref):
        # sep2 3x3 grouped conv (stride 1, pad 1) as 9 shifted + masked matmuls over
        # the flat (HoWo, C) rows of this image -- y1 never leaves VMEM.
        pad_ref[...] = jnp.zeros_like(pad_ref)
        pad_ref[pl.ds(PAD, HoWo), :] = y1
        acc = jnp.zeros((HoWo, LANES), jnp.float32)
        for di in range(3):
            for dj in range(3):
                t = di * 3 + dj
                k = (di - 1) * Wo + (dj - 1)                     # flat row shift
                m = mask_ref[pl.ds(t * HoWo, HoWo), :]           # (HoWo, 1) validity
                tap = pad_ref[pl.ds(PAD + k, HoWo), :] * m
                acc = acc + jnp.dot(tap.astype(jnp.bfloat16),
                                    wdw_ref[pl.ds(t * LANES, LANES), :],
                                    preferred_element_type=jnp.float32)
        y2 = acc * dws_ref[...] + dwb_ref[...]
        y2 = jnp.where(y2 > 0, y2, dwa_ref[...] * y2)
        z = jnp.dot(y2.astype(jnp.bfloat16), wpw_ref[...],
                    preferred_element_type=jnp.float32)
        z = z * pws_ref[...] + pwb_ref[...]                      # (HoWo, 128)
        # SE block: this grid step is exactly one image, so the global average pool is
        # a plain sublane reduction (XLU) -- no pooling matmuls / reshapes.
        pooled = jnp.sum(z, axis=0, keepdims=True) * (1.0 / HoWo)   # (1, 128)
        h = jnp.dot(pooled, w1_ref[...], preferred_element_type=jnp.float32) + b1_ref[...]
        h = jnp.where(h > 0, h, a1_ref[...] * h)
        g = jnp.dot(h, w2_ref[...], preferred_element_type=jnp.float32) + b2_ref[...]
        g = pl.reciprocal(1.0 + jnp.exp(-g), approx=True)            # sigmoid (EUP)
        out = z * g + short                                          # gate + residual
        o_ref[...] = jnp.where(out > 0, out, a4_ref[...] * out).astype(o_ref.dtype)

    if dim_match:
        def kernel(col_ref, short_ref, mask_ref,
                   wdw1_ref, dw1s_ref, dw1b_ref, dw1a_ref,
                   wpw1_ref, pw1s_ref, pw1b_ref, pw1a_ref,
                   wdw2_ref, dw2s_ref, dw2b_ref, dw2a_ref,
                   wpw2_ref, pw2s_ref, pw2b_ref,
                   w1_ref, b1_ref, a1_ref, w2_ref, b2_ref, a4_ref,
                   o_ref, pad_ref):
            y1 = _stage1(col_ref, wdw1_ref, dw1s_ref, dw1b_ref, dw1a_ref,
                         wpw1_ref, pw1s_ref, pw1b_ref, pw1a_ref)
            _stage2(y1, short_ref[...], mask_ref,
                    wdw2_ref, dw2s_ref, dw2b_ref, dw2a_ref,
                    wpw2_ref, pw2s_ref, pw2b_ref,
                    w1_ref, b1_ref, a1_ref, w2_ref, b2_ref, a4_ref,
                    o_ref, pad_ref)
    else:
        def kernel(col_ref, mask_ref,
                   wdw1_ref, dw1s_ref, dw1b_ref, dw1a_ref,
                   wpw1_ref, pw1s_ref, pw1b_ref, pw1a_ref,
                   wdw2_ref, dw2s_ref, dw2b_ref, dw2a_ref,
                   wpw2_ref, pw2s_ref, pw2b_ref,
                   w1_ref, b1_ref, a1_ref, w2_ref, b2_ref, a4_ref,
                   o_ref, pad_ref):
            z1 = _stage1(col_ref, wdw1_ref, dw1s_ref, dw1b_ref, dw1a_ref,
                         wpw1_ref, pw1s_ref, pw1b_ref, pw1a_ref)
            # lane-aligned split: shortcut in lanes [0,128), sep1 in [128,256)
            _stage2(z1[:, LANES:2 * LANES], z1[:, :LANES], mask_ref,
                    wdw2_ref, dw2s_ref, dw2b_ref, dw2a_ref,
                    wpw2_ref, pw2s_ref, pw2b_ref,
                    w1_ref, b1_ref, a1_ref, w2_ref, b2_ref, a4_ref,
                    o_ref, pad_ref)
    return kernel


def _conv_tap_masks(Ho, Wo):
    """(9*Ho*Wo, 1) f32: tap-t validity of each output row for a 3x3 / pad-1 conv."""
    HoWo = Ho * Wo
    m = np.zeros((9, HoWo), np.float32)
    for di in range(3):
        for dj in range(3):
            t = di * 3 + dj
            for r in range(HoWo):
                hv = r // Wo + di - 1
                wv = r % Wo + dj - 1
                m[t, r] = 1.0 if (0 <= hv < Ho and 0 <= wv < Wo) else 0.0
    return jnp.asarray(m.reshape(9 * HoWo, 1))


def run_block(col1, short, kern, N, Ho, Wo, dim_match):
    HoWo = Ho * Wo
    M = N * HoWo
    K1 = col1.shape[1]
    PAD = _round_up(Wo + 1, 8)
    kernel = _make_block_kernel(Ho, Wo, dim_match)
    tapmask = _conv_tap_masks(Ho, Wo)

    row_blk = lambda n: (n, 0)
    rep = lambda n: (0, 0)

    arrays = [col1]
    specs = [pl.BlockSpec((HoWo, K1), row_blk)]
    if dim_match:
        arrays.append(short)
        specs.append(pl.BlockSpec((HoWo, LANES), row_blk))
    arrays.append(tapmask)
    specs.append(pl.BlockSpec(tapmask.shape, rep))
    for name in ('Wdw1', 'dw1_scale', 'dw1_bias', 'dw1_alpha',
                 'Wpw1', 'pw1_scale', 'pw1_bias', 'pw1_alpha',
                 'Wdw2', 'dw2_scale', 'dw2_bias', 'dw2_alpha',
                 'Wpw2', 'pw2_scale', 'pw2_bias',
                 'se_w1', 'se_b1', 'se_a1', 'se_w2', 'se_b2', 'alpha4'):
        a = kern[name]
        arrays.append(a)
        specs.append(pl.BlockSpec(a.shape, rep))

    return pl.pallas_call(
        kernel,
        out_shape=jax.ShapeDtypeStruct((M, LANES), jnp.float32),
        grid=(N,),
        in_specs=specs,
        out_specs=pl.BlockSpec((HoWo, LANES), row_blk),
        scratch_shapes=[pltpu.VMEM((HoWo + 2 * PAD, LANES), jnp.float32)],
        compiler_params=pltpu.CompilerParams(dimension_semantics=("parallel",)),
    )(*arrays)


# ------------------------------ glue (plain JAX) ---------------------------

def im2col_nhwc(x, kh, kw, stride, padding, dilation):
    N, H, W, C = x.shape
    ph, pw_ = padding
    xp = jnp.pad(x, ((0, 0), (ph, ph), (pw_, pw_), (0, 0)))
    Ho = (H + 2 * ph - dilation * (kh - 1) - 1) // stride[0] + 1
    Wo = (W + 2 * pw_ - dilation * (kw - 1) - 1) // stride[1] + 1
    cols = []
    for i in range(kh):
        for j in range(kw):
            hi, wj = i * dilation, j * dilation
            patch = xp[:, hi:hi + stride[0] * (Ho - 1) + 1:stride[0],
                          wj:wj + stride[1] * (Wo - 1) + 1:stride[1], :]
            cols.append(patch)
    col = jnp.concatenate(cols, axis=-1)            # (N, Ho, Wo, kh*kw*C)
    return col.reshape(N * Ho * Wo, kh * kw * C), (N, Ho, Wo)


def dense_grouped_weight(w, groups):
    # PyTorch (Cout, Cin/groups, kh, kw) -> dense (kh*kw*Cin, Cout), block-diagonal over
    # groups, row order matching im2col (tap-major, then input channel).
    w = np.asarray(w)
    Cout, Cpg, kh, kw = w.shape
    Cin = Cpg * groups
    Cout_pg = Cout // groups
    W = np.zeros((kh * kw * Cin, Cout), np.float32)
    for g in range(groups):
        for i in range(kh):
            for j in range(kw):
                r0 = (i * kw + j) * Cin + g * Cpg
                W[r0:r0 + Cpg, g * Cout_pg:(g + 1) * Cout_pg] = \
                    w[g * Cout_pg:(g + 1) * Cout_pg, :, i, j].T
    return jnp.asarray(W)


def dense_grouped_weight_taps(w, groups, cin_pad, cout_pad):
    # (Cout, Cin/groups, kh, kw) -> (kh*kw*cin_pad, cout_pad): one dense, lane-padded
    # (cin_pad, cout_pad) block per 3x3 tap (block-diagonal over groups).
    w = np.asarray(w)
    Cout, Cpg, kh, kw = w.shape
    Cout_pg = Cout // groups
    W = np.zeros((kh * kw, cin_pad, cout_pad), np.float32)
    for g in range(groups):
        for i in range(kh):
            for j in range(kw):
                W[i * kw + j, g * Cpg:(g + 1) * Cpg, g * Cout_pg:(g + 1) * Cout_pg] = \
                    w[g * Cout_pg:(g + 1) * Cout_pg, :, i, j].T
    return W.reshape(kh * kw * cin_pad, cout_pad)


# ------------------------------ parameters ---------------------------------

def init_separable(key, cin, cout, factor=2, act_pw=False):
    assert cin % group_base == 0
    cdw = cin * factor
    groups = cin // group_base
    ks = jax.random.split(key, 10)
    p = {
        'dw_w':     0.1 * jax.random.normal(ks[0], (cdw, group_base, 3, 3), jnp.float32),
        'pw_w':     0.1 * jax.random.normal(ks[1], (cout, cdw, 1, 1), jnp.float32),
        'dw_gamma': 1.0 + 0.1 * jax.random.normal(ks[2], (cdw,), jnp.float32),
        'dw_beta':  0.1 * jax.random.normal(ks[3], (cdw,), jnp.float32),
        'dw_mean':  0.05 * jax.random.normal(ks[4], (cdw,), jnp.float32),
        'dw_var':   1.0 + 0.1 * jnp.abs(jax.random.normal(ks[5], (cdw,), jnp.float32)),
        'pw_gamma': 1.0 + 0.1 * jax.random.normal(ks[6], (cout,), jnp.float32),
        'pw_beta':  0.1 * jax.random.normal(ks[7], (cout,), jnp.float32),
        'pw_mean':  0.05 * jax.random.normal(ks[8], (cout,), jnp.float32),
        'pw_var':   1.0 + 0.1 * jnp.abs(jax.random.normal(ks[9], (cout,), jnp.float32)),
        'dw_alpha': jnp.full((cdw,), 0.25, jnp.float32),     # PReLU init like PyTorch
        'groups':   groups,
        'act_pw':   act_pw,
    }
    p['pw_alpha'] = (jnp.full((cout,), 0.25, jnp.float32) if act_pw
                     else jnp.ones((cout,), jnp.float32))    # alpha=1 <=> no activation
    # kernel-ready (folded) forms
    p['dw_Wd'] = dense_grouped_weight(p['dw_w'], groups)
    p['pw_Wd'] = jnp.transpose(p['pw_w'][:, :, 0, 0])
    p['dw_scale'] = p['dw_gamma'] / jnp.sqrt(p['dw_var'] + bn_eps)
    p['dw_bias'] = p['dw_beta'] - p['dw_mean'] * p['dw_scale']
    p['pw_scale'] = p['pw_gamma'] / jnp.sqrt(p['pw_var'] + bn_eps)
    p['pw_bias'] = p['pw_beta'] - p['pw_mean'] * p['pw_scale']
    return p


def init_se(key, c):
    cm = c // se_ratio
    ks = jax.random.split(key, 4)
    return {
        'w1': 0.1 * jax.random.normal(ks[0], (c, cm), jnp.float32),
        'b1': 0.1 * jax.random.normal(ks[1], (cm,), jnp.float32),
        'a1': jnp.full((cm,), 0.25, jnp.float32),
        'w2': 0.1 * jax.random.normal(ks[2], (cm, c), jnp.float32),
        'b2': 0.1 * jax.random.normal(ks[3], (c,), jnp.float32),
    }


def _prep_kernel_params(params):
    """Fold BN, pad every channel dim to 128 lanes and cast MXU operands to bf16."""
    c2, c3 = params['c2'], params['c3']
    dim_match = params['dim_match']
    s1, p2, se = params['sep1'], params['sep2'], params['se']
    cm = c3 // se_ratio

    def row(v, n=LANES, fill=0.0):
        out = np.full((1, n), fill, np.float32)
        v = np.asarray(v, np.float32)
        out[0, :v.shape[0]] = v
        return jnp.asarray(out)

    # ---- stage 1: shortcut (if any) + sep1 fused on the shared im2col ----
    K1 = s1['dw_Wd'].shape[0]
    if dim_match:
        cdw1 = s1['dw_Wd'].shape[1]
        Wdw1 = np.zeros((K1, LANES), np.float32)
        Wdw1[:, :cdw1] = np.asarray(s1['dw_Wd'])
        dw1_scale, dw1_bias = row(s1['dw_scale']), row(s1['dw_bias'])
        dw1_alpha = row(s1['dw_alpha'], fill=1.0)
        Cout1 = LANES
        Wpw1 = np.zeros((LANES, Cout1), np.float32)
        Wpw1[:cdw1, :c2] = np.asarray(s1['pw_Wd'])
        pw1_scale = row(s1['pw_scale'], Cout1)
        pw1_bias = row(s1['pw_bias'], Cout1)
        pw1_alpha = row(s1['pw_alpha'], Cout1, fill=1.0)
    else:
        sc = params['shortcut']
        cdw_s, cdw_1 = sc['dw_Wd'].shape[1], s1['dw_Wd'].shape[1]
        Wdw1 = np.zeros((K1, LANES), np.float32)
        Wdw1[:, :cdw_s] = np.asarray(sc['dw_Wd'])
        Wdw1[:, cdw_s:cdw_s + cdw_1] = np.asarray(s1['dw_Wd'])
        dw1_scale = row(np.concatenate([np.asarray(sc['dw_scale']), np.asarray(s1['dw_scale'])]))
        dw1_bias = row(np.concatenate([np.asarray(sc['dw_bias']), np.asarray(s1['dw_bias'])]))
        dw1_alpha = row(np.concatenate([np.asarray(sc['dw_alpha']), np.asarray(s1['dw_alpha'])]),
                        fill=1.0)
        # block-diagonal pw: shortcut output in lanes [0,128), sep1 in [128,256)
        Cout1 = 2 * LANES
        Wpw1 = np.zeros((LANES, Cout1), np.float32)
        Wpw1[:cdw_s, :c3] = np.asarray(sc['pw_Wd'])
        Wpw1[cdw_s:cdw_s + cdw_1, LANES:LANES + c2] = np.asarray(s1['pw_Wd'])
        pw1_scale = np.zeros((1, Cout1), np.float32)
        pw1_scale[0, :c3] = np.asarray(sc['pw_scale'])
        pw1_scale[0, LANES:LANES + c2] = np.asarray(s1['pw_scale'])
        pw1_bias = np.zeros((1, Cout1), np.float32)
        pw1_bias[0, :c3] = np.asarray(sc['pw_bias'])
        pw1_bias[0, LANES:LANES + c2] = np.asarray(s1['pw_bias'])
        pw1_alpha = np.ones((1, Cout1), np.float32)
        pw1_alpha[0, :c3] = np.asarray(sc['pw_alpha'])           # == 1 (no pw act)
        pw1_alpha[0, LANES:LANES + c2] = np.asarray(s1['pw_alpha'])
        pw1_scale, pw1_bias, pw1_alpha = map(jnp.asarray, (pw1_scale, pw1_bias, pw1_alpha))

    # ---- stage 2: sep2 per-tap dense weights + SE block + final PReLU ----
    Wdw2 = dense_grouped_weight_taps(p2['dw_w'], p2['groups'], LANES, LANES)
    cdw2 = p2['pw_Wd'].shape[0]
    Wpw2 = np.zeros((LANES, LANES), np.float32)
    Wpw2[:cdw2, :c3] = np.asarray(p2['pw_Wd'])
    se_w1 = np.zeros((LANES, LANES), np.float32)
    se_w1[:c3, :cm] = np.asarray(se['w1'])
    se_w2 = np.zeros((LANES, LANES), np.float32)
    se_w2[:cm, :c3] = np.asarray(se['w2'])

    return {
        'Wdw1': jnp.asarray(Wdw1, jnp.bfloat16),
        'dw1_scale': dw1_scale, 'dw1_bias': dw1_bias, 'dw1_alpha': dw1_alpha,
        'Wpw1': jnp.asarray(Wpw1, jnp.bfloat16),
        'pw1_scale': pw1_scale, 'pw1_bias': pw1_bias, 'pw1_alpha': pw1_alpha,
        'Wdw2': jnp.asarray(Wdw2, jnp.bfloat16),
        'dw2_scale': row(p2['dw_scale']), 'dw2_bias': row(p2['dw_bias']),
        'dw2_alpha': row(p2['dw_alpha'], fill=1.0),
        'Wpw2': jnp.asarray(Wpw2, jnp.bfloat16),
        'pw2_scale': row(p2['pw_scale']), 'pw2_bias': row(p2['pw_bias']),
        'se_w1': jnp.asarray(se_w1), 'se_b1': row(se['b1']), 'se_a1': row(se['a1'], fill=1.0),
        'se_w2': jnp.asarray(se_w2), 'se_b2': row(se['b2']),
        'alpha4': row(params['alpha4'], fill=1.0),
    }


def init_block(key, c1, c2, c3, factor=2, dim_match=True):
    ks = jax.random.split(key, 4)
    params = {'dim_match': dim_match, 'c1': c1, 'c2': c2, 'c3': c3}
    if not dim_match:
        params['shortcut'] = init_separable(ks[0], c1, c3, factor, act_pw=False)
    params['sep1'] = init_separable(ks[1], c1, c2, factor, act_pw=True)
    params['sep2'] = init_separable(ks[2], c2, c3, factor, act_pw=False)
    params['se'] = init_se(ks[3], c3)
    params['alpha4'] = jnp.full((c3,), 0.25, jnp.float32)
    params['kern'] = _prep_kernel_params(params)
    return params


# ------------------------------ block forward ------------------------------

def vargnet_block_forward(x_nchw, params, stride=(1, 1)):
    dim_match = params['dim_match']
    c1, c3 = params['c1'], params['c3']
    if dim_match:
        # identity shortcut requires same spatial size / channel count
        assert stride == (1, 1) and c1 == c3, "dim_match=True requires stride (1,1), c1==c3"
    x = jnp.transpose(x_nchw, (0, 2, 3, 1))                       # NCHW -> NHWC
    # im2col for the first (possibly stride-2) 3x3 conv, shared by shortcut and sep1
    col1, (N, Ho, Wo) = im2col_nhwc(x, 3, 3, stride, (1, 1), 1)
    col1 = col1.astype(jnp.bfloat16)                              # bf16 MXU operand / 2x DMA
    short = None
    if dim_match:
        short = jnp.pad(x.reshape(N * Ho * Wo, c1), ((0, 0), (0, LANES - c1)))
    out = run_block(col1, short, params['kern'], N, Ho, Wo, dim_match)
    out = out[:, :c3].reshape(N, Ho, Wo, c3)
    return jnp.transpose(out, (0, 3, 1, 2))                       # NHWC -> NCHW


# ------------------------- pure-JAX reference (check) ----------------------

def _prelu(x, alpha):
    return jnp.where(x > 0, x, alpha * x)


def _ref_separable(x, p, stride, act_pw):
    y = lax.conv_general_dilated(
        x, jnp.transpose(p['dw_w'], (2, 3, 1, 0)),
        window_strides=stride, padding=[(1, 1), (1, 1)], rhs_dilation=(1, 1),
        dimension_numbers=('NHWC', 'HWIO', 'NHWC'), feature_group_count=p['groups'])
    y = (y - p['dw_mean']) / jnp.sqrt(p['dw_var'] + bn_eps) * p['dw_gamma'] + p['dw_beta']
    y = _prelu(y, p['dw_alpha'])
    z = lax.conv_general_dilated(
        y, jnp.transpose(p['pw_w'], (2, 3, 1, 0)),
        window_strides=(1, 1), padding='VALID',
        dimension_numbers=('NHWC', 'HWIO', 'NHWC'))
    z = (z - p['pw_mean']) / jnp.sqrt(p['pw_var'] + bn_eps) * p['pw_gamma'] + p['pw_beta']
    if act_pw:
        z = _prelu(z, p['pw_alpha'])
    return z


def _ref_block(x_nhwc, params, stride):
    if params['dim_match']:
        short = x_nhwc
    else:
        short = _ref_separable(x_nhwc, params['shortcut'], stride, act_pw=False)
    y = _ref_separable(x_nhwc, params['sep1'], stride, act_pw=True)
    z = _ref_separable(y, params['sep2'], (1, 1), act_pw=False)
    se = params['se']
    pooled = jnp.mean(z, axis=(1, 2))                             # AdaptiveAvgPool2d(1)
    h = _prelu(pooled @ se['w1'] + se['b1'], se['a1'])
    g = jax.nn.sigmoid(h @ se['w2'] + se['b2'])
    z = z * g[:, None, None, :]
    out = z + short
    return _prelu(out, params['alpha4'])


# ---------------------------------- main ------------------------------------

if __name__ == "__main__":
    key = jax.random.PRNGKey(0)
    kpA, kxA, kpB, kxB = jax.random.split(key, 4)

    # Config A: dim_match=False (downsampling block), kernel 3x3, stride (2,2), factor 2
    c1, c2, c3 = 16, 24, 32
    paramsA = init_block(kpA, c1, c2, c3, factor=2, dim_match=False)
    xA = jax.random.normal(kxA, (2, c1, 16, 16), jnp.float32)      # NCHW, like PyTorch
    outA = jax.block_until_ready(vargnet_block_forward(xA, paramsA, stride=(2, 2)))
    assert outA.shape == (2, c3, 8, 8), outA.shape
    refA = jnp.transpose(_ref_block(jnp.transpose(xA, (0, 2, 3, 1)), paramsA, (2, 2)),
                         (0, 3, 1, 2))
    errA = float(jnp.max(jnp.abs(outA - refA)))
    assert errA < 5e-2, f"config A max abs err {errA}"             # bf16 MXU operands

    # Config B: dim_match=True (identity shortcut, stride (1,1)), c1 == c3
    c = 32
    paramsB = init_block(kpB, c, c, c, factor=2, dim_match=True)
    xB = jax.random.normal(kxB, (2, c, 16, 16), jnp.float32)
    outB = jax.block_until_ready(vargnet_block_forward(xB, paramsB, stride=(1, 1)))
    assert outB.shape == (2, c, 16, 16), outB.shape
    refB = jnp.transpose(_ref_block(jnp.transpose(xB, (0, 2, 3, 1)), paramsB, (1, 1)),
                         (0, 3, 1, 2))
    errB = float(jnp.max(jnp.abs(outB - refB)))
    assert errB < 5e-2, f"config B max abs err {errB}"

    print("KERNEL_OK")
</pallas_src>

<mosaic_0001>
module attributes {stable_mosaic.version = 11 : i64} {
  func.func @kernel(%arg0: i32, %arg1: memref<64x144xbf16, #tpu.memory_space<vmem>>, %arg2: memref<576x1xf32, #tpu.memory_space<vmem>>, %arg3: memref<144x128xbf16, #tpu.memory_space<vmem>>, %arg4: memref<1x128xf32, #tpu.memory_space<vmem>>, %arg5: memref<1x128xf32, #tpu.memory_space<vmem>>, %arg6: memref<1x128xf32, #tpu.memory_space<vmem>>, %arg7: memref<128x256xbf16, #tpu.memory_space<vmem>>, %arg8: memref<1x256xf32, #tpu.memory_space<vmem>>, %arg9: memref<1x256xf32, #tpu.memory_space<vmem>>, %arg10: memref<1x256xf32, #tpu.memory_space<vmem>>, %arg11: memref<1152x128xbf16, #tpu.memory_space<vmem>>, %arg12: memref<1x128xf32, #tpu.memory_space<vmem>>, %arg13: memref<1x128xf32, #tpu.memory_space<vmem>>, %arg14: memref<1x128xf32, #tpu.memory_space<vmem>>, %arg15: memref<128x128xbf16, #tpu.memory_space<vmem>>, %arg16: memref<1x128xf32, #tpu.memory_space<vmem>>, %arg17: memref<1x128xf32, #tpu.memory_space<vmem>>, %arg18: memref<128x128xf32, #tpu.memory_space<vmem>>, %arg19: memref<1x128xf32, #tpu.memory_space<vmem>>, %arg20: memref<1x128xf32, #tpu.memory_space<vmem>>, %arg21: memref<128x128xf32, #tpu.memory_space<vmem>>, %arg22: memref<1x128xf32, #tpu.memory_space<vmem>>, %arg23: memref<1x128xf32, #tpu.memory_space<vmem>>, %arg24: memref<64x128xf32, #tpu.memory_space<vmem>>, %arg25: memref<96x128xf32, #tpu.memory_space<vmem>>) attributes {dimension_semantics = [#tpu.dimension_semantics<parallel>], iteration_bounds = array<i64: 2>, scalar_prefetch = 0 : i64, scratch_operands = 1 : i64, tpu.core_type = #tpu.core_type<tc>, window_params = [{transform_indices = @transform_0, window_bounds = array<i64: 64, 144>}, {pipeline_mode = #tpu.pipeline_mode<synchronous>, transform_indices = @transform_1, window_bounds = array<i64: 576, 1>}, {pipeline_mode = #tpu.pipeline_mode<synchronous>, transform_indices = @transform_2, window_bounds = array<i64: 144, 128>}, {pipeline_mode = #tpu.pipeline_mode<synchronous>, transform_indices = @transform_3, window_bounds = array<i64: 1, 128>}, {pipeline_mode = #tpu.pipeline_mode<synchronous>, transform_indices = @transform_4, window_bounds = array<i64: 1, 128>}, {pipeline_mode = #tpu.pipeline_mode<synchronous>, transform_indices = @transform_5, window_bounds = array<i64: 1, 128>}, {pipeline_mode = #tpu.pipeline_mode<synchronous>, transform_indices = @transform_6, window_bounds = array<i64: 128, 256>}, {pipeline_mode = #tpu.pipeline_mode<synchronous>, transform_indices = @transform_7, window_bounds = array<i64: 1, 256>}, {pipeline_mode = #tpu.pipeline_mode<synchronous>, transform_indices = @transform_8, window_bounds = array<i64: 1, 256>}, {pipeline_mode = #tpu.pipeline_mode<synchronous>, transform_indices = @transform_9, window_bounds = array<i64: 1, 256>}, {pipeline_mode = #tpu.pipeline_mode<synchronous>, transform_indices = @transform_10, window_bounds = array<i64: 1152, 128>}, {pipeline_mode = #tpu.pipeline_mode<synchronous>, transform_indices = @transform_11, window_bounds = array<i64: 1, 128>}, {pipeline_mode = #tpu.pipeline_mode<synchronous>, transform_indices = @transform_12, window_bounds = array<i64: 1, 128>}, {pipeline_mode = #tpu.pipeline_mode<synchronous>, transform_indices = @transform_13, window_bounds = array<i64: 1, 128>}, {pipeline_mode = #tpu.pipeline_mode<synchronous>, transform_indices = @transform_14, window_bounds = array<i64: 128, 128>}, {pipeline_mode = #tpu.pipeline_mode<synchronous>, transform_indices = @transform_15, window_bounds = array<i64: 1, 128>}, {pipeline_mode = #tpu.pipeline_mode<synchronous>, transform_indices = @transform_16, window_bounds = array<i64: 1, 128>}, {pipeline_mode = #tpu.pipeline_mode<synchronous>, transform_indices = @transform_17, window_bounds = array<i64: 128, 128>}, {pipeline_mode = #tpu.pipeline_mode<synchronous>, transform_indices = @transform_18, window_bounds = array<i64: 1, 128>}, {pipeline_mode = #tpu.pipeline_mode<synchronous>, transform_indices = @transform_19, window_bounds = array<i64: 1, 128>}, {pipeline_mode = #tpu.pipeline_mode<synchronous>, transform_indices = @transform_20, window_bounds = array<i64: 128, 128>}, {pipeline_mode = #tpu.pipeline_mode<synchronous>, transform_indices = @transform_21, window_bounds = array<i64: 1, 128>}, {pipeline_mode = #tpu.pipeline_mode<synchronous>, transform_indices = @transform_22, window_bounds = array<i64: 1, 128>}, {transform_indices = @transform_23, window_bounds = array<i64: 64, 128>}]} {
    %c0 = arith.constant 0 : index
    %c0_0 = arith.constant 0 : index
    %0 = vector.load %arg1[%c0, %c0_0] : memref<64x144xbf16, #tpu.memory_space<vmem>>, vector<64x144xbf16>
    %c0_1 = arith.constant 0 : index
    %c0_2 = arith.constant 0 : index
    %1 = vector.load %arg3[%c0_1, %c0_2] : memref<144x128xbf16, #tpu.memory_space<vmem>>, vector<144x128xbf16>
    %cst = arith.constant dense<0.000000e+00> : vector<64x128xf32>
    %2 = tpu.matmul %0, %1, %cst {dimension_numbers = #tpu.dot_dimension_numbers<[1], [0], [0], [1], [0, 0, 1, 1], [], []>} : vector<64x144xbf16>, vector<144x128xbf16>, vector<64x128xf32> -> vector<64x128xf32>
    %c0_3 = arith.constant 0 : index
    %c0_4 = arith.constant 0 : index
    %3 = vector.load %arg4[%c0_3, %c0_4] : memref<1x128xf32, #tpu.memory_space<vmem>>, vector<1x128xf32>
    %4 = vector.broadcast %3 : vector<1x128xf32> to vector<64x128xf32>
    %5 = arith.mulf %2, %4 : vector<64x128xf32>
    %c0_5 = arith.constant 0 : index
    %c0_6 = arith.constant 0 : index
    %6 = vector.load %arg5[%c0_5, %c0_6] : memref<1x128xf32, #tpu.memory_space<vmem>>, vector<1x128xf32>
    %7 = vector.broadcast %6 : vector<1x128xf32> to vector<64x128xf32>
    %8 = arith.addf %5, %7 : vector<64x128xf32>
    %cst_7 = arith.constant 0.000000e+00 : f32
    %9 = vector.broadcast %cst_7 : f32 to vector<64x128xf32>
    %10 = arith.cmpf ogt, %8, %9 : vector<64x128xf32>
    %c0_8 = arith.constant 0 : index
    %c0_9 = arith.constant 0 : index
    %11 = vector.load %arg6[%c0_8, %c0_9] : memref<1x128xf32, #tpu.memory_space<vmem>>, vector<1x128xf32>
    %12 = vector.broadcast %11 : vector<1x128xf32> to vector<64x128xf32>
    %13 = arith.mulf %12, %8 : vector<64x128xf32>
    %14 = arith.select %10, %8, %13 : vector<64x128xi1>, vector<64x128xf32>
    %15 = arith.truncf %14 : vector<64x128xf32> to vector<64x128xbf16>
    %c0_10 = arith.constant 0 : index
    %c0_11 = arith.constant 0 : index
    %16 = vector.load %arg7[%c0_10, %c0_11] : memref<128x256xbf16, #tpu.memory_space<vmem>>, vector<128x256xbf16>
    %cst_12 = arith.constant dense<0.000000e+00> : vector<64x256xf32>
    %17 = tpu.matmul %15, %16, %cst_12 {dimension_numbers = #tpu.dot_dimension_numbers<[1], [0], [0], [1], [0, 0, 1, 1], [], []>} : vector<64x128xbf16>, vector<128x256xbf16>, vector<64x256xf32> -> vector<64x256xf32>
    %c0_13 = arith.constant 0 : index
    %c0_14 = arith.constant 0 : index
    %18 = vector.load %arg8[%c0_13, %c0_14] : memref<1x256xf32, #tpu.memory_space<vmem>>, vector<1x256xf32>
    %19 = vector.broadcast %18 : vector<1x256xf32> to vector<64x256xf32>
    %20 = arith.mulf %17, %19 : vector<64x256xf32>
    %c0_15 = arith.constant 0 : index
    %c0_16 = arith.constant 0 : index
    %21 = vector.load %arg9[%c0_15, %c0_16] : memref<1x256xf32, #tpu.memory_space<vmem>>, vector<1x256xf32>
    %22 = vector.broadcast %21 : vector<1x256xf32> to vector<64x256xf32>
    %23 = arith.addf %20, %22 : vector<64x256xf32>
    %cst_17 = arith.constant 0.000000e+00 : f32
    %24 = vector.broadcast %cst_17 : f32 to vector<64x256xf32>
    %25 = arith.cmpf ogt, %23, %24 : vector<64x256xf32>
    %c0_18 = arith.constant 0 : index
    %c0_19 = arith.constant 0 : index
    %26 = vector.load %arg10[%c0_18, %c0_19] : memref<1x256xf32, #tpu.memory_space<vmem>>, vector<1x256xf32>
    %27 = vector.broadcast %26 : vector<1x256xf32> to vector<64x256xf32>
    %28 = arith.mulf %27, %23 : vector<64x256xf32>
    %29 = arith.select %25, %23, %28 : vector<64x256xi1>, vector<64x256xf32>
    %30 = vector.extract_strided_slice %29 {offsets = [0, 128], sizes = [64, 128], strides = [1, 1]} : vector<64x256xf32> to vector<64x128xf32>
    %31 = vector.extract_strided_slice %29 {offsets = [0, 0], sizes = [64, 128], strides = [1, 1]} : vector<64x256xf32> to vector<64x128xf32>
    %cst_20 = arith.constant 0.000000e+00 : f32
    %32 = vector.broadcast %cst_20 : f32 to vector<96x128xf32>
    %c0_21 = arith.constant 0 : index
    %c0_22 = arith.constant 0 : index
    %33 = vector.load %arg25[%c0_21, %c0_22] : memref<96x128xf32, #tpu.memory_space<vmem>>, vector<96x128xf32>
    tpu.vector_store %arg25[%c0_21, %c0_22], %32 {strides = array<i32>} : memref<96x128xf32, #tpu.memory_space<vmem>>, vector<96x128xf32>,
    %c16 = arith.constant 16 : index
    %c0_23 = arith.constant 0 : index
    %34 = vector.load %arg25[%c16, %c0_23] : memref<96x128xf32, #tpu.memory_space<vmem>>, vector<64x128xf32>
    tpu.vector_store %arg25[%c16, %c0_23], %30 {strides = array<i32>} : memref<96x128xf32, #tpu.memory_space<vmem>>, vector<64x128xf32>,
    %cst_24 = arith.constant 0.000000e+00 : f32
    %35 = vector.broadcast %cst_24 : f32 to vector<64x128xf32>
    %c0_25 = arith.constant 0 : index
    %c0_26 = arith.constant 0 : index
    %36 = vector.load %arg2[%c0_25, %c0_26] : memref<576x1xf32, #tpu.memory_space<vmem>>, vector<64x1xf32>
    %c7 = arith.constant 7 : index
    %c0_27 = arith.constant 0 : index
    %37 = vector.load %arg25[%c7, %c0_27] : memref<96x128xf32, #tpu.memory_space<vmem>>, vector<64x128xf32>
    %38 = vector.broadcast %36 : vector<64x1xf32> to vector<64x128xf32>
    %39 = arith.mulf %37, %38 : vector<64x128xf32>
    %40 = arith.truncf %39 : vector<64x128xf32> to vector<64x128xbf16>
    %c0_28 = arith.constant 0 : index
    %c0_29 = arith.constant 0 : index
    %41 = vector.load %arg11[%c0_28, %c0_29] : memref<1152x128xbf16, #tpu.memory_space<vmem>>, vector<128x128xbf16>
    %cst_30 = arith.constant dense<0.000000e+00> : vector<64x128xf32>
    %42 = tpu.matmul %40, %41, %cst_30 {dimension_numbers = #tpu.dot_dimension_numbers<[1], [0], [0], [1], [0, 0, 1, 1], [], []>} : vector<64x128xbf16>, vector<128x128xbf16>, vector<64x128xf32> -> vector<64x128xf32>
    %43 = arith.addf %35, %42 : vector<64x128xf32>
    %c64 = arith.constant 64 : index
    %c0_31 = arith.constant 0 : index
    %44 = vector.load %arg2[%c64, %c0_31] : memref<576x1xf32, #tpu.memory_space<vmem>>, vector<64x1xf32>
    %c8 = arith.constant 8 : index
    %c0_32 = arith.constant 0 : index
    %45 = vector.load %arg25[%c8, %c0_32] : memref<96x128xf32, #tpu.memory_space<vmem>>, vector<64x128xf32>
    %46 = vector.broadcast %44 : vector<64x1xf32> to vector<64x128xf32>
    %47 = arith.mulf %45, %46 : vector<64x128xf32>
    %48 = arith.truncf %47 : vector<64x128xf32> to vector<64x128xbf16>
    %c128 = arith.constant 128 : index
    %c0_33 = arith.constant 0 : index
    %49 = vector.load %arg11[%c128, %c0_33] : memref<1152x128xbf16, #tpu.memory_space<vmem>>, vector<128x128xbf16>
    %cst_34 = arith.constant dense<0.000000e+00> : vector<64x128xf32>
    %50 = tpu.matmul %48, %49, %cst_34 {dimension_numbers = #tpu.dot_dimension_numbers<[1], [0], [0], [1], [0, 0, 1, 1], [], []>} : vector<64x128xbf16>, vector<128x128xbf16>, vector<64x128xf32> -> vector<64x128xf32>
    %51 = arith.addf %43, %50 : vector<64x128xf32>
    %c128_35 = arith.constant 128 : index
    %c0_36 = arith.constant 0 : index
    %52 = vector.load %arg2[%c128_35, %c0_36] : memref<576x1xf32, #tpu.memory_space<vmem>>, vector<64x1xf32>
    %c9 = arith.constant 9 : index
    %c0_37 = arith.constant 0 : index
    %53 = vector.load %arg25[%c9, %c0_37] : memref<96x128xf32, #tpu.memory_space<vmem>>, vector<64x128xf32>
    %54 = vector.broadcast %52 : vector<64x1xf32> to vector<64x128xf32>
    %55 = arith.mulf %53, %54 : vector<64x128xf32>
    %56 = arith.truncf %55 : vector<64x128xf32> to vector<64x128xbf16>
    %c256 = arith.constant 256 : index
    %c0_38 = arith.constant 0 : index
    %57 = vector.load %arg11[%c256, %c0_38] : memref<1152x128xbf16, #tpu.memory_space<vmem>>, vector<128x128xbf16>
    %cst_39 = arith.constant dense<0.000000e+00> : vector<64x128xf32>
    %58 = tpu.matmul %56, %57, %cst_39 {dimension_numbers = #tpu.dot_dimension_numbers<[1], [0], [0], [1], [0, 0, 1, 1], [], []>} : vector<64x128xbf16>, vector<128x128xbf16>, vector<64x128xf32> -> vector<64x128xf32>
    %59 = arith.addf %51, %58 : vector<64x128xf32>
    %c192 = arith.constant 192 : index
    %c0_40 = arith.constant 0 : index
    %60 = vector.load %arg2[%c192, %c0_40] : memref<576x1xf32, #tpu.memory_space<vmem>>, vector<64x1xf32>
    %c15 = arith.constant 15 : index
    %c0_41 = arith.constant 0 : index
    %61 = vector.load %arg25[%c15, %c0_41] : memref<96x128xf32, #tpu.memory_space<vmem>>, vector<64x128xf32>
    %62 = vector.broadcast %60 : vector<64x1xf32> to vector<64x128xf32>
    %63 = arith.mulf %61, %62 : vector<64x128xf32>
    %64 = arith.truncf %63 : vector<64x128xf32> to vector<64x128xbf16>
    %c384 = arith.constant 384 : index
    %c0_42 = arith.constant 0 : index
    %65 = vector.load %arg11[%c384, %c0_42] : memref<1152x128xbf16, #tpu.memory_space<vmem>>, vector<128x128xbf16>
    %cst_43 = arith.constant dense<0.000000e+00> : vector<64x128xf32>
    %66 = tpu.matmul %64, %65, %cst_43 {dimension_numbers = #tpu.dot_dimension_numbers<[1], [0], [0], [1], [0, 0, 1, 1], [], []>} : vector<64x128xbf16>, vector<128x128xbf16>, vector<64x128xf32> -> vector<64x128xf32>
    %67 = arith.addf %59, %66 : vector<64x128xf32>
    %c256_44 = arith.constant 256 : index
    %c0_45 = arith.constant 0 : index
    %68 = vector.load %arg2[%c256_44, %c0_45] : memref<576x1xf32, #tpu.memory_space<vmem>>, vector<64x1xf32>
    %c16_46 = arith.constant 16 : index
    %c0_47 = arith.constant 0 : index
    %69 = vector.load %arg25[%c16_46, %c0_47] : memref<96x128xf32, #tpu.memory_space<vmem>>, vector<64x128xf32>
    %70 = vector.broadcast %68 : vector<64x1xf32> to vector<64x128xf32>
    %71 = arith.mulf %69, %70 : vector<64x128xf32>
    %72 = arith.truncf %71 : vector<64x128xf32> to vector<64x128xbf16>
    %c512 = arith.constant 512 : index
    %c0_48 = arith.constant 0 : index
    %73 = vector.load %arg11[%c512, %c0_48] : memref<1152x128xbf16, #tpu.memory_space<vmem>>, vector<128x128xbf16>
    %cst_49 = arith.constant dense<0.000000e+00> : vector<64x128xf32>
    %74 = tpu.matmul %72, %73, %cst_49 {dimension_numbers = #tpu.dot_dimension_numbers<[1], [0], [0], [1], [0, 0, 1, 1], [], []>} : vector<64x128xbf16>, vector<128x128xbf16>, vector<64x128xf32> -> vector<64x128xf32>
    %75 = arith.addf %67, %74 : vector<64x128xf32>
    %c320 = arith.constant 320 : index
    %c0_50 = arith.constant 0 : index
    %76 = vector.load %arg2[%c320, %c0_50] : memref<576x1xf32, #tpu.memory_space<vmem>>, vector<64x1xf32>
    %c17 = arith.constant 17 : index
    %c0_51 = arith.constant 0 : index
    %77 = vector.load %arg25[%c17, %c0_51] : memref<96x128xf32, #tpu.memory_space<vmem>>, vector<64x128xf32>
    %78 = vector.broadcast %76 : vector<64x1xf32> to vector<64x128xf32>
    %79 = arith.mulf %77, %78 : vector<64x128xf32>
    %80 = arith.truncf %79 : vector<64x128xf32> to vector<64x128xbf16>
    %c640 = arith.constant 640 : index
    %c0_52 = arith.constant 0 : index
    %81 = vector.load %arg11[%c640, %c0_52] : memref<1152x128xbf16, #tpu.memory_space<vmem>>, vector<128x128xbf16>
    %cst_53 = arith.constant dense<0.000000e+00> : vector<64x128xf32>
    %82 = tpu.matmul %80, %81, %cst_53 {dimension_numbers = #tpu.dot_dimension_numbers<[1], [0], [0], [1], [0, 0, 1, 1], [], []>} : vector<64x128xbf16>, vector<128x128xbf16>, vector<64x128xf32> -> vector<64x128xf32>
    %83 = arith.addf %75, %82 : vector<64x128xf32>
    %c384_54 = arith.constant 384 : index
    %c0_55 = arith.constant 0 : index
    %84 = vector.load %arg2[%c384_54, %c0_55] : memref<576x1xf32, #tpu.memory_space<vmem>>, vector<64x1xf32>
    %c23 = arith.constant 23 : index
    %c0_56 = arith.constant 0 : index
    %85 = vector.load %arg25[%c23, %c0_56] : memref<96x128xf32, #tpu.memory_space<vmem>>, vector<64x128xf32>
    %86 = vector.broadcast %84 : vector<64x1xf32> to vector<64x128xf32>
    %87 = arith.mulf %85, %86 : vector<64x128xf32>
    %88 = arith.truncf %87 : vector<64x128xf32> to vector<64x128xbf16>
    %c768 = arith.constant 768 : index
    %c0_57 = arith.constant 0 : index
    %89 = vector.load %arg11[%c768, %c0_57] : memref<1152x128xbf16, #tpu.memory_space<vmem>>, vector<128x128xbf16>
    %cst_58 = arith.constant dense<0.000000e+00> : vector<64x128xf32>
    %90 = tpu.matmul %88, %89, %cst_58 {dimension_numbers = #tpu.dot_dimension_numbers<[1], [0], [0], [1], [0, 0, 1, 1], [], []>} : vector<64x128xbf16>, vector<128x128xbf16>, vector<64x128xf32> -> vector<64x128xf32>
    %91 = arith.addf %83, %90 : vector<64x128xf32>
    %c448 = arith.constant 448 : index
    %c0_59 = arith.constant 0 : index
    %92 = vector.load %arg2[%c448, %c0_59] : memref<576x1xf32, #tpu.memory_space<vmem>>, vector<64x1xf32>
    %c24 = arith.constant 24 : index
    %c0_60 = arith.constant 0 : index
    %93 = vector.load %arg25[%c24, %c0_60] : memref<96x128xf32, #tpu.memory_space<vmem>>, vector<64x128xf32>
    %94 = vector.broadcast %92 : vector<64x1xf32> to vector<64x128xf32>
    %95 = arith.mulf %93, %94 : vector<64x128xf32>
    %96 = arith.truncf %95 : vector<64x128xf32> to vector<64x128xbf16>
    %c896 = arith.constant 896 : index
    %c0_61 = arith.constant 0 : index
    %97 = vector.load %arg11[%c896, %c0_61] : memref<1152x128xbf16, #tpu.memory_space<vmem>>, vector<128x128xbf16>
    %cst_62 = arith.constant dense<0.000000e+00> : vector<64x128xf32>
    %98 = tpu.matmul %96, %97, %cst_62 {dimension_numbers = #tpu.dot_dimension_numbers<[1], [0], [0], [1], [0, 0, 1, 1], [], []>} : vector<64x128xbf16>, vector<128x128xbf16>, vector<64x128xf32> -> vector<64x128xf32>
    %99 = arith.addf %91, %98 : vector<64x128xf32>
    %c512_63 = arith.constant 512 : index
    %c0_64 = arith.constant 0 : index
    %100 = vector.load %arg2[%c512_63, %c0_64] : memref<576x1xf32, #tpu.memory_space<vmem>>, vector<64x1xf32>
    %c25 = arith.constant 25 : index
    %c0_65 = arith.constant 0 : index
    %101 = vector.load %arg25[%c25, %c0_65] : memref<96x128xf32, #tpu.memory_space<vmem>>, vector<64x128xf32>
    %102 = vector.broadcast %100 : vector<64x1xf32> to vector<64x128xf32>
    %103 = arith.mulf %101, %102 : vector<64x128xf32>
    %104 = arith.truncf %103 : vector<64x128xf32> to vector<64x128xbf16>
    %c1024 = arith.constant 1024 : index
    %c0_66 = arith.constant 0 : index
    %105 = vector.load %arg11[%c1024, %c0_66] : memref<1152x128xbf16, #tpu.memory_space<vmem>>, vector<128x128xbf16>
    %cst_67 = arith.constant dense<0.000000e+00> : vector<64x128xf32>
    %106 = tpu.matmul %104, %105, %cst_67 {dimension_numbers = #tpu.dot_dimension_numbers<[1], [0], [0], [1], [0, 0, 1, 1], [], []>} : vector<64x128xbf16>, vector<128x128xbf16>, vector<64x128xf32> -> vector<64x128xf32>
    %107 = arith.addf %99, %106 : vector<64x128xf32>
    %c0_68 = arith.constant 0 : index
    %c0_69 = arith.constant 0 : index
    %108 = vector.load %arg12[%c0_68, %c0_69] : memref<1x128xf32, #tpu.memory_space<vmem>>, vector<1x128xf32>
    %109 = vector.broadcast %108 : vector<1x128xf32> to vector<64x128xf32>
    %110 = arith.mulf %107, %109 : vector<64x128xf32>
    %c0_70 = arith.constant 0 : index
    %c0_71 = arith.constant 0 : index
    %111 = vector.load %arg13[%c0_70, %c0_71] : memref<1x128xf32, #tpu.memory_space<vmem>>, vector<1x128xf32>
    %112 = vector.broadcast %111 : vector<1x128xf32> to vector<64x128xf32>
    %113 = arith.addf %110, %112 : vector<64x128xf32>
    %cst_72 = arith.constant 0.000000e+00 : f32
    %114 = vector.broadcast %cst_72 : f32 to vector<64x128xf32>
    %115 = arith.cmpf ogt, %113, %114 : vector<64x128xf32>
    %c0_73 = arith.constant 0 : index
    %c0_74 = arith.constant 0 : index
    %116 = vector.load %arg14[%c0_73, %c0_74] : memref<1x128xf32, #tpu.memory_space<vmem>>, vector<1x128xf32>
    %117 = vector.broadcast %116 : vector<1x128xf32> to vector<64x128xf32>
    %118 = arith.mulf %117, %113 : vector<64x128xf32>
    %119 = arith.select %115, %113, %118 : vector<64x128xi1>, vector<64x128xf32>
    %120 = arith.truncf %119 : vector<64x128xf32> to vector<64x128xbf16>
    %c0_75 = arith.constant 0 : index
    %c0_76 = arith.constant 0 : index
    %121 = vector.load %arg15[%c0_75, %c0_76] : memref<128x128xbf16, #tpu.memory_space<vmem>>, vector<128x128xbf16>
    %cst_77 = arith.constant dense<0.000000e+00> : vector<64x128xf32>
    %122 = tpu.matmul %120, %121, %cst_77 {dimension_numbers = #tpu.dot_dimension_numbers<[1], [0], [0], [1], [0, 0, 1, 1], [], []>} : vector<64x128xbf16>, vector<128x128xbf16>, vector<64x128xf32> -> vector<64x128xf32>
    %c0_78 = arith.constant 0 : index
    %c0_79 = arith.constant 0 : index
    %123 = vector.load %arg16[%c0_78, %c0_79] : memref<1x128xf32, #tpu.memory_space<vmem>>, vector<1x128xf32>
    %124 = vector.broadcast %123 : vector<1x128xf32> to vector<64x128xf32>
    %125 = arith.mulf %122, %124 : vector<64x128xf32>
    %c0_80 = arith.constant 0 : index
    %c0_81 = arith.constant 0 : index
    %126 = vector.load %arg17[%c0_80, %c0_81] : memref<1x128xf32, #tpu.memory_space<vmem>>, vector<1x128xf32>
    %127 = vector.broadcast %126 : vector<1x128xf32> to vector<64x128xf32>
    %128 = arith.addf %125, %127 : vector<64x128xf32>
    %cst_82 = arith.constant dense<0.000000e+00> : vector<128xf32>
    %129 = vector.multi_reduction <add>, %128, %cst_82 [0] : vector<64x128xf32> to vector<128xf32>
    %130 = vector.shape_cast %129 : vector<128xf32> to vector<1x128xf32>
    %cst_83 = arith.constant 1.562500e-02 : f32
    %131 = vector.broadcast %cst_83 : f32 to vector<1x128xf32>
    %132 = arith.mulf %130, %131 : vector<1x128xf32>
    %c0_84 = arith.constant 0 : index
    %c0_85 = arith.constant 0 : index
    %133 = vector.load %arg18[%c0_84, %c0_85] : memref<128x128xf32, #tpu.memory_space<vmem>>, vector<128x128xf32>
    %cst_86 = arith.constant dense<0.000000e+00> : vector<1x128xf32>
    %134 = tpu.matmul %132, %133, %cst_86 {dimension_numbers = #tpu.dot_dimension_numbers<[1], [0], [0], [1], [0, 0, 1, 1], [], []>} : vector<1x128xf32>, vector<128x128xf32>, vector<1x128xf32> -> vector<1x128xf32>
    %c0_87 = arith.constant 0 : index
    %c0_88 = arith.constant 0 : index
    %135 = vector.load %arg19[%c0_87, %c0_88] : memref<1x128xf32, #tpu.memory_space<vmem>>, vector<1x128xf32>
    %136 = arith.addf %134, %135 : vector<1x128xf32>
    %cst_89 = arith.constant 0.000000e+00 : f32
    %137 = vector.broadcast %cst_89 : f32 to vector<1x128xf32>
    %138 = arith.cmpf ogt, %136, %137 : vector<1x128xf32>
    %c0_90 = arith.constant 0 : index
    %c0_91 = arith.constant 0 : index
    %139 = vector.load %arg20[%c0_90, %c0_91] : memref<1x128xf32, #tpu.memory_space<vmem>>, vector<1x128xf32>
    %140 = arith.mulf %139, %136 : vector<1x128xf32>
    %141 = arith.select %138, %136, %140 : vector<1x128xi1>, vector<1x128xf32>
    %c0_92 = arith.constant 0 : index
    %c0_93 = arith.constant 0 : index
    %142 = vector.load %arg21[%c0_92, %c0_93] : memref<128x128xf32, #tpu.memory_space<vmem>>, vector<128x128xf32>
    %cst_94 = arith.constant dense<0.000000e+00> : vector<1x128xf32>
    %143 = tpu.matmul %141, %142, %cst_94 {dimension_numbers = #tpu.dot_dimension_numbers<[1], [0], [0], [1], [0, 0, 1, 1], [], []>} : vector<1x128xf32>, vector<128x128xf32>, vector<1x128xf32> -> vector<1x128xf32>
    %c0_95 = arith.constant 0 : index
    %c0_96 = arith.constant 0 : index
    %144 = vector.load %arg22[%c0_95, %c0_96] : memref<1x128xf32, #tpu.memory_space<vmem>>, vector<1x128xf32>
    %145 = arith.addf %143, %144 : vector<1x128xf32>
    %cst_97 = arith.constant 0.000000e+00 : f32
    %146 = vector.broadcast %cst_97 : f32 to vector<1x128xf32>
    %147 = arith.subf %146, %145 : vector<1x128xf32>
    %148 = math.exp %147 : vector<1x128xf32>
    %cst_98 = arith.constant 1.000000e+00 : f32
    %149 = vector.broadcast %cst_98 : f32 to vector<1x128xf32>
    %150 = arith.addf %149, %148 : vector<1x128xf32>
    %151 = tpu.reciprocal %150 {approx = true} : vector<1x128xf32> -> vector<1x128xf32>
    %152 = vector.broadcast %151 : vector<1x128xf32> to vector<64x128xf32>
    %153 = arith.mulf %128, %152 : vector<64x128xf32>
    %154 = arith.addf %153, %31 : vector<64x128xf32>
    %cst_99 = arith.constant 0.000000e+00 : f32
    %155 = vector.broadcast %cst_99 : f32 to vector<64x128xf32>
    %156 = arith.cmpf ogt, %154, %155 : vector<64x128xf32>
    %c0_100 = arith.constant 0 : index
    %c0_101 = arith.constant 0 : index
    %157 = vector.load %arg23[%c0_100, %c0_101] : memref<1x128xf32, #tpu.memory_space<vmem>>, vector<1x128xf32>
    %158 = vector.broadcast %157 : vector<1x128xf32> to vector<64x128xf32>
    %159 = arith.mulf %158, %154 : vector<64x128xf32>
    %160 = arith.select %156, %154, %159 : vector<64x128xi1>, vector<64x128xf32>
    %c0_102 = arith.constant 0 : index
    %c0_103 = arith.constant 0 : index
    %161 = vector.load %arg24[%c0_102, %c0_103] : memref<64x128xf32, #tpu.memory_space<vmem>>, vector<64x128xf32>
    tpu.vector_store %arg24[%c0_102, %c0_103], %160 {strides = array<i32>} : memref<64x128xf32, #tpu.memory_space<vmem>>, vector<64x128xf32>,
    return
  }
  func.func @transform_0(%arg0: i32) -> (i32, i32) {
    %c0_i32 = arith.constant 0 : i32
    %c0_i32_0 = arith.constant 0 : i32
    return %arg0, %c0_i32 : i32, i32
  }
  func.func @transform_1(%arg0: i32) -> (i32, i32) {
    %c0_i32 = arith.constant 0 : i32
    %c0_i32_0 = arith.constant 0 : i32
    %c0_i32_1 = arith.constant 0 : i32
    return %c0_i32, %c0_i32_0 : i32, i32
  }
  func.func @transform_2(%arg0: i32) -> (i32, i32) {
    %c0_i32 = arith.constant 0 : i32
    %c0_i32_0 = arith.constant 0 : i32
    %c0_i32_1 = arith.constant 0 : i32
    return %c0_i32, %c0_i32_0 : i32, i32
  }
  func.func @transform_3(%arg0: i32) -> (i32, i32) {
    %c0_i32 = arith.constant 0 : i32
    %c0_i32_0 = arith.constant 0 : i32
    %c0_i32_1 = arith.constant 0 : i32
    return %c0_i32, %c0_i32_0 : i32, i32
  }
  func.func @transform_4(%arg0: i32) -> (i32, i32) {
    %c0_i32 = arith.constant 0 : i32
    %c0_i32_0 = arith.constant 0 : i32
    %c0_i32_1 = arith.constant 0 : i32
    return %c0_i32, %c0_i32_0 : i32, i32
  }
  func.func @transform_5(%arg0: i32) -> (i32, i32) {
    %c0_i32 = arith.constant 0 : i32
    %c0_i32_0 = arith.constant 0 : i32
    %c0_i32_1 = arith.constant 0 : i32
    return %c0_i32, %c0_i32_0 : i32, i32
  }
  func.func @transform_6(%arg0: i32) -> (i32, i32) {
    %c0_i32 = arith.constant 0 : i32
    %c0_i32_0 = arith.constant 0 : i32
    %c0_i32_1 = arith.constant 0 : i32
    return %c0_i32, %c0_i32_0 : i32, i32
  }
  func.func @transform_7(%arg0: i32) -> (i32, i32) {
    %c0_i32 = arith.constant 0 : i32
    %c0_i32_0 = arith.constant 0 : i32
    %c0_i32_1 = arith.constant 0 : i32
    return %c0_i32, %c0_i32_0 : i32, i32
  }
  func.func @transform_8(%arg0: i32) -> (i32, i32) {
    %c0_i32 = arith.constant 0 : i32
    %c0_i32_0 = arith.constant 0 : i32
    %c0_i32_1 = arith.constant 0 : i32
    return %c0_i32, %c0_i32_0 : i32, i32
  }
  func.func @transform_9(%arg0: i32) -> (i32, i32) {
    %c0_i32 = arith.constant 0 : i32
    %c0_i32_0 = arith.constant 0 : i32
    %c0_i32_1 = arith.constant 0 : i32
    return %c0_i32, %c0_i32_0 : i32, i32
  }
  func.func @transform_10(%arg0: i32) -> (i32, i32) {
    %c0_i32 = arith.constant 0 : i32
    %c0_i32_0 = arith.constant 0 : i32
    %c0_i32_1 = arith.constant 0 : i32
    return %c0_i32, %c0_i32_0 : i32, i32
  }
  func.func @transform_11(%arg0: i32) -> (i32, i32) {
    %c0_i32 = arith.constant 0 : i32
    %c0_i32_0 = arith.constant 0 : i32
    %c0_i32_1 = arith.constant 0 : i32
    return %c0_i32, %c0_i32_0 : i32, i32
  }
  func.func @transform_12(%arg0: i32) -> (i32, i32) {
    %c0_i32 = arith.constant 0 : i32
    %c0_i32_0 = arith.constant 0 : i32
    %c0_i32_1 = arith.constant 0 : i32
    return %c0_i32, %c0_i32_0 : i32, i32
  }
  func.func @transform_13(%arg0: i32) -> (i32, i32) {
    %c0_i32 = arith.constant 0 : i32
    %c0_i32_0 = arith.constant 0 : i32
    %c0_i32_1 = arith.constant 0 : i32
    return %c0_i32, %c0_i32_0 : i32, i32
  }
  func.func @transform_14(%arg0: i32) -> (i32, i32) {
    %c0_i32 = arith.constant 0 : i32
    %c0_i32_0 = arith.constant 0 : i32
    %c0_i32_1 = arith.constant 0 : i32
    return %c0_i32, %c0_i32_0 : i32, i32
  }
  func.func @transform_15(%arg0: i32) -> (i32, i32) {
    %c0_i32 = arith.constant 0 : i32
    %c0_i32_0 = arith.constant 0 : i32
    %c0_i32_1 = arith.constant 0 : i32
    return %c0_i32, %c0_i32_0 : i32, i32
  }
  func.func @transform_16(%arg0: i32) -> (i32, i32) {
    %c0_i32 = arith.constant 0 : i32
    %c0_i32_0 = arith.constant 0 : i32
    %c0_i32_1 = arith.constant 0 : i32
    return %c0_i32, %c0_i32_0 : i32, i32
  }
  func.func @transform_17(%arg0: i32) -> (i32, i32) {
    %c0_i32 = arith.constant 0 : i32
    %c0_i32_0 = arith.constant 0 : i32
    %c0_i32_1 = arith.constant 0 : i32
    return %c0_i32, %c0_i32_0 : i32, i32
  }
  func.func @transform_18(%arg0: i32) -> (i32, i32) {
    %c0_i32 = arith.constant 0 : i32
    %c0_i32_0 = arith.constant 0 : i32
    %c0_i32_1 = arith.constant 0 : i32
    return %c0_i32, %c0_i32_0 : i32, i32
  }
  func.func @transform_19(%arg0: i32) -> (i32, i32) {
    %c0_i32 = arith.constant 0 : i32
    %c0_i32_0 = arith.constant 0 : i32
    %c0_i32_1 = arith.constant 0 : i32
    return %c0_i32, %c0_i32_0 : i32, i32
  }
  func.func @transform_20(%arg0: i32) -> (i32, i32) {
    %c0_i32 = arith.constant 0 : i32
    %c0_i32_0 = arith.constant 0 : i32
    %c0_i32_1 = arith.constant 0 : i32
    return %c0_i32, %c0_i32_0 : i32, i32
  }
  func.func @transform_21(%arg0: i32) -> (i32, i32) {
    %c0_i32 = arith.constant 0 : i32
    %c0_i32_0 = arith.constant 0 : i32
    %c0_i32_1 = arith.constant 0 : i32
    return %c0_i32, %c0_i32_0 : i32, i32
  }
  func.func @transform_22(%arg0: i32) -> (i32, i32) {
    %c0_i32 = arith.constant 0 : i32
    %c0_i32_0 = arith.constant 0 : i32
    %c0_i32_1 = arith.constant 0 : i32
    return %c0_i32, %c0_i32_0 : i32, i32
  }
  func.func @transform_23(%arg0: i32) -> (i32, i32) {
    %c0_i32 = arith.constant 0 : i32
    %c0_i32_0 = arith.constant 0 : i32
    return %arg0, %c0_i32 : i32, i32
  }
}

</mosaic_0001>

<bundles_post_ra>
// kernel: tpu_custom_call.1
= control target key start
LH: loop header
LB: loop body
LE: loop exit
PB: predicated region body
PF: predicated region fallthrough
CT: control target
= control target key end

     0   :  { %s7045_s0 = inlined_call_operand.vmem [shape: bf16[128,144], index: 0, kind: input, shape index: {}]   ;;  %s7046_s1 = inlined_call_operand.vmem [shape: f32[576,1], index: 1, kind: input, shape index: {}]   ;;  %s7047_s2 = inlined_call_operand.hbm [shape: bf16[144,128], index: 2, kind: input, shape index: {}]   ;;  %s7048_s3 = inlined_call_operand.vmem [shape: f32[1,128], index: 3, kind: input, shape index: {}]   ;;  %s7049_s4 = inlined_call_operand.hbm [shape: f32[1,128], index: 4, kind: input, shape index: {}]   ;;  %s7050_s5 = inlined_call_operand.hbm [shape: f32[1,128], index: 5, kind: input, shape index: {}]   ;;  %s7051_s6 = inlined_call_operand.vmem [shape: bf16[128,256], index: 6, kind: input, shape index: {}]   ;;  %s7052_s7 = inlined_call_operand.vmem [shape: f32[1,256], index: 7, kind: input, shape index: {}]   ;;  %s7053_s8 = inlined_call_operand.vmem [shape: f32[1,256], index: 8, kind: input, shape index: {}]   ;;  %s7054_s9 = inlined_call_operand.hbm [shape: f32[1,256], index: 9, kind: input, shape index: {}]   ;;  %s7055_s10 = inlined_call_operand.vmem [shape: bf16[1152,128], index: 10, kind: input, shape index: {}]   ;;  %s7056_s11 = inlined_call_operand.hbm [shape: f32[1,128], index: 11, kind: input, shape index: {}]   ;;  %s7057_s12 = inlined_call_operand.hbm [shape: f32[1,128], index: 12, kind: input, shape index: {}]   ;;  %s7058_s13 = inlined_call_operand.hbm [shape: f32[1,128], index: 13, kind: input, shape index: {}]   ;;  %s7059_s14 = inlined_call_operand.hbm [shape: bf16[128,128], index: 14, kind: input, shape index: {}]   ;;  %s7060_s15 = inlined_call_operand.hbm [shape: f32[1,128], index: 15, kind: input, shape index: {}]   ;;  %s7061_s16 = inlined_call_operand.hbm [shape: f32[1,128], index: 16, kind: input, shape index: {}]   ;;  %s7062_s17 = inlined_call_operand.vmem [shape: f32[128,128], index: 17, kind: input, shape index: {}]   ;;  %s7063_s18 = inlined_call_operand.vmem [shape: f32[1,128], index: 18, kind: input, shape index: {}]   ;;  %s7064_s19 = inlined_call_operand.vmem [shape: f32[1,128], index: 19, kind: input, shape index: {}]   ;;  %s7065_s20 = inlined_call_operand.hbm [shape: f32[128,128], index: 20, kind: input, shape index: {}]   ;;  %s7066_s21 = inlined_call_operand.vmem [shape: f32[1,128], index: 21, kind: input, shape index: {}]   ;;  %s7067_s22 = inlined_call_operand.vmem [shape: f32[1,128], index: 22, kind: input, shape index: {}]   ;;  %s7068_s23 = inlined_call_operand.hbm [shape: f32[128,128], index: 23, kind: output, shape index: {}]  }
   0x1   :  { %7092 = sst [smem:[#allocation61_spill]] %s7045_s0 }
   0x2   :  { %7093 = sst [smem:[#allocation62_spill]] %s7046_s1 }
   0x3   :  { %7094 = sst [smem:[#allocation63_spill]] %s7047_s2 }
   0x4   :  { %7095 = sst [smem:[#allocation64_spill]] %s7048_s3 }
   0x5   :  { %7096 = sst [smem:[#allocation65_spill]] %s7049_s4 }
   0x6   :  { %7097 = sst [smem:[#allocation66_spill]] %s7050_s5 }
   0x7   :  { %7098 = sst [smem:[#allocation67_spill]] %s7051_s6 }
   0x8   :  { %7099 = sst [smem:[#allocation68_spill]] %s7052_s7 }
   0x9   :  { %7100 = sst [smem:[#allocation69_spill]] %s7054_s9 }
   0xa   :  { %7101 = sst [smem:[#allocation70_spill]] %s7057_s12 }
   0xb   :  { %7102 = sst [smem:[#allocation71_spill]] %s7059_s14 }
   0xc   :  { %7103 = sst [smem:[#allocation72_spill]] %s7066_s21 }
   0xd   :  { %7104 = sst [smem:[#allocation73_spill]] %s7067_s22 }
   0xe   :  { %7105 = sst [smem:[#allocation74_spill]] %s7068_s23 }
   0xf   :  { %28 = vsyncpa [#allocation4], 0 }
  0x10   :  { %29 = vsyncpa [#allocation7], 0 }
  0x11   :  { %30 = vsyncpa [#allocation10], 0 }
  0x12   :  { %31 = vsyncpa [#allocation13], 0 }
  0x13   :  { %32 = vsyncpa [#allocation16], 0 }
  0x14   :  { %33 = vsyncpa [#allocation19], 0 }
  0x15   :  { %34 = vsyncpa [#allocation5], 0 }
  0x16   :  { %36 = vsyncpa [#allocation5 + $0x1], 0  ;;  %s5485_s4 = smov 0   ;;  %s5487_s30 = smov 0  }
  0x17   :  { %s5489_s24 = smov 0   ;;  %s5491_s25 = smov 0  }
  0x18 LB: > { %7106 = sst [smem:[#allocation29_spill]] %s5329_s4  ;;  %s5506_s5 = sadd.s32 4294967295, %s5341_s25   ;;  %s5341_s25 = sphi %s5491_s25, %s7210_s25   ;;  %s5337_s24 = sphi %s5489_s24, %s7212_s24   ;;  %s5333_s30 = sphi %s5487_s30, %s7214_s30   ;;  %s5329_s4 = sphi %s5485_s4, %s7213_s4  }
  0x19   : > { %7107 = sst [smem:[#allocation30_spill]] %s5337_s24  ;;  %s3916_s1 = sadd.s32 4294967294, %s5341_s25  }
  0x1a   : > { %7108 = sst [smem:[#allocation31_spill]] %s5341_s25  ;;  %s5510_s26 = sadd.s32 1, %s5341_s25  }
  0x1b   : > { %7109 = sst [smem:[#allocation32_spill]] %s5510_s26  ;;  %s537_s2 = sadd.s32 1, %s5337_s24 }
  0x1c   : > { %s534_s6 = ssub.s32 %s5341_s25, %s5510_s26  ;;  %p547_p0 = scmp.ne.s32.totalorder %s5337_s24, %s5333_s30 }
  0x1d   : > { %p535_p1 = scmp.eq.s32.totalorder %s534_s6, 0  ;;  %p548_p2 = scmp.eq.s32.totalorder %s5506_s5, 1 }
  0x1e   : > { %p553_p3 = scmp.ne.s32.totalorder %s5333_s30, %s5329_s4  ;;  %p554_p4 = scmp.eq.s32.totalorder %s3916_s1, 1 }
  0x1f   : > { %s5521_s27 = scalar_select %p535_p1, %s5337_s24, %s537_s2  }
  0x20   : > { %p5523_p5 = por %p548_p2, %p547_p0  ;;  %p5527_p6 = por %p554_p4, %p553_p3 }
  0x21   : > { %7110 = sst [smem:[#allocation33_spill]] %s5521_s27  ;;  %p3917_p7 = scmp.ge.s32.totalorder %s5341_s25, 1 }
  0x22   : > { %s7111_s7 = scalar_select %p5523_p5, 1, 0 }
  0x23   : > { %s7113_s28 = scalar_select %p5527_p6, 1, 0 }
  0x24   : > { %7112 = sst [smem:[#allocation34_spill]] %s7111_s7  ;;  %p561_p8 = scmp.lt.s32.totalorder %s5341_s25, 3 }
  0x25   : > { %7114 = sst [smem:[#allocation35_spill]] %s7113_s28  ;;  %p7083_p9 = scmp.eq.s32.totalorder %s5506_s5, 0 }
  0x26   : > { %p5534_p10 = pnand %p3917_p7, %p561_p8  ;;  %s5343_s3 = smov [#allocation6]  }
  0x27   : > { %s593_s0 = sshll.u32 %s5343_s3, 4  ;;  %s5344_s1 = smov [#allocation9]   ;;  %s594_s0 = int_to_ptr.vmem [resolvable:$true] %s593_s0 }
  0x28   : > { %s7115_s29 = scalar_select %p5534_p10, 1, 0 }
  0x29   : > { %p4701_p11 = pneg %p5534_p10  ;;  %s624_s2 = sshll.u32 %s5344_s1, 4  ;;  %s5546_s2 = int_to_ptr.vmem [resolvable:$true] %s624_s2 }
  0x2a   : > { %s5345_s27 = smov [#allocation12]   ;;  %s7117_s3 = sld [smem:[#allocation65_spill]] }
  0x2b   : > { %p5542_p12 = pnand %p7083_p9, %p4701_p11  ;;  %s649_s24 = sshll.u32 %s5345_s27, 4  ;;  %s5548_s24 = int_to_ptr.vmem [resolvable:$true] %s649_s24 }
  0x2d   : > { %p5558_p0 = pneg %p5542_p12 }
  0x30   : > { %s4947_s4 = scalar_lea.hbm %s7117_s3, 16 }
  0x31   : > { %p4948_p13 = scmp.ne.s32.totalorder %s7117_s3, %s4947_s4  ;;  %p4954_p3 = scmp.lt.u32.totalorder %s4947_s4, %s7117_s3 }
  0x33   : > { %p4950_p1 = pnand %p5558_p0, %p4948_p13 }
  0x35   : > { %p4951_p2 = pneg %p4950_p1 }
  0x37   : > { %p4956_p4 = pnand %p4954_p3, %p4951_p2 }
  0x39   : > { %4959 = shalt.err (!%p4956_p4)
}
  0x3a   : > { %s4960_s26 = scalar_lea.vmem %s594_s0, 16  ;;  %s4967_s25 = scalar_lea.vmem %s594_s0, 32 }
  0x3b   : > { %p4961_p7 = scmp.ne.s32.totalorder %s594_s0, %s4960_s26  ;;  %p4968_p9 = scmp.lt.s32.totalorder %s594_s0, %s594_s0 }
  0x3c   : > { %p4969_p6 = scmp.lt.s32.totalorder %s4967_s25, %s4960_s26 }
  0x3d   : > { %p4963_p8 = pnand %p4961_p7, %p5558_p0 }
  0x3e   : > { %p4970_p5 = por %p4969_p6, %p4968_p9 }
  0x3f   : > { %p4964_p11 = pneg %p4963_p8 }
  0x41   : > { %p4971_p10 = pnand %p4970_p5, %p4964_p11 }
  0x43   : > { %4974 = shalt.err (!%p4971_p10)
}
  0x44   : > { %4707 = dma.hbm_to_vmem [thread:$0]  (!%p5542_p12), %s7117_s3, 16, %s594_s0, [#allocation7]  }
  0x45   : > { %s7119_s9 = sld [smem:[#allocation69_spill]] }
  0x4b   : > { %s4975_s27 = scalar_lea.hbm %s7119_s9, 32 }
  0x4c   : > { %p4976_p13 = scmp.ne.s32.totalorder %s7119_s9, %s4975_s27  ;;  %p4982_p5 = scmp.lt.u32.totalorder %s4975_s27, %s7119_s9 }
  0x4e   : > { %p4978_p1 = pnand %p4976_p13, %p5558_p0 }
  0x50   : > { %p4979_p6 = pneg %p4978_p1 }
  0x52   : > { %p4984_p9 = pnand %p4982_p5, %p4979_p6 }
  0x54   : > { %4987 = shalt.err (!%p4984_p9)
}
  0x55   : > { %s4988_s0 = scalar_lea.vmem %s5546_s2, 32  ;;  %p4996_p4 = scmp.lt.s32.totalorder %s5546_s2, %s5546_s2 }
  0x56   : > { %p4989_p10 = scmp.ne.s32.totalorder %s5546_s2, %s4988_s0  ;;  %p4997_p7 = scmp.lt.s32.totalorder %s4988_s0, %s4988_s0 }
  0x58   : > { %p4991_p2 = pnand %p4989_p10, %p5558_p0  ;;  %p4998_p8 = por %p4997_p7, %p4996_p4 }
  0x5a   : > { %p4992_p3 = pneg %p4991_p2 }
  0x5c   : > { %p4999_p11 = pnand %p4998_p8, %p4992_p3 }
  0x5e   : > { %5002 = shalt.err (!%p4999_p11)
}
  0x5f   : > { %4713 = dma.hbm_to_vmem [thread:$0]  (!%p5542_p12), %s7119_s9, 32, %s5546_s2, [#allocation10]  }
  0x60   : > { %s7120_s12 = sld [smem:[#allocation70_spill]] }
  0x66   : > { %s5003_s23 = scalar_lea.hbm %s7120_s12, 16 }
  0x67   : > { %p5004_p13 = scmp.ne.s32.totalorder %s7120_s12, %s5003_s23  ;;  %p5010_p5 = scmp.lt.u32.totalorder %s5003_s23, %s7120_s12 }
  0x69   : > { %p5006_p1 = pnand %p5004_p13, %p5558_p0 }
  0x6b   : > { %p5007_p6 = pneg %p5006_p1 }
  0x6d   : > { %p5012_p9 = pnand %p5010_p5, %p5007_p6 }
  0x6f   : > { %5015 = shalt.err (!%p5012_p9)
}
  0x70   : > { %s5016_s2 = scalar_lea.vmem %s5548_s24, 16  ;;  %s5023_s0 = scalar_lea.vmem %s5548_s24, 32 }
  0x71   : > { %p5017_p10 = scmp.ne.s32.totalorder %s5548_s24, %s5016_s2  ;;  %p5024_p4 = scmp.lt.s32.totalorder %s5548_s24, %s5548_s24 }
  0x72   : > { %p5025_p7 = scmp.lt.s32.totalorder %s5023_s0, %s5016_s2 }
  0x73   : > { %p5019_p2 = pnand %p5017_p10, %p5558_p0 }
  0x74   : > { %p5026_p8 = por %p5025_p7, %p5024_p4 }
  0x75   : > { %p5020_p3 = pneg %p5019_p2 }
  0x77   : > { %p5027_p11 = pnand %p5026_p8, %p5020_p3 }
  0x79   : > { %5030 = shalt.err (!%p5027_p11)
}
  0x7a   : > { %4719 = dma.hbm_to_vmem [thread:$0]  (!%p5542_p12), %s7120_s12, 16, %s5548_s24, [#allocation13]  }
  0x7b   : > { %s5346_s7 = smov [#allocation15]   ;;  %s5347_s23 = smov [#allocation18]  }
  0x7c   : > { %s670_s28 = sshll.u32 %s5346_s7, 4  ;;  %s695_s4 = sshll.u32 %s5347_s23, 4  ;;  %s671_s28 = int_to_ptr.vmem [resolvable:$true] %s670_s28  ;;  %s696_s4 = int_to_ptr.vmem [resolvable:$true] %s695_s4 }
  0x7d   : > { %s7121_s14 = sld [smem:[#allocation71_spill]] }
  0x83   : > { %s5031_s25 = scalar_lea.hbm %s7121_s14, 1024 }
  0x84   : > { %p5032_p13 = scmp.ne.s32.totalorder %s7121_s14, %s5031_s25  ;;  %p5038_p5 = scmp.lt.u32.totalorder %s5031_s25, %s7121_s14 }
  0x86   : > { %p5034_p1 = pnand %p5032_p13, %p5558_p0 }
  0x88   : > { %p5035_p6 = pneg %p5034_p1 }
  0x8a   : > { %p5040_p9 = pnand %p5038_p5, %p5035_p6 }
  0x8c   : > { %5043 = shalt.err (!%p5040_p9)
}
  0x8d   : > { %s5044_s24 = scalar_lea.vmem %s671_s28, 1024  ;;  %p5052_p4 = scmp.lt.s32.totalorder %s671_s28, %s671_s28 }
  0x8e   : > { %p5045_p10 = scmp.ne.s32.totalorder %s671_s28, %s5044_s24  ;;  %p5053_p7 = scmp.lt.s32.totalorder %s5044_s24, %s5044_s24 }
  0x90   : > { %p5047_p2 = pnand %p5045_p10, %p5558_p0  ;;  %p5054_p8 = por %p5053_p7, %p5052_p4 }
  0x92   : > { %p5048_p3 = pneg %p5047_p2 }
  0x94   : > { %p5055_p11 = pnand %p5054_p8, %p5048_p3 }
  0x96   : > { %5058 = shalt.err (!%p5055_p11)
}
  0x97   : > { %s7087_s22 = smov 64   ;;  %s7088_s7 = smov 4  }
  0x98   : > { %4725 = dma.hbm_to_vmem [thread:$0]  (!%p5542_p12), %s7121_s14, 1024, %s671_s28, [#allocation16], %s7087_s22, %s7087_s22, %s7088_s7  }
  0x99   : > { %s5059_s25 = scalar_lea.hbm %s7061_s16, 16 }
  0x9a   : > { %p5060_p13 = scmp.ne.s32.totalorder %s7061_s16, %s5059_s25  ;;  %p5066_p5 = scmp.lt.u32.totalorder %s5059_s25, %s7061_s16 }
  0x9c   : > { %p5062_p1 = pnand %p5060_p13, %p5558_p0 }
  0x9e   : > { %p5063_p6 = pneg %p5062_p1 }
  0xa0   : > { %p5068_p9 = pnand %p5066_p5, %p5063_p6 }
  0xa2   : > { %5071 = shalt.err (!%p5068_p9)
}
  0xa3   : > { %s5072_s3 = scalar_lea.vmem %s696_s4, 16  ;;  %s5079_s28 = scalar_lea.vmem %s696_s4, 32 }
  0xa4   : > { %p5073_p10 = scmp.ne.s32.totalorder %s696_s4, %s5072_s3  ;;  %p5080_p4 = scmp.lt.s32.totalorder %s696_s4, %s696_s4 }
  0xa5   : > { %p5081_p7 = scmp.lt.s32.totalorder %s5079_s28, %s5072_s3 }
  0xa6   : > { %p5075_p2 = pnand %p5073_p10, %p5558_p0 }
  0xa7   : > { %p5082_p8 = por %p5081_p7, %p5080_p4 }
  0xa8   : > { %p5076_p3 = pneg %p5075_p2 }
  0xaa   : > { %p5083_p11 = pnand %p5082_p8, %p5076_p3 }
  0xac   : > { %5086 = shalt.err (!%p5083_p11)
}
  0xad   : > { %4731 = dma.hbm_to_vmem [thread:$0]  (!%p5542_p12), %s7061_s16, 16, %s696_s4, [#allocation19]  }
  0xae   : > { %s5350_s26 = smov [#allocation3]   ;;  %s5351_s2 = smov [#allocation8]  }
  0xaf   : > { %s576_s25 = sshll.u32 %s5350_s26, 4  ;;  %s604_s0 = sshll.u32 %s5351_s2, 4  ;;  %s577_s25 = int_to_ptr.vmem [resolvable:$true] %s576_s25  ;;  %s605_s0 = int_to_ptr.vmem [resolvable:$true] %s604_s0 }
  0xb0   : > { %s7122_s22 = sld [smem:[#allocation63_spill]] }
  0xb6   : > { %s5087_s7 = scalar_lea.hbm %s7122_s22, 1152 }
  0xb7   : > { %p5088_p13 = scmp.ne.s32.totalorder %s7122_s22, %s5087_s7  ;;  %p5094_p5 = scmp.lt.u32.totalorder %s5087_s7, %s7122_s22 }
  0xb9   : > { %p5090_p1 = pnand %p5088_p13, %p5558_p0 }
  0xbb   : > { %p5091_p6 = pneg %p5090_p1 }
  0xbd   : > { %p5096_p9 = pnand %p5094_p5, %p5091_p6 }
  0xbf   : > { %5099 = shalt.err (!%p5096_p9)
}
  0xc0   : > { %s5100_s4 = scalar_lea.vmem %s577_s25, 1152  ;;  %p5108_p4 = scmp.lt.s32.totalorder %s577_s25, %s577_s25 }
  0xc1   : > { %p5101_p10 = scmp.ne.s32.totalorder %s577_s25, %s5100_s4  ;;  %p5109_p7 = scmp.lt.s32.totalorder %s5100_s4, %s5100_s4 }
  0xc3   : > { %p5103_p2 = pnand %p5101_p10, %p5558_p0  ;;  %p5110_p8 = por %p5109_p7, %p5108_p4 }
  0xc5   : > { %p5104_p3 = pneg %p5103_p2 }
  0xc7   : > { %p5111_p11 = pnand %p5110_p8, %p5104_p3 }
  0xc9   : > { %5114 = shalt.err (!%p5111_p11)
}
  0xca   : > { %s7123_s27 = smov 4   ;;  %s7124_s26 = smov 64  }
  0xcb   : > { %4704 = dma.hbm_to_vmem [thread:$0]  (!%p5542_p12), %s7122_s22, 1152, %s577_s25, [#allocation4], %s7124_s26, %s7124_s26, %s7123_s27  }
  0xcc   : > { %s7125_s24 = sld [smem:[#allocation66_spill]] }
  0xd2   : > { %s7126_s3 = smov %s7125_s24  ;;  %s5115_s28 = scalar_lea.hbm %s7125_s24, 16 }
  0xd3   : > { %p5116_p13 = scmp.ne.s32.totalorder %s7126_s3, %s5115_s28  ;;  %p5122_p5 = scmp.lt.u32.totalorder %s5115_s28, %s7126_s3 }
  0xd5   : > { %p5118_p1 = pnand %p5116_p13, %p5558_p0 }
  0xd7   : > { %p5119_p6 = pneg %p5118_p1 }
  0xd9   : > { %p5124_p9 = pnand %p5122_p5, %p5119_p6 }
  0xdb   : > { %5127 = shalt.err (!%p5124_p9)
}
  0xdc   : > { %s5128_s9 = scalar_lea.vmem %s605_s0, 16  ;;  %s5135_s25 = scalar_lea.vmem %s605_s0, 32 }
  0xdd   : > { %p5129_p10 = scmp.ne.s32.totalorder %s605_s0, %s5128_s9  ;;  %p5136_p4 = scmp.lt.s32.totalorder %s605_s0, %s605_s0 }
  0xde   : > { %p5137_p7 = scmp.lt.s32.totalorder %s5135_s25, %s5128_s9 }
  0xdf   : > { %p5131_p2 = pnand %p5129_p10, %p5558_p0 }
  0xe0   : > { %p5138_p8 = por %p5137_p7, %p5136_p4 }
  0xe1   : > { %p5132_p3 = pneg %p5131_p2 }
  0xe3   : > { %p5139_p11 = pnand %p5138_p8, %p5132_p3 }
  0xe5   : > { %5142 = shalt.err (!%p5139_p11)
}
  0xe6   : > { %4710 = dma.hbm_to_vmem [thread:$0]  (!%p5542_p12), %s7126_s3, 16, %s605_s0, [#allocation7]  }
  0xe7   : > { %s5352_s12 = smov [#allocation11]   ;;  %s5353_s7 = smov [#allocation14]  }
  0xe8   : > { %s638_s14 = sshll.u32 %s5352_s12, 4  ;;  %s660_s2 = sshll.u32 %s5353_s7, 4  ;;  %s639_s14 = int_to_ptr.vmem [resolvable:$true] %s638_s14  ;;  %s661_s2 = int_to_ptr.vmem [resolvable:$true] %s660_s2 }
  0xe9   : > { %s5143_s28 = scalar_lea.hbm %s7056_s11, 16 }
  0xea   : > { %p5144_p13 = scmp.ne.s32.totalorder %s7056_s11, %s5143_s28  ;;  %p5150_p5 = scmp.lt.u32.totalorder %s5143_s28, %s7056_s11 }
  0xec   : > { %p5146_p1 = pnand %p5144_p13, %p5558_p0 }
  0xee   : > { %p5147_p6 = pneg %p5146_p1 }
  0xf0   : > { %p5152_p9 = pnand %p5150_p5, %p5147_p6 }
  0xf2   : > { %5155 = shalt.err (!%p5152_p9)
}
  0xf3   : > { %s5156_s0 = scalar_lea.vmem %s639_s14, 16  ;;  %s5163_s27 = scalar_lea.vmem %s639_s14, 32 }
  0xf4   : > { %p5157_p10 = scmp.ne.s32.totalorder %s639_s14, %s5156_s0  ;;  %p5164_p4 = scmp.lt.s32.totalorder %s639_s14, %s639_s14 }
  0xf5   : > { %p5165_p7 = scmp.lt.s32.totalorder %s5163_s27, %s5156_s0 }
  0xf6   : > { %p5159_p2 = pnand %p5157_p10, %p5558_p0 }
  0xf7   : > { %p5166_p8 = por %p5165_p7, %p5164_p4 }
  0xf8   : > { %p5160_p3 = pneg %p5159_p2 }
  0xfa   : > { %p5167_p11 = pnand %p5166_p8, %p5160_p3 }
  0xfc   : > { %5170 = shalt.err (!%p5167_p11)
}
  0xfd   : > { %4716 = dma.hbm_to_vmem [thread:$0]  (!%p5542_p12), %s7056_s11, 16, %s639_s14, [#allocation10]  }
  0xfe   : > { %s5171_s24 = scalar_lea.hbm %s7058_s13, 16 }
  0xff   : > { %p5172_p13 = scmp.ne.s32.totalorder %s7058_s13, %s5171_s24  ;;  %p5178_p5 = scmp.lt.u32.totalorder %s5171_s24, %s7058_s13 }
 0x101   : > { %p5174_p1 = pnand %p5172_p13, %p5558_p0 }
 0x103   : > { %p5175_p6 = pneg %p5174_p1 }
 0x105   : > { %p5180_p9 = pnand %p5178_p5, %p5175_p6 }
 0x107   : > { %5183 = shalt.err (!%p5180_p9)
}
 0x108   : > { %s5184_s25 = scalar_lea.vmem %s661_s2, 16  ;;  %s5191_s14 = scalar_lea.vmem %s661_s2, 32 }
 0x109   : > { %p5185_p10 = scmp.ne.s32.totalorder %s661_s2, %s5184_s25  ;;  %p5192_p4 = scmp.lt.s32.totalorder %s661_s2, %s661_s2 }
 0x10a   : > { %p5193_p7 = scmp.lt.s32.totalorder %s5191_s14, %s5184_s25 }
 0x10b   : > { %p5187_p2 = pnand %p5185_p10, %p5558_p0 }
 0x10c   : > { %p5194_p8 = por %p5193_p7, %p5192_p4 }
 0x10d   : > { %p5188_p3 = pneg %p5187_p2 }
 0x10f   : > { %p5195_p11 = pnand %p5194_p8, %p5188_p3 }
 0x111   : > { %5198 = shalt.err (!%p5195_p11)
}
 0x112   : > { %4722 = dma.hbm_to_vmem [thread:$0]  (!%p5542_p12), %s7058_s13, 16, %s661_s2, [#allocation13]  }
 0x113   : > { %s5354_s26 = smov [#allocation17]   ;;  %s5355_s7 = smov [#allocation20]  }
 0x114   : > { %s684_s12 = sshll.u32 %s5354_s26, 4  ;;  %s714_s21 = sshll.u32 %s5355_s7, 4  ;;  %s685_s12 = int_to_ptr.vmem [resolvable:$true] %s684_s12  ;;  %s715_s21 = int_to_ptr.vmem [resolvable:$true] %s714_s21 }
 0x115   : > { %s5199_s23 = scalar_lea.hbm %s7060_s15, 16 }
 0x116   : > { %p5200_p13 = scmp.ne.s32.totalorder %s7060_s15, %s5199_s23  ;;  %p5206_p5 = scmp.lt.u32.totalorder %s5199_s23, %s7060_s15 }
 0x118   : > { %p5202_p1 = pnand %p5200_p13, %p5558_p0 }
 0x11a   : > { %p5203_p6 = pneg %p5202_p1 }
 0x11c   : > { %p5208_p9 = pnand %p5206_p5, %p5203_p6 }
 0x11e   : > { %5211 = shalt.err (!%p5208_p9)
}
 0x11f   : > { %s5212_s2 = scalar_lea.vmem %s685_s12, 16  ;;  %s5219_s0 = scalar_lea.vmem %s685_s12, 32 }
 0x120   : > { %p5213_p10 = scmp.ne.s32.totalorder %s685_s12, %s5212_s2  ;;  %p5220_p4 = scmp.lt.s32.totalorder %s685_s12, %s685_s12 }
 0x121   : > { %p5221_p7 = scmp.lt.s32.totalorder %s5219_s0, %s5212_s2 }
 0x122   : > { %p5215_p2 = pnand %p5213_p10, %p5558_p0 }
 0x123   : > { %p5222_p8 = por %p5221_p7, %p5220_p4 }
 0x124   : > { %p5216_p3 = pneg %p5215_p2 }
 0x126   : > { %p5223_p11 = pnand %p5222_p8, %p5216_p3 }
 0x128   : > { %5226 = shalt.err (!%p5223_p11)
}
 0x129   : > { %4728 = dma.hbm_to_vmem [thread:$0]  (!%p5542_p12), %s7060_s15, 16, %s685_s12, [#allocation16]  }
 0x12a   : > { %s5227_s28 = scalar_lea.hbm %s7065_s20, 2048 }
 0x12b   : > { %p5228_p13 = scmp.ne.s32.totalorder %s7065_s20, %s5227_s28  ;;  %p5234_p5 = scmp.lt.u32.totalorder %s5227_s28, %s7065_s20 }
 0x12d   : > { %p5230_p1 = pnand %p5228_p13, %p5558_p0 }
 0x12f   : > { %p5231_p6 = pneg %p5230_p1 }
 0x131   : > { %p5236_p9 = pnand %p5234_p5, %p5231_p6 }
 0x133   : > { %5239 = shalt.err (!%p5236_p9)
}
 0x134   : > { %s5240_s14 = scalar_lea.vmem %s715_s21, 2048  ;;  %p5248_p4 = scmp.lt.s32.totalorder %s715_s21, %s715_s21 }
 0x135   : > { %p5241_p10 = scmp.ne.s32.totalorder %s715_s21, %s5240_s14  ;;  %p5249_p7 = scmp.lt.s32.totalorder %s5240_s14, %s5240_s14 }
 0x137   : > { %p5243_p2 = pnand %p5241_p10, %p5558_p0  ;;  %p5250_p8 = por %p5249_p7, %p5248_p4 }
 0x139   : > { %p5244_p3 = pneg %p5243_p2 }
 0x13b   : > { %p5251_p11 = pnand %p5250_p8, %p5244_p3 }
 0x13d   : > { %5254 = shalt.err (!%p5251_p11)
}
 0x13e   : > { %s5356_s12 = smov 128   ;;  %s5357_s2 = smov 8  }
 0x13f   : > { %4734 = dma.hbm_to_vmem [thread:$0]  (!%p5542_p12), %s7065_s20, 2048, %s715_s21, [#allocation19], %s5356_s12, %s5356_s12, %s5357_s2  }
 0x140   : > { %p7127_p13 = scmp.ne.s32.totalorder %s7115_s29, 0 }
 0x142   : > { %746 = sbr.rel (%p7127_p13) target bundleno = 2005 (0x7d5), region = 112 }
 0x149   : > { %p7128_p1 = scmp.eq.s32.totalorder %s5506_s5, 0 }
 0x14b   : > { %5300 = dma.done.wait (%p7128_p1), [#allocation4], 1152   ;;  %p7129_p0 = pmov %p7128_p1 }
 0x14d   : > { %5302 = vsyncadd (%p7129_p0), [#allocation4], 4294966144  ;;  %p7130_p6 = pmov %p7129_p0 }
 0x14e   : > { %p7131_p5 = pmov %p7129_p0 }
 0x14f   : > { %5304 = dma.done.wait (%p7130_p6), [#allocation7], 32  }
 0x150   : > { %5306 = vsyncadd (%p7131_p5), [#allocation7], 4294967264  ;;  %p7132_p9 = pmov %p7129_p0 }
 0x151   : > { %p7133_p12 = pmov %p7129_p0 }
 0x152   : > { %5308 = dma.done.wait (%p7132_p9), [#allocation10], 48  }
 0x153   : > { %5310 = vsyncadd (%p7133_p12), [#allocation10], 4294967248  ;;  %p7134_p10 = pmov %p7129_p0 }
 0x154   : > { %p7135_p2 = pmov %p7129_p0 }
 0x155   : > { %5312 = dma.done.wait (%p7134_p10), [#allocation13], 32  }
 0x156   : > { %5314 = vsyncadd (%p7135_p2), [#allocation13], 4294967264  ;;  %p7136_p3 = pmov %p7129_p0 }
 0x157   : > { %p7137_p4 = pmov %p7129_p0 }
 0x158   : > { %5316 = dma.done.wait (%p7136_p3), [#allocation16], 1040  }
 0x159   : > { %5318 = vsyncadd (%p7137_p4), [#allocation16], 4294966256  ;;  %p7138_p7 = pmov %p7129_p0 }
 0x15a   : > { %p7139_p8 = pmov %p7129_p0 }
 0x15b   : > { %5320 = dma.done.wait (%p7138_p7), [#allocation19], 2064  }
 0x15c   : > { %5322 = vsyncadd (%p7139_p8), [#allocation19], 4294965232  ;;  %s3943_s29 = sshll.u32 %s5506_s5, 3  ;;  %v5358_v0 = vmov 0   ;;  %v4817_v1 = vld [vmem:[#allocation3] sm:$0xff]   ;;  %v4818_v2 = vld [vmem:[#allocation3 + $0x8] sm:$0xff]  }
 0x15d   : > { %989 = vmatprep.subr.bf16.mxu0 %v5358_v0  ;;  %4815 = vset.pattern.permute.xlu0 %v5358_v0  ;;  %p852_p11 = scmp.lt.s32.totalorder %s3943_s29, 15  ;;  %v4819_v3 = vld [vmem:[#allocation3 + $0x10] sm:$0xff]   ;;  %s7140_s26 = sld [smem:[#allocation61_spill]]  ;;  %v4820_v4 = vld [vmem:[#allocation3 + $0x18] sm:$0xff]   ;;  %vm976_vm0 = vcmask 130048   ;;  %v4821_v6 = vld [vmem:[#allocation3 + $0x20] sm:$0xff]  }
 0x15e   : > { %4816 = vset.pattern.permute.xlu1 %v5358_v0  ;;  %990 = vmatpush1.bf16.msra.mxu0 %v4817_v1  ;;  %s7141_s23 = sld [smem:[#allocation62_spill]]  ;;  %v4822_v11 = vld [vmem:[#allocation3 + $0x28] sm:$0xff]   ;;  %v4823_v14 = vld [vmem:[#allocation3 + $0x30] sm:$0xff]   ;;  %v4824_v15 = vld [vmem:[#allocation3 + $0x38] sm:$0xff]   ;;  %s7142_s2 = sld [smem:[#allocation67_spill]] }
 0x15f   : > { %s7216_s29 = smov (!%p852_p11, %s3943_s29), 15  ;;  %991 = vmatprep.subr.bf16.mxu0 %v5358_v0  ;;  %v4825_v20 = vld [vmem:[#allocation3 + $0x40] sm:$0xff]   ;;  %s7143_s25 = sld [smem:[#allocation64_spill]] }
 0x160   : > { %s4077_s6 = sshll.u32 %s7216_s29, 3  ;;  %s7194_s27 = sld [smem:[#allocation72_spill]] }
 0x161   : > { %s848_s29 = sand.u32 1, %s5333_s30   ;;  %s7196_s21 = sld [smem:[#allocation73_spill]] }
 0x162   : > { %992 = vmatpush1.bf16.msra.mxu0 %v4818_v2  ;;  %s7203_s9 = sld [smem:[#allocation74_spill]]  ;;  %s7204_s14 = sld [smem:[#allocation34_spill]] }
 0x163   : > { %993 = vmatprep.subr.bf16.mxu0 %v5358_v0  ;;  %s5806_s7 = scalar_lea.vmem %s7140_s26, %s4077_s6  ;;  %s3942_s6 = sshll.u32 %s848_s29, 6 }
 0x164   : > { %v4828_v5 = vld [vmem:[%s5806_s7 + $0x4] ss:$8 sps:$4 sm:$0xff]   ;;  %v1820_v8 = vld [vmem:[%s7141_s23 + $0x90] sm:$0xff]  ;;  %v1821_v10 = vld [vmem:[%s7141_s23 + $0x98] sm:$0xff]  ;;  %s4078_s26 = sshll.u32 %s5506_s5, 10  ;;  %s6984_s24 = scalar_lea.vmem [#allocation21], %s3942_s6 }
 0x165   : > { %3963 = vmatprep.mubr.msk.bf16.mxu0 %vm976_vm0, %v4828_v5  ;;  %v1818_v7 = vld [vmem:[%s7141_s23 + $0x80] sm:$0xff]  ;;  %1846 = vperm.xlu1 %4816, %v1820_v8   ;;  %v1819_v9 = vld [vmem:[%s7141_s23 + $0x88] sm:$0xff]  ;;  %v1824_v16 = vld [vmem:[%s7141_s23 + $0xb0] sm:$0xff]  ;;  %s3747_s28 = sshll.u32 %s6984_s24, 4  ;;  %s7004_s12 = scalar_lea.sflag [#allocation5], %s848_s29  ;;  %s6992_s28 = int_to_ptr.vmem [resolvable:$true] %s3747_s28 }
 0x166   : > { %994 = vmatpush1.bf16.msra.mxu0 %v4819_v3  ;;  %1836 = vperm.xlu0 %4815, %v1818_v7   ;;  %v1822_v12 = vld [vmem:[%s7141_s23 + $0xa0] sm:$0xff]  ;;  %v1823_v13 = vld [vmem:[%s7141_s23 + $0xa8] sm:$0xff]  ;;  %v1825_v17 = vld [vmem:[%s7141_s23 + $0xb8] sm:$0xff]  ;;  %s5255_s0 = scalar_lea.vmem %s6992_s28, 1024 }
 0x167   : > { %995 = vmatprep.subr.bf16.mxu0 %v5358_v0  ;;  %v2023_v18 = vld [vmem:[%s7141_s23 + $0xc0] sm:$0xff]  ;;  %v2024_v19 = vld [vmem:[%s7141_s23 + $0xc8] sm:$0xff]  ;;  %v2025_v22 = vld [vmem:[%s7141_s23 + $0xd0] sm:$0xff]  ;;  %p5256_p13 = scmp.ne.s32.totalorder %s6992_s28, %s5255_s0 }
 0x168   : > { %v4840_v21 = vld [vmem:[%s7142_s2 + $0x4] ss:$8 sps:$4 sm:$0xff]   ;;  %v4826_v23 = vld [vmem:[%s5806_s7] ss:$8 sps:$4 sm:$0xff]   ;;  %v2026_v24 = vld [vmem:[%s7141_s23 + $0xd8] sm:$0xff]  ;;  %p7205_p1 = scmp.ne.s32.totalorder %s7204_s14, 0 }
 0x169   : > { %1851 = vperm.xlu1 %4816, %v1821_v10   ;;  %v4829_v25 = vld [vmem:[%s5806_s7 + $0x14] ss:$8 sps:$4 sm:$0xff]   ;;  %v4838_v26 = vld [vmem:[%s7142_s2] ss:$8 sps:$4 sm:$0xff]   ;;  %v4841_v28 = vld [vmem:[%s7142_s2 + $0x10] ss:$8 sps:$4 sm:$0xff]  }
 0x16a   : > { %996 = vmatpush1.bf16.msra.mxu0 %v4820_v4  ;;  %1841 = vperm.xlu0 %4815, %v1819_v9   ;;  %v4843_v27 = vld [vmem:[%s7142_s2 + $0x14] ss:$8 sps:$4 sm:$0xff]   ;;  %v4846_v29 = vld [vmem:[%s7142_s2 + $0x24] ss:$8 sps:$4 sm:$0xff]   ;;  %v4831_v30 = vld [vmem:[%s5806_s7 + $0x10] ss:$8 sps:$4 sm:$0xff]   ;;  %p5257_p0 = pnand %p5256_p13, %p7205_p1 }
 0x16b   : > { %997 = vmatprep.subr.bf16.mxu0 %v5358_v0  ;;  %v4832_v31 = vld [vmem:[%s5806_s7 + $0x24] ss:$8 sps:$4 sm:$0xff]   ;;  %v4844_v32 = vld [vmem:[%s7142_s2 + $0x20] ss:$8 sps:$4 sm:$0xff]   ;;  %v4849_v33 = vld [vmem:[%s7142_s2 + $0x34] ss:$8 sps:$4 sm:$0xff]  }
 0x16c   : > { %v4847_v34 = vld [vmem:[%s7142_s2 + $0x30] ss:$8 sps:$4 sm:$0xff]   ;;  %v4852_v35 = vld [vmem:[%s7142_s2 + $0x44] ss:$8 sps:$4 sm:$0xff]   ;;  %v4834_v36 = vld [vmem:[%s5806_s7 + $0x20] ss:$8 sps:$4 sm:$0xff]   ;;  %p5258_p6 = pneg %p5257_p0 }
 0x16d   : > { %1861 = vperm.xlu1 %4816, %v1823_v13   ;;  %v4835_v37 = vld [vmem:[%s5806_s7 + $0x34] ss:$8 sps:$4 sm:$0xff]   ;;  %v4850_v38 = vld [vmem:[%s7142_s2 + $0x40] ss:$8 sps:$4 sm:$0xff]   ;;  %v4853_v40 = vld [vmem:[%s7142_s2 + $0x50] ss:$8 sps:$4 sm:$0xff]  }
 0x16e   : > { %998 = vmatpush1.bf16.msra.mxu0 %v4821_v6  ;;  %1856 = vperm.xlu0 %4815, %v1822_v12   ;;  %v4855_v39 = vld [vmem:[%s7142_s2 + $0x54] ss:$8 sps:$4 sm:$0xff]   ;;  %v4837_v41 = vld [vmem:[%s5806_s7 + $0x30] ss:$8 sps:$4 sm:$0xff]   ;;  %v2027_v42 = vld [vmem:[%s7141_s23 + $0xe0] sm:$0xff]  ;;  %v5359_v12 = vmov 0.0  }
 0x16f   : > { %999 = vmatprep.subr.bf16.mxu0 %v5358_v0  ;;  %v2028_v43 = vld [vmem:[%s7141_s23 + $0xe8] sm:$0xff]  ;;  %v2029_v46 = vld [vmem:[%s7141_s23 + $0xf0] sm:$0xff]  ;;  %v2030_v47 = vld [vmem:[%s7141_s23 + $0xf8] sm:$0xff]  ;;  %1405 = vst [vmem:[#allocation2 + $0x8] sm:$0xff] %v5359_v12  ;;  %s7145_s7 = sld [smem:[#allocation68_spill]] }
 0x170   : > { %v4858_v44 = vld [vmem:[%s7142_s2 + $0x64] ss:$8 sps:$4 sm:$0xff]   ;;  %v4856_v45 = vld [vmem:[%s7142_s2 + $0x60] ss:$8 sps:$4 sm:$0xff]   ;;  %v4861_v48 = vld [vmem:[%s7142_s2 + $0x74] ss:$8 sps:$4 sm:$0xff]  }
 0x171   : > { %1871 = vperm.xlu1 %4816, %v1825_v17   ;;  %v4859_v49 = vld [vmem:[%s7142_s2 + $0x70] ss:$8 sps:$4 sm:$0xff]   ;;  %v2228_v50 = vld [vmem:[%s7141_s23 + $0x100] sm:$0xff]  ;;  %v2229_v51 = vld [vmem:[%s7141_s23 + $0x108] sm:$0xff]  ;;  %1404 = vst [vmem:[#allocation2] sm:$0xff] %v5359_v12 }
 0x172   : > { %1000 = vmatpush1.bf16.msra.mxu0 %v4822_v11  ;;  %1866 = vperm.xlu0 %4815, %v1824_v16   ;;  %v2230_v52 = vld [vmem:[%s7141_s23 + $0x110] sm:$0xff]  ;;  %v2231_v53 = vld [vmem:[%s7141_s23 + $0x118] sm:$0xff]  ;;  %v2232_v54 = vld [vmem:[%s7141_s23 + $0x120] sm:$0xff]  ;;  %1414 = vst [vmem:[#allocation2 + $0x50] sm:$0xff] %v5359_v12 }
 0x173   : > { %1001 = vmatprep.subr.bf16.mxu0 %v5358_v0  ;;  %v2233_v55 = vld [vmem:[%s7141_s23 + $0x128] sm:$0xff]  ;;  %v2234_v56 = vld [vmem:[%s7141_s23 + $0x130] sm:$0xff]  ;;  %v2235_v57 = vld [vmem:[%s7141_s23 + $0x138] sm:$0xff]  ;;  %1415 = vst [vmem:[#allocation2 + $0x58] sm:$0xff] %v5359_v12 }
 0x174   : > { %v2433_v58 = vld [vmem:[%s7141_s23 + $0x140] sm:$0xff]  ;;  %v2434_v59 = vld [vmem:[%s7141_s23 + $0x148] sm:$0xff]  ;;  %v2435_v60 = vld [vmem:[%s7141_s23 + $0x150] sm:$0xff] }
 0x175   : > { %2046 = vperm.xlu1 %4816, %v2024_v19   ;;  %v2436_v61 = vld [vmem:[%s7141_s23 + $0x158] sm:$0xff]  ;;  %v2437_v62 = vld [vmem:[%s7141_s23 + $0x160] sm:$0xff]  ;;  %v2438_v63 = vld [vmem:[%s7141_s23 + $0x168] sm:$0xff] }
 0x176   : > { %1002 = vmatpush1.bf16.msra.mxu0 %v4823_v14  ;;  %2041 = vperm.xlu0 %4815, %v2023_v18   ;;  %v2439_v1 = vld [vmem:[%s7141_s23 + $0x170] sm:$0xff]  ;;  %v2440_v2 = vld [vmem:[%s7141_s23 + $0x178] sm:$0xff]  ;;  %v2638_v3 = vld [vmem:[%s7141_s23 + $0x180] sm:$0xff] }
 0x177   : > { %1003 = vmatprep.subr.bf16.mxu0 %v5358_v0  ;;  %v2639_v4 = vld [vmem:[%s7141_s23 + $0x188] sm:$0xff]  ;;  %v2640_v5 = vld [vmem:[%s7141_s23 + $0x190] sm:$0xff]  ;;  %v2641_v6 = vld [vmem:[%s7141_s23 + $0x198] sm:$0xff] }
 0x178   : > { %v2642_v7 = vld [vmem:[%s7141_s23 + $0x1a0] sm:$0xff]  ;;  %v2643_v8 = vld [vmem:[%s7141_s23 + $0x1a8] sm:$0xff]  ;;  %v2644_v9 = vld [vmem:[%s7141_s23 + $0x1b0] sm:$0xff] }
 0x179   : > { %2056 = vperm.xlu1 %4816, %v2026_v24   ;;  %v2645_v10 = vld [vmem:[%s7141_s23 + $0x1b8] sm:$0xff]  ;;  %v1508_v11 = vld [vmem:[%s7141_s23 + $0x40] sm:$0xff]  ;;  %v1509_v13 = vld [vmem:[%s7141_s23 + $0x48] sm:$0xff] }
 0x17a   : > { %1004 = vmatpush1.bf16.msra.mxu0 %v4824_v15  ;;  %2051 = vperm.xlu0 %4815, %v2025_v22   ;;  %v2843_v14 = vld [vmem:[%s7141_s23 + $0x1c0] sm:$0xff]  ;;  %v2844_v15 = vld [vmem:[%s7141_s23 + $0x1c8] sm:$0xff]  ;;  %v1510_v16 = vld [vmem:[%s7141_s23 + $0x50] sm:$0xff] }
 0x17b   : > { %1005 = vmatprep.subr.bf16.mxu0 %v5358_v0  ;;  %v1511_v17 = vld [vmem:[%s7141_s23 + $0x58] sm:$0xff]  ;;  %v2845_v18 = vld [vmem:[%s7141_s23 + $0x1d0] sm:$0xff]  ;;  %v2847_v22 = vld [vmem:[%s7141_s23 + $0x1e0] sm:$0xff] }
 0x17c   : > { %v2846_v19 = vld [vmem:[%s7141_s23 + $0x1d8] sm:$0xff]  ;;  %v1514_v24 = vld [vmem:[%s7141_s23 + $0x70] sm:$0xff] }
 0x17d   : > { %2066 = vperm.xlu1 %4816, %v2028_v43   ;;  %v1431_v43 = vld [vmem:[%s7141_s23 + $0x38] sm:$0xff] }
 0x17e   : > { %1006 = vmatpush1.bf16.msra.mxu0 %v4825_v20  ;;  %2061 = vperm.xlu0 %4815, %v2027_v42   ;;  %v1512_v20 = vld [vmem:[%s7141_s23 + $0x60] sm:$0xff]  ;;  %v1430_v42 = vld [vmem:[%s7141_s23 + $0x30] sm:$0xff] }
 0x17f   : > { %1215 = vmatprep.subr.bf16.mxu0 %v4840_v21  ;;  %v1513_v21 = vld [vmem:[%s7141_s23 + $0x68] sm:$0xff] }
 0x181   : > { %1022 = vmatmul.mubr.bf16.vlgmr.msra.gmra.mrb[0].mxu0 %v4826_v23  ;;  %2076 = vperm.xlu1 %4816, %v2030_v47   ;;  %v2848_v23 = vld [vmem:[%s7141_s23 + $0x1e8] sm:$0xff] }
 0x182   : > { %3964 = vmatprep.mubr.msk.bf16.mxu0 %vm976_vm0, %v4829_v25  ;;  %1216 = vmatpush1.bf16.msra.mxu0 %v4838_v26  ;;  %v1515_v25 = vld [vmem:[%s7141_s23 + $0x78] sm:$0xff]  ;;  %v2849_v26 = vld [vmem:[%s7141_s23 + $0x1f0] sm:$0xff] }
 0x183   : > { %1217 = vmatprep.subr.bf16.mxu0 %v4843_v27  ;;  %2071 = vperm.xlu0 %4815, %v2029_v46   ;;  %v2850_v27 = vld [vmem:[%s7141_s23 + $0x1f8] sm:$0xff]  ;;  %v3967_v46 = vld [vmem:[%s7143_s25] ss:$0 sm:$0xff]  ;;  %s6990_s25 = scalar_lea.hbm %s7203_s9, %s4078_s26 }
 0x185   : > { %2251 = vperm.xlu1 %4816, %v2229_v51   ;;  %v3969_v51 = vld [vmem:[#allocation8] ss:$0 sm:$0xff] }
 0x186   : > { %1218 = vmatpush1.bf16.msra.mxu0 %v4841_v28  ;;  %v1424_v28 = vld [vmem:[%s7141_s23] sm:$0xff] }
 0x187   : > { %1219 = vmatprep.subr.bf16.mxu0 %v4846_v29  ;;  %2246 = vperm.xlu0 %4815, %v2228_v50   ;;  %v1425_v29 = vld [vmem:[%s7141_s23 + $0x8] sm:$0xff] }
 0x189   : > { %1030 = vmatmul.mubr.bf16.gmra.mrb[4].mxu0 %v4831_v30  ;;  %2261 = vperm.xlu1 %4816, %v2231_v53   ;;  %v4862_v30 = vld [vmem:[%s7055_s10 + $0x40] sm:$0xff]  }
 0x18a   : > { %3965 = vmatprep.mubr.msk.bf16.mxu0 %vm976_vm0, %v4832_v31  ;;  %1220 = vmatpush1.bf16.msra.mxu0 %v4844_v32  ;;  %v3048_v31 = vld [vmem:[%s7141_s23 + $0x200] sm:$0xff]  ;;  %v3049_v32 = vld [vmem:[%s7141_s23 + $0x208] sm:$0xff] }
 0x18b   : > { %1221 = vmatprep.subr.bf16.mxu0 %v4849_v33  ;;  %2256 = vperm.xlu0 %4815, %v2230_v52   ;;  %v4863_v33 = vld [vmem:[%s7055_s10 + $0x80] sm:$0xff]  }
 0x18c   : > { %4281 = vmatprep.subr.bf16.mxu1 %v4863_v33 }
 0x18d   : > { %2271 = vperm.xlu1 %4816, %v2233_v55   ;;  %4282 = vmatpush3.bf16.msra.mxu1 %v4863_v33 }
 0x18e   : > { %1222 = vmatpush1.bf16.msra.mxu0 %v4847_v34  ;;  %v1426_v34 = vld [vmem:[%s7141_s23 + $0x10] sm:$0xff] }
 0x18f   : > { %1223 = vmatprep.subr.bf16.mxu0 %v4852_v35  ;;  %2266 = vperm.xlu0 %4815, %v2232_v54   ;;  %v1427_v35 = vld [vmem:[%s7141_s23 + $0x18] sm:$0xff] }
 0x191   : > { %1038 = vmatmul.mubr.bf16.gmra.mrb[8].mxu0 %v4834_v36  ;;  %2281 = vperm.xlu1 %4816, %v2235_v57   ;;  %v3050_v36 = vld [vmem:[%s7141_s23 + $0x210] sm:$0xff] }
 0x192   : > { %3966 = vmatprep.mubr.msk.bf16.mxu0 %vm976_vm0, %v4835_v37  ;;  %1224 = vmatpush1.bf16.msra.mxu0 %v4850_v38  ;;  %v3051_v37 = vld [vmem:[%s7141_s23 + $0x218] sm:$0xff]  ;;  %v1428_v38 = vld [vmem:[%s7141_s23 + $0x20] sm:$0xff] }
 0x193   : > { %1225 = vmatprep.subr.bf16.mxu0 %v4855_v39  ;;  %2276 = vperm.xlu0 %4815, %v2234_v56   ;;  %v1429_v39 = vld [vmem:[%s7141_s23 + $0x28] sm:$0xff] }
 0x195   : > { %2456 = vperm.xlu1 %4816, %v2434_v59  }
 0x196   : > { %1226 = vmatpush1.bf16.msra.mxu0 %v4853_v40  ;;  %v3052_v40 = vld [vmem:[%s7141_s23 + $0x220] sm:$0xff] }
 0x197   : > { %1227 = vmatprep.subr.bf16.mxu0 %v4858_v44  ;;  %2451 = vperm.xlu0 %4815, %v2433_v58   ;;  %v3054_v44 = vld [vmem:[%s7141_s23 + $0x230] sm:$0xff] }
 0x199   : > { %1046 = vmatmul.mubr.bf16.gmra.mrb[12].mxu0 %v4837_v41  ;;  %2466 = vperm.xlu1 %4816, %v2436_v61   ;;  %v3053_v41 = vld [vmem:[%s7141_s23 + $0x228] sm:$0xff] }
 0x19a   : > { %1247 = vmatprep.mubr.bf16.mxu0 %v5358_v0  ;;  %1228 = vmatpush1.bf16.msra.mxu0 %v4856_v45  ;;  %v3055_v45 = vld [vmem:[%s7141_s23 + $0x238] sm:$0xff] }
 0x19b   : > { %1229 = vmatprep.subr.bf16.mxu0 %v4861_v48  ;;  %2461 = vperm.xlu0 %4815, %v2435_v60   ;;  %v3968_v48 = vld [vmem:[#allocation6] ss:$0 sm:$0xff] }
 0x19d   : > { %2476 = vperm.xlu1 %4816, %v2438_v63  }
 0x19e   : > { %1230 = vmatpush1.bf16.msra.mxu0 %v4859_v49 }
 0x19f   : > { %2471 = vperm.xlu0 %4815, %v2437_v62   ;;  %4233 = vmatprep.subr.bf16.mxu0 %v4862_v30 }
 0x1a1   : > { %2486 = vperm.xlu1 %4816, %v2440_v2  }
 0x1a3   : > { %2481 = vperm.xlu0 %4815, %v2439_v1  }
 0x1a5   : > { %2661 = vperm.xlu1 %4816, %v2639_v4  }
 0x1a7   : > { %2656 = vperm.xlu0 %4815, %v2638_v3  }
 0x1a9   : > { %2671 = vperm.xlu1 %4816, %v2641_v6  }
 0x1ab   : > { %2666 = vperm.xlu0 %4815, %v2640_v5  }
 0x1ad   : > { %2681 = vperm.xlu1 %4816, %v2643_v8  }
 0x1af   : > { %2676 = vperm.xlu0 %4815, %v2642_v7  }
 0x1b1   : > { %2691 = vperm.xlu1 %4816, %v2645_v10  }
 0x1b3   : > { %2686 = vperm.xlu0 %4815, %v2644_v9  }
 0x1b5   : > { %1531 = vperm.xlu1 %4816, %v1509_v13  }
 0x1b7   : > { %1526 = vperm.xlu0 %4815, %v1508_v11  }
 0x1b9   : > { %2866 = vperm.xlu1 %4816, %v2844_v15  }
 0x1bb   : > { %2861 = vperm.xlu0 %4815, %v2843_v14  }
 0x1bd   : > { %1541 = vperm.xlu1 %4816, %v1511_v17  }
 0x1bf   : > { %1536 = vperm.xlu0 %4815, %v1510_v16  }
 0x1c1   : > { %2876 = vperm.xlu1 %4816, %v2846_v19  }
 0x1c3   : > { %2871 = vperm.xlu0 %4815, %v2845_v18  }
 0x1c5   : > { %1551 = vperm.xlu1 %4816, %v1513_v21  }
 0x1c7   : > { %1546 = vperm.xlu0 %4815, %v1512_v20  }
 0x1c9   : > { %2886 = vperm.xlu1 %4816, %v2848_v23  }
 0x1cb   : > { %2881 = vperm.xlu0 %4815, %v2847_v22  }
 0x1cd   : > { %1561 = vperm.xlu1 %4816, %v1515_v25  }
 0x1cf   : > { %1556 = vperm.xlu0 %4815, %v1514_v24  }
 0x1d1   : > { %2896 = vperm.xlu1 %4816, %v2850_v27  }
 0x1d3   : > { %2891 = vperm.xlu0 %4815, %v2849_v26  }
 0x1d5   : > { %1447 = vperm.xlu1 %4816, %v1425_v29  }
 0x1d7   : > { %1442 = vperm.xlu0 %4815, %v1424_v28  }
 0x1d9   : > { %3071 = vperm.xlu1 %4816, %v3049_v32  }
 0x1db   : > { %3066 = vperm.xlu0 %4815, %v3048_v31  }
 0x1dd   : > { %1457 = vperm.xlu1 %4816, %v1427_v35  }
 0x1df   : > { %1452 = vperm.xlu0 %4815, %v1426_v34  }
 0x1e1   : > { %3081 = vperm.xlu1 %4816, %v3051_v37  }
 0x1e3   : > { %3076 = vperm.xlu0 %4815, %v3050_v36  }
 0x1e5   : > { %1467 = vperm.xlu1 %4816, %v1429_v39   ;;  %v6105_v39 = vpop.permute.xlu0 %1836 }
 0x1e7   : > { %1462 = vperm.xlu0 %4815, %v1428_v38   ;;  %v6103_v38 = vpop.permute.xlu1 %1846 }
 0x1e9   : > { %3091 = vperm.xlu1 %4816, %v3053_v41   ;;  %v6109_v41 = vpop.permute.xlu0 %1841 }
 0x1eb   : > { %3086 = vperm.xlu0 %4815, %v3052_v40   ;;  %v6107_v40 = vpop.permute.xlu1 %1851 }
 0x1ed   : > { %1477 = vperm.xlu1 %4816, %v1431_v43   ;;  %v6116_v43 = vpop.permute.xlu0 %1856 }
 0x1ef   : > { %1472 = vperm.xlu0 %4815, %v1430_v42   ;;  %v6111_v42 = vpop.permute.xlu1 %1861 }
 0x1f1   : > { %3101 = vperm.xlu1 %4816, %v3055_v45   ;;  %v4866_v45 = vld [vmem:[%s7055_s10 + $0x50] sm:$0xff]  }
 0x1f3   : > { %3096 = vperm.xlu0 %4815, %v3054_v44   ;;  %v1290_v44 = vlaneseq }
 0x254   : > { %v1023_v47 = vpop.f32.mrb[0].mxu0 }
 0x255   : > { %v1061_v49 = vmul.f32 %v3967_v46, %v1023_v47  ;;  %v1025_v50 = vpop.f32.mrb[1].mxu0  ;;  %v6123_v47 = vpop.permute.xlu1 %1871 }
 0x256   : > { %v1026_v52 = vpop.f32.mrb[2].mxu0  ;;  %v6133_v50 = vld [vmem:[%s7145_s7] sm:$0x3] }
 0x257   : > { %v1076_v53 = vadd.f32 %v3968_v48, %v1061_v49  ;;  %v1062_v54 = vmul.f32 %v3967_v46, %v1026_v52  ;;  %v1028_v55 = vpop.f32.mrb[3].mxu0  ;;  %v6128_v49 = vpop.permute.xlu0 %1866 }
 0x259   : > { %v1099_v56 = vmul.f32 %v3969_v51, %v1076_v53  ;;  %v1077_v57 = vadd.f32 %v3968_v48, %v1062_v54  ;;  %vm1084_vm1 = vcmp.gt.f32.partialorder %v1076_v53, 0.0  ;;  %v4865_v54 = vld [vmem:[%s7055_s10 + $0x88] sm:$0xff]  }
 0x25a   : > { %4283 = vmatprep.subr.bf16.mxu1 %v4865_v54 }
 0x25b   : > { %vm1085_vm2 = vcmp.gt.f32.partialorder %v1077_v57, 0.0  ;;  %v1100_v58 = vmul.f32 %v3969_v51, %v1077_v57  ;;  %v1107_v60 = vsel %vm1084_vm1, %v1076_v53, %v1099_v56  ;;  %v6145_v53 = vld [vmem:[%s7053_s8] sm:$0x3]  ;;  %v6154_v56 = vpop.permute.xlu1 %2046  ;;  %4284 = vmatpush3.bf16.msra.mxu1 %v4865_v54 }
 0x25c   : > { %v1031_v59 = vpop.f32.mrb[4].mxu0 }
 0x25d   : > { %v1108_v61 = vsel %vm1085_vm2, %v1077_v57, %v1100_v58  ;;  %v1063_v62 = vmul.f32 %v3967_v46, %v1031_v59  ;;  %v1033_v63 = vpop.f32.mrb[5].mxu0  ;;  %v6156_v57 = vld [vmem:[#allocation9] sm:$0x3]  ;;  %v4870_v58 = vld [vmem:[%s7055_s10 + $0x60] sm:$0xff]  }
 0x25e   : > { %v1115_v1 = vpack.c.bf16 %v1108_v61, %v1107_v60  ;;  %v1034_v2 = vpop.f32.mrb[6].mxu0  ;;  %v6165_v60 = vpop.permute.xlu0 %2041  ;;  %v4867_v61 = vld [vmem:[%s7055_s10 + $0x90] sm:$0xff]  }
 0x25f   : > { %v1078_v3 = vadd.f32 %v3968_v48, %v1063_v62  ;;  %v1064_v4 = vmul.f32 %v3967_v46, %v1034_v2  ;;  %v1036_v5 = vpop.f32.mrb[7].mxu0  ;;  %4285 = vmatprep.subr.bf16.mxu1 %v4867_v61  ;;  %v4872_v62 = vld [vmem:[%s7055_s10 + $0x68] sm:$0xff]   ;;  %v6173_v63 = vpop.permute.xlu1 %2056 }
 0x260   : > { %1248 = vmatmul.mubr.bf16.vlgmr.msra.gmra.mrb[16].mxu0 %v1115_v1  ;;  %4286 = vmatpush3.bf16.msra.mxu1 %v4867_v61  ;;  %7146 = vst [vmem:[#allocation37_spill] sm:$0xff] %v6173_v63  ;;  %v4869_v1 = vld [vmem:[%s7055_s10 + $0x98] sm:$0xff]  }
 0x261   : > { %v1101_v6 = vmul.f32 %v3969_v51, %v1078_v3  ;;  %v1079_v7 = vadd.f32 %v3968_v48, %v1064_v4  ;;  %1257 = vmatprep.mubr.bf16.mxu0 %v5358_v0  ;;  %4234 = vmatpush3.bf16.msra.mxu0 %v4862_v30  ;;  %vm1086_vm3 = vcmp.gt.f32.partialorder %v1078_v3, 0.0  ;;  %v4871_v4 = vld [vmem:[%s7055_s10 + $0xa0] sm:$0xff]  }
 0x262   : > { %v6178_v2 = vpop.permute.xlu0 %2051  ;;  %4287 = vmatprep.subr.bf16.mxu1 %v4869_v1 }
 0x263   : > { %vm1087_vm4 = vcmp.gt.f32.partialorder %v1079_v7, 0.0  ;;  %v1102_v8 = vmul.f32 %v3969_v51, %v1079_v7  ;;  %v1109_v12 = vsel %vm1086_vm3, %v1078_v3, %v1101_v6  ;;  %7147 = vst [vmem:[#allocation38_spill] sm:$0xff] %v6178_v2  ;;  %v4874_v3 = vld [vmem:[%s7055_s10 + $0x70] sm:$0xff]   ;;  %v6186_v5 = vpop.permute.xlu1 %2066  ;;  %v4876_v6 = vld [vmem:[%s7055_s10 + $0x78] sm:$0xff]  }
 0x264   : > { %v1039_v9 = vpop.f32.mrb[8].mxu0  ;;  %4288 = vmatpush3.bf16.msra.mxu1 %v4869_v1  ;;  %7148 = vst [vmem:[#allocation39_spill] sm:$0xff] %v6186_v5 }
 0x265   : > { %v1065_v10 = vmul.f32 %v3967_v46, %v1039_v9  ;;  %v1041_v11 = vpop.f32.mrb[9].mxu0  ;;  %v1110_v13 = vsel %vm1087_vm4, %v1079_v7, %v1102_v8  ;;  %4289 = vmatprep.subr.bf16.mxu1 %v4871_v4  ;;  %v4873_v8 = vld [vmem:[%s7055_s10 + $0xa8] sm:$0xff]   ;;  %v6199_v9 = vld [vmem:[%s7055_s10] sm:$0xff]  }
 0x266   : > { %v1042_v14 = vpop.f32.mrb[10].mxu0  ;;  %v1116_v15 = vpack.c.bf16 %v1110_v13, %v1109_v12  ;;  %v6191_v7 = vpop.permute.xlu0 %2061  ;;  %v4875_v11 = vld [vmem:[%s7055_s10 + $0xb0] sm:$0xff]   ;;  %v4877_v13 = vld [vmem:[%s7055_s10 + $0xb8] sm:$0xff]  }
 0x267   : > { %v1080_v16 = vadd.f32 %v3968_v48, %v1065_v10  ;;  %v1066_v17 = vmul.f32 %v3967_v46, %v1042_v14  ;;  %v1044_v18 = vpop.f32.mrb[11].mxu0  ;;  %7149 = vst [vmem:[#allocation40_spill] sm:$0xff] %v6191_v7  ;;  %v6201_v10 = vpop.permute.xlu1 %2076 }
 0x268   : > { %1258 = vmatmul.mubr.bf16.gmra.mrb[20].mxu0 %v1116_v15  ;;  %4290 = vmatpush3.bf16.msra.mxu1 %v4871_v4  ;;  %7150 = vst [vmem:[#allocation41_spill] sm:$0xff] %v6201_v10 }
 0x269   : > { %vm1088_vm5 = vcmp.gt.f32.partialorder %v1080_v16, 0.0  ;;  %v1103_v19 = vmul.f32 %v3969_v51, %v1080_v16  ;;  %v1081_v20 = vadd.f32 %v3968_v48, %v1066_v17  ;;  %1267 = vmatprep.mubr.bf16.mxu0 %v5358_v0  ;;  %4291 = vmatprep.subr.bf16.mxu1 %v4873_v8 }
 0x26a   : > { %v6207_v12 = vpop.permute.xlu0 %2071 }
 0x26b   : > { %vm1089_vm6 = vcmp.gt.f32.partialorder %v1081_v20, 0.0  ;;  %v1104_v21 = vmul.f32 %v3969_v51, %v1081_v20  ;;  %v1111_v22 = vsel %vm1088_vm5, %v1080_v16, %v1103_v19  ;;  %7151 = vst [vmem:[#allocation42_spill] sm:$0xff] %v6207_v12  ;;  %v6212_v14 = vpop.permute.xlu1 %2251  ;;  %v6219_v16 = vld [vmem:[%s7055_s10 + $0xc0] sm:$0xff]  }
 0x26c   : > { %v1047_v23 = vpop.f32.mrb[12].mxu0  ;;  %4292 = vmatpush3.bf16.msra.mxu1 %v4873_v8 }
 0x26d   : > { %v1067_v24 = vmul.f32 %v3967_v46, %v1047_v23  ;;  %v1049_v25 = vpop.f32.mrb[13].mxu0  ;;  %v1112_v26 = vsel %vm1089_vm6, %v1081_v20, %v1104_v21  ;;  %4293 = vmatprep.subr.bf16.mxu1 %v4875_v11 }
 0x26e   : > { %v1050_v27 = vpop.f32.mrb[14].mxu0  ;;  %v1117_v28 = vpack.c.bf16 %v1112_v26, %v1111_v22  ;;  %v6214_v15 = vpop.permute.xlu0 %2246 }
 0x26f   : > { %v1082_v29 = vadd.f32 %v3968_v48, %v1067_v24  ;;  %v1068_v30 = vmul.f32 %v3967_v46, %v1050_v27  ;;  %v1052_v31 = vpop.f32.mrb[15].mxu0  ;;  %v6121_v46 = vshrl.u32 %v1290_v44, 7  ;;  %v6222_v17 = vpop.permute.xlu1 %2261 }
 0x270   : > { %1268 = vmatmul.mubr.bf16.gmra.mrb[24].mxu0 %v1117_v28  ;;  %4294 = vmatpush3.bf16.msra.mxu1 %v4875_v11 }
 0x271   : > { %vm1090_vm7 = vcmp.gt.f32.partialorder %v1082_v29, 0.0  ;;  %v1105_v32 = vmul.f32 %v3969_v51, %v1082_v29  ;;  %v1083_v33 = vadd.f32 %v3968_v48, %v1068_v30  ;;  %1277 = vmatprep.mubr.bf16.mxu0 %v5358_v0  ;;  %v4864_v0 = vld [vmem:[%s7055_s10 + $0x48] sm:$0xff]   ;;  %v6126_v48 = vsub.s32 0, %v6121_v46  ;;  %4295 = vmatprep.subr.bf16.mxu1 %v4877_v13 }
 0x272   : > { %4235 = vmatprep.subr.bf16.mxu0 %v4864_v0  ;;  %v6224_v18 = vpop.permute.xlu0 %2256  ;;  %v1296_v4 = vsub.s32 1, %v6121_v46 }
 0x273   : > { %vm1091_vm8 = vcmp.gt.f32.partialorder %v1083_v33, 0.0  ;;  %v1106_v34 = vmul.f32 %v3969_v51, %v1083_v33  ;;  %v1113_v35 = vsel %vm1090_vm7, %v1082_v29, %v1105_v32  ;;  %4236 = vmatpush3.bf16.msra.mxu0 %v4864_v0  ;;  %7144 = vst [vmem:[#allocation36_spill] sm:$0xff] %v6126_v48  ;;  %v4868_v51 = vld [vmem:[%s7055_s10 + $0x58] sm:$0xff]   ;;  %v6140_v52 = vrot.slane %v6133_v50, %v6126_v48  ;;  %v6226_v19 = vpop.permute.xlu1 %2271 }
 0x274   : > { %4237 = vmatprep.subr.bf16.mxu0 %v4866_v45  ;;  %v6152_v55 = vrot.slane %v6145_v53, %v6126_v48  ;;  %v6163_v59 = vrot.slane %v6156_v57, %v6126_v48  ;;  %4296 = vmatpush3.bf16.msra.mxu1 %v4877_v13  ;;  %v6284_v8 = vrot.slane %v6133_v50, %v1296_v4 }
 0x275   : > { %v1114_v36 = vsel %vm1091_vm8, %v1083_v33, %v1106_v34  ;;  %4305 = vmatprep.subr.bf16.mxu1 %v6219_v16  ;;  %v6289_v48 = vrot.slane %v6145_v53, %v1296_v4  ;;  %v6296_v46 = vrot.slane %v6156_v57, %v1296_v4 }
 0x276   : > { %v1118_v37 = vpack.c.bf16 %v1114_v36, %v1113_v35  ;;  %v6228_v20 = vpop.permute.xlu0 %2266 }
 0x277   : > { %4238 = vmatpush3.bf16.msra.mxu0 %v4866_v45  ;;  %v6230_v21 = vpop.permute.xlu1 %2281 }
 0x278   : > { %1278 = vmatmul.mubr.bf16.gmra.mrb[28].mxu0 %v1118_v37  ;;  %4239 = vmatprep.subr.bf16.mxu0 %v4868_v51 }
 0x27a   : > { %v6232_v22 = vpop.permute.xlu0 %2276 }
 0x27b   : > { %4240 = vmatpush3.bf16.msra.mxu0 %v4868_v51  ;;  %v6234_v23 = vpop.permute.xlu1 %2456 }
 0x27c   : > { %4241 = vmatprep.subr.bf16.mxu0 %v4870_v58 }
 0x27e   : > { %v6236_v24 = vpop.permute.xlu0 %2451 }
 0x27f   : > { %4242 = vmatpush3.bf16.msra.mxu0 %v4870_v58  ;;  %v6238_v25 = vpop.permute.xlu1 %2466 }
 0x280   : > { %4243 = vmatprep.subr.bf16.mxu0 %v4872_v62 }
 0x282   : > { %v6240_v26 = vpop.permute.xlu0 %2461 }
 0x283   : > { %4244 = vmatpush3.bf16.msra.mxu0 %v4872_v62  ;;  %v6242_v27 = vpop.permute.xlu1 %2476 }
 0x284   : > { %4245 = vmatprep.subr.bf16.mxu0 %v4874_v3 }
 0x286   : > { %v6244_v28 = vpop.permute.xlu0 %2471 }
 0x287   : > { %4246 = vmatpush3.bf16.msra.mxu0 %v4874_v3  ;;  %v6246_v29 = vpop.permute.xlu1 %2486 }
 0x288   : > { %4247 = vmatprep.subr.bf16.mxu0 %v4876_v6  ;;  %7152 = vst [vmem:[#allocation43_spill] sm:$0xff] %v6246_v29 }
 0x28a   : > { %v6248_v30 = vpop.permute.xlu0 %2481 }
 0x28b   : > { %4248 = vmatpush3.bf16.msra.mxu0 %v4876_v6  ;;  %7153 = vst [vmem:[#allocation44_spill] sm:$0xff] %v6248_v30  ;;  %v6250_v31 = vpop.permute.xlu1 %2661 }
 0x28c   : > { %4257 = vmatprep.subr.bf16.mxu0 %v6199_v9 }
 0x28e   : > { %v6252_v32 = vpop.permute.xlu0 %2656 }
 0x28f   : > { %v6254_v33 = vpop.permute.xlu1 %2671 }
 0x292   : > { %v6256_v34 = vpop.permute.xlu0 %2666 }
 0x293   : > { %v6258_v35 = vpop.permute.xlu1 %2681 }
 0x296   : > { %v6260_v36 = vpop.permute.xlu0 %2676 }
 0x297   : > { %v6262_v37 = vpop.permute.xlu1 %2691 }
 0x298   : > { %7154 = vst [vmem:[#allocation45_spill] sm:$0xff] %v6262_v37 }
 0x29a   : > { %v6264_v0 = vpop.permute.xlu0 %2686 }
 0x29b   : > { %7155 = vst [vmem:[#allocation46_spill] sm:$0xff] %v6264_v0  ;;  %v1532_v44 = vpop.permute.xlu1 %1531 }
 0x29e   : > { %v1527_v45 = vpop.permute.xlu0 %1526 }
 0x29f   : > { %v6266_v51 = vpop.permute.xlu1 %2866 }
 0x2a0   : > { %7156 = vst [vmem:[#allocation47_spill] sm:$0xff] %v6266_v51 }
 0x2a2   : > { %v6268_v54 = vpop.permute.xlu0 %2861 }
 0x2a3   : > { %7157 = vst [vmem:[#allocation48_spill] sm:$0xff] %v6268_v54  ;;  %v6270_v58 = vpop.permute.xlu1 %1541 }
 0x2a6   : > { %v6272_v61 = vpop.permute.xlu0 %1536 }
 0x2a7   : > { %v6274_v62 = vpop.permute.xlu1 %2876 }
 0x2a8   : > { %7158 = vst [vmem:[#allocation49_spill] sm:$0xff] %v6274_v62 }
 0x2aa   : > { %v6276_v1 = vpop.permute.xlu0 %2871 }
 0x2ab   : > { %7159 = vst [vmem:[#allocation50_spill] sm:$0xff] %v6276_v1  ;;  %v6278_v3 = vpop.permute.xlu1 %1551 }
 0x2ae   : > { %v6281_v6 = vpop.permute.xlu0 %1546 }
 0x2af   : > { %v6286_v11 = vpop.permute.xlu1 %2886 }
 0x2b0   : > { %7160 = vst [vmem:[#allocation51_spill] sm:$0xff] %v6286_v11 }
 0x2b2   : > { %v6292_v37 = vpop.permute.xlu0 %2881 }
 0x2b3   : > { %7161 = vst [vmem:[#allocation52_spill] sm:$0xff] %v6292_v37  ;;  %v6304_v2 = vpop.permute.xlu1 %1561 }
 0x2b7   : > { %v6320_v1 = vpop.permute.xlu1 %2896 }
 0x333   : > { %v1249_v13 = vpop.f32.mrb[16].mxu0 }
 0x334   : > { %v1300_v51 = vmul.f32 %v6140_v52, %v1249_v13  ;;  %v1251_v54 = vpop.f32.mrb[17].mxu0 }
 0x335   : > { %v1301_v0 = vmul.f32 %v6284_v8, %v1251_v54  ;;  %v1253_v29 = vpop.f32.mrb[18].mxu0 }
 0x336   : > { %v1328_v50 = vadd.f32 %v6152_v55, %v1300_v51  ;;  %v1302_v30 = vmul.f32 %v6140_v52, %v1253_v29  ;;  %v1255_v12 = vpop.f32.mrb[19].mxu0  ;;  %v1564_v51 = vmul.f32 0.0, %v1527_v45 }
 0x337   : > { %v1329_v10 = vadd.f32 %v6289_v48, %v1301_v0  ;;  %v1303_v53 = vmul.f32 %v6284_v8, %v1255_v12  ;;  %v6311_v0 = vpop.permute.xlu0 %1556 }
 0x338   : > { %vm1344_vm9 = vcmp.gt.f32.partialorder %v1328_v50, 0.0  ;;  %v1372_v13 = vmul.f32 %v6163_v59, %v1328_v50  ;;  %v1330_v7 = vadd.f32 %v6152_v55, %v1302_v30 }
 0x339   : > { %vm1345_vm10 = vcmp.gt.f32.partialorder %v1329_v10, 0.0  ;;  %v1373_v57 = vmul.f32 %v6296_v46, %v1329_v10  ;;  %v1331_v54 = vadd.f32 %v6289_v48, %v1303_v53 }
 0x33a   : > { %v6308_v4 = vsel %vm1344_vm9, %v1328_v50, %v1372_v13  ;;  %vm1346_vm11 = vcmp.gt.f32.partialorder %v1330_v7, 0.0  ;;  %v1374_v29 = vmul.f32 %v6163_v59, %v1330_v7 }
 0x33b   : > { %7162 = vst [vmem:[#allocation53_spill] sm:$0xff] %v6308_v4  ;;  %v1389_v12 = vsel %vm1345_vm10, %v1329_v10, %v1373_v57  ;;  %vm1347_vm12 = vcmp.gt.f32.partialorder %v1331_v54, 0.0  ;;  %v1375_v5 = vmul.f32 %v6296_v46, %v1331_v54  ;;  %v1259_v30 = vpop.f32.mrb[20].mxu0 }
 0x33c   : > { %1416 = vst [vmem:[#allocation2 + $0x10] sm:$0xff] %v1389_v12  ;;  %v6314_v63 = vsel %vm1346_vm11, %v1330_v7, %v1374_v29  ;;  %v1304_v11 = vmul.f32 %v6140_v52, %v1259_v30  ;;  %v1261_v37 = vpop.f32.mrb[21].mxu0  ;;  %v1565_v53 = vmul.f32 %v1532_v44, %v1389_v12  ;;  %v6325_v30 = vmul.f32 %v6214_v15, %v1389_v12  ;;  %v6351_v15 = vpop.permute.xlu1 %1447 }
 0x33d   : > { %7163 = vst [vmem:[#allocation54_spill] sm:$0xff] %v6314_v63  ;;  %v1391_v45 = vsel %vm1347_vm12, %v1331_v54, %v1375_v5  ;;  %v1305_v50 = vmul.f32 %v6284_v8, %v1261_v37  ;;  %v1263_v13 = vpop.f32.mrb[22].mxu0 }
 0x33e   : > { %1417 = vst [vmem:[#allocation2 + $0x18] sm:$0xff] %v1391_v45  ;;  %v1332_v4 = vadd.f32 %v6152_v55, %v1304_v11  ;;  %v1306_v10 = vmul.f32 %v6140_v52, %v1263_v13  ;;  %v1265_v57 = vpop.f32.mrb[23].mxu0  ;;  %v1572_v62 = vpack.c.bf16 %v1565_v53, %v1564_v51  ;;  %7164 = vst [vmem:[#allocation55_spill] sm:$0xff] %v6325_v30  ;;  %v6332_v11 = vpop.permute.xlu0 %2891 }
 0x33f   : > { %v1333_v7 = vadd.f32 %v6289_v48, %v1305_v50  ;;  %v1307_v29 = vmul.f32 %v6284_v8, %v1265_v57  ;;  %v6328_v5 = vmul.f32 %v6212_v14, %v1391_v45 }
 0x340   : > { %vm1348_vm13 = vcmp.gt.f32.partialorder %v1332_v4, 0.0  ;;  %v1376_v37 = vmul.f32 %v6163_v59, %v1332_v4  ;;  %v1334_v44 = vadd.f32 %v6152_v55, %v1306_v10  ;;  %4249 = vmatprep.mubr.bf16.mxu0 %v1572_v62 }
 0x341   : > { %7165 = vst [vmem:[#allocation56_spill] sm:$0xff] %v6328_v5  ;;  %vm1349_vm14 = vcmp.gt.f32.partialorder %v1333_v7, 0.0  ;;  %v1377_v54 = vmul.f32 %v6296_v46, %v1333_v7  ;;  %v1335_v51 = vadd.f32 %v6289_v48, %v1307_v29 }
 0x342   : > { %v6338_v12 = vsel %vm1348_vm13, %v1332_v4, %v1376_v37  ;;  %vm1350_vm15 = vcmp.gt.f32.partialorder %v1334_v44, 0.0  ;;  %v1378_v14 = vmul.f32 %v6163_v59, %v1334_v44  ;;  %v1566_v4 = vmul.f32 %v6272_v61, %v1391_v45 }
 0x343   : > { %7166 = vst [vmem:[#allocation57_spill] sm:$0xff] %v6338_v12  ;;  %v6341_v53 = vsel %vm1349_vm14, %v1333_v7, %v1377_v54  ;;  %vm1351_vm0 = vcmp.gt.f32.partialorder %v1335_v51, 0.0  ;;  %v1379_v62 = vmul.f32 %v6296_v46, %v1335_v51  ;;  %v1269_v50 = vpop.f32.mrb[24].mxu0  ;;  %v1826_v13 = vld [vmem:[#allocation2 + $0x9] sm:$0xff] }
 0x344   : > { %1418 = vst [vmem:[#allocation2 + $0x20] sm:$0xff] %v6341_v53  ;;  %v6345_v10 = vsel %vm1350_vm15, %v1334_v44, %v1378_v14  ;;  %v1308_v57 = vmul.f32 %v6140_v52, %v1269_v50  ;;  %v1271_v29 = vpop.f32.mrb[25].mxu0  ;;  %v1567_v37 = vmul.f32 %v6270_v58, %v6341_v53  ;;  %v1874_v44 = vmul.f32 %v6105_v39, %v1826_v13 }
 0x345   : > { %7167 = vst [vmem:[#allocation58_spill] sm:$0xff] %v6345_v10  ;;  %v6353_v7 = vsel %vm1351_vm0, %v1335_v51, %v1379_v62  ;;  %v1309_v54 = vmul.f32 %v6284_v8, %v1271_v29  ;;  %v1273_v12 = vpop.f32.mrb[26].mxu0  ;;  %v6356_v63 = vld [vmem:[#allocation2 + $0x11] sm:$0xff]  ;;  %v4880_v51 = vld [vmem:[%s7055_s10 + $0x8] sm:$0xff]   ;;  %v1443_v62 = vpop.permute.xlu0 %1442 }
 0x346   : > { %1419 = vst [vmem:[#allocation2 + $0x28] sm:$0xff] %v6353_v7  ;;  %v1336_v14 = vadd.f32 %v6152_v55, %v1308_v57  ;;  %v1310_v61 = vmul.f32 %v6140_v52, %v1273_v12  ;;  %v1275_v45 = vpop.f32.mrb[27].mxu0  ;;  %v1875_v58 = vmul.f32 %v6109_v41, %v6356_v63  ;;  %v1573_v50 = vpack.c.bf16 %v1567_v37, %v1566_v4 }
 0x347   : > { %v1337_v29 = vadd.f32 %v6289_v48, %v1309_v54  ;;  %v1311_v39 = vmul.f32 %v6284_v8, %v1275_v45 }
 0x348   : > { %vm1352_vm1 = vcmp.gt.f32.partialorder %v1336_v14, 0.0  ;;  %v1380_v13 = vmul.f32 %v6163_v59, %v1336_v14  ;;  %v1338_v57 = vadd.f32 %v6152_v55, %v1310_v61  ;;  %v1882_v12 = vpack.c.bf16 %v1875_v58, %v1874_v44  ;;  %4250 = vmatmul.mubr.bf16.vlgmr.msra.gmra.mrb[32].mxu0 %v1573_v50  ;;  %v4882_v61 = vld [vmem:[%s7055_s10 + $0x10] sm:$0xff]   ;;  %v6380_v44 = vpop.permute.xlu1 %3071 }
 0x349   : > { %vm1353_vm2 = vcmp.gt.f32.partialorder %v1337_v29, 0.0  ;;  %v1381_v41 = vmul.f32 %v6296_v46, %v1337_v29  ;;  %v1339_v4 = vadd.f32 %v6289_v48, %v1311_v39  ;;  %4258 = vmatpush3.bf16.msra.mxu0 %v6199_v9 }
 0x34a   : > { %v6374_v37 = vsel %vm1352_vm1, %v1336_v14, %v1380_v13  ;;  %vm1354_vm3 = vcmp.gt.f32.partialorder %v1338_v57, 0.0  ;;  %v1382_v54 = vmul.f32 %v6163_v59, %v1338_v57  ;;  %4297 = vmatprep.mubr.bf16.mxu1 %v1882_v12  ;;  %4259 = vmatprep.subr.bf16.mxu0 %v4880_v51  ;;  %v1568_v12 = vmul.f32 %v6281_v6, %v6353_v7 }
 0x34b   : > { %7168 = vst [vmem:[#allocation59_spill] sm:$0xff] %v6374_v37  ;;  %v6382_v45 = vsel %vm1353_vm2, %v1337_v29, %v1381_v41  ;;  %vm1355_vm4 = vcmp.gt.f32.partialorder %v1339_v4, 0.0  ;;  %v1383_v58 = vmul.f32 %v6296_v46, %v1339_v4  ;;  %v1279_v50 = vpop.f32.mrb[28].mxu0  ;;  %v6385_v9 = vld [vmem:[#allocation2 + $0x19] sm:$0xff]  ;;  %v6395_v41 = vpop.permute.xlu0 %3066  ;;  %vm5361_vm1 = vmmov 0  }
 0x34c   : > { %1420 = vst [vmem:[#allocation2 + $0x30] sm:$0xff] %v6382_v45  ;;  %v6388_v14 = vsel %vm1354_vm3, %v1338_v57, %v1382_v54  ;;  %v1312_v39 = vmul.f32 %v6140_v52, %v1279_v50  ;;  %v1281_v13 = vpop.f32.mrb[29].mxu0  ;;  %v1569_v29 = vmul.f32 %v6278_v3, %v6382_v45  ;;  %v1876_v57 = vmul.f32 %v6103_v38, %v6385_v9  ;;  %v4884_v50 = vld [vmem:[%s7055_s10 + $0x18] sm:$0xff]  }
 0x34d   : > { %7169 = vst [vmem:[#allocation60_spill] sm:$0xff] %v6388_v14  ;;  %v6397_v37 = vsel %vm1355_vm4, %v1339_v4, %v1383_v58  ;;  %v1313_v10 = vmul.f32 %v6284_v8, %v1281_v13  ;;  %v1283_v30 = vpop.f32.mrb[30].mxu0  ;;  %v6400_v5 = vld [vmem:[#allocation2 + $0x21] sm:$0xff]  ;;  %4260 = vmatpush3.bf16.msra.mxu0 %v4880_v51 }
 0x34e   : > { %1421 = vst [vmem:[#allocation2 + $0x38] sm:$0xff] %v6397_v37  ;;  %v1340_v6 = vadd.f32 %v6152_v55, %v1312_v39  ;;  %v1314_v54 = vmul.f32 %v6140_v52, %v1283_v30  ;;  %v1285_v3 = vpop.f32.mrb[31].mxu0  ;;  %v1877_v4 = vmul.f32 %v6107_v40, %v6400_v5  ;;  %4261 = vmatprep.subr.bf16.mxu0 %v4882_v61  ;;  %v1432_v13 = vld [vmem:[#allocation2 + $0x7] sm:$0xff] }
 0x34f   : > { %v1574_v58 = vpack.c.bf16 %v1569_v29, %v1568_v12  ;;  %v1341_v38 = vadd.f32 %v6289_v48, %v1313_v10  ;;  %v1315_v51 = vmul.f32 %v6284_v8, %v1285_v3  ;;  %v4881_v40 = vld [vmem:[%s7055_s10 + $0xc8] sm:$0xff]   ;;  %v6421_v29 = vpop.permute.xlu1 %1457  ;;  %v1480_v3 = vmul.f32 %v1443_v62, %v1432_v13 }
 0x350   : > { %vm1356_vm5 = vcmp.gt.f32.partialorder %v1340_v6, 0.0  ;;  %v1384_v39 = vmul.f32 %v6163_v59, %v1340_v6  ;;  %v1342_v52 = vadd.f32 %v6152_v55, %v1314_v54  ;;  %v1883_v30 = vpack.c.bf16 %v1877_v4, %v1876_v57  ;;  %v6419_v12 = vld [vmem:[#allocation2 + $0xf] sm:$0xff]  ;;  %v4886_v57 = vld [vmem:[%s7055_s10 + $0x20] sm:$0xff]   ;;  %v6431_v54 = vpop.permute.xlu0 %1452 }
 0x351   : > { %4253 = vmatprep.mubr.bf16.mxu0 %v1574_v58  ;;  %vm1357_vm6 = vcmp.gt.f32.partialorder %v1341_v38, 0.0  ;;  %v1385_v10 = vmul.f32 %v6296_v46, %v1341_v38  ;;  %v1343_v8 = vadd.f32 %v6289_v48, %v1315_v51  ;;  %4262 = vmatpush3.bf16.msra.mxu0 %v4882_v61  ;;  %v1570_v58 = vmul.f32 %v6311_v0, %v6397_v37 }
 0x352   : > { %v6425_v14 = vsel %vm1356_vm5, %v1340_v6, %v1384_v39  ;;  %vm1358_vm7 = vcmp.gt.f32.partialorder %v1342_v52, 0.0  ;;  %v1386_v55 = vmul.f32 %v6163_v59, %v1342_v52  ;;  %4298 = vmatmul.mubr.bf16.vlgmr.msra.gmra.mrb[0].mxu1 %v1883_v30  ;;  %4263 = vmatprep.subr.bf16.mxu0 %v4884_v50  ;;  %v1481_v59 = vmul.f32 %v6351_v15, %v6419_v12  ;;  %v4883_v6 = vld [vmem:[%s7055_s10 + $0xd0] sm:$0xff]   ;;  %v4885_v30 = vld [vmem:[%s7055_s10 + $0xd8] sm:$0xff]  }
 0x353   : > { %v6433_v4 = vsel %vm1357_vm6, %v1341_v38, %v1385_v10  ;;  %vm1359_vm8 = vcmp.gt.f32.partialorder %v1343_v8, 0.0  ;;  %v1387_v48 = vmul.f32 %v6296_v46, %v1343_v8  ;;  %4306 = vmatpush3.bf16.msra.mxu1 %v6219_v16  ;;  %v6437_v62 = vld [vmem:[#allocation2 + $0x29] sm:$0xff]  ;;  %v6457_v15 = vmul.f32 %v6224_v18, %v6341_v53  ;;  %v6471_v18 = vpop.permute.xlu1 %3081  ;;  %v6486_v10 = vld [vmem:[#allocation2 + $0x1f] sm:$0xff] }
 0x354   : > { %1422 = vst [vmem:[#allocation2 + $0x40] sm:$0xff] %v6433_v4  ;;  %v6442_v61 = vsel %vm1358_vm7, %v1342_v52, %v1386_v55  ;;  %4307 = vmatprep.subr.bf16.mxu1 %v4881_v40  ;;  %v1571_v16 = vmul.f32 %v6304_v2, %v6433_v4  ;;  %v6461_v38 = vmul.f32 %v6222_v17, %v6353_v7  ;;  %v4890_v55 = vld [vmem:[%s7055_s10 + $0x30] sm:$0xff]  }
 0x355   : > { %v6451_v46 = vsel %vm1359_vm8, %v1343_v8, %v1387_v48  ;;  %v6453_v13 = vld [vmem:[#allocation2 + $0x31] sm:$0xff]  ;;  %4264 = vmatpush3.bf16.msra.mxu0 %v4884_v50  ;;  %v1878_v0 = vmul.f32 %v6116_v43, %v6437_v62  ;;  %v4888_v50 = vld [vmem:[%s7055_s10 + $0x28] sm:$0xff]   ;;  %v1488_v39 = vpack.c.bf16 %v1481_v59, %v1480_v3  ;;  %v6477_v52 = vmul.f32 %v6228_v20, %v6382_v45  ;;  %v6488_v8 = vpop.permute.xlu0 %3076 }
 0x356   : > { %1423 = vst [vmem:[#allocation2 + $0x48] sm:$0xff] %v6451_v46  ;;  %v1879_v2 = vmul.f32 %v6111_v42, %v6453_v13  ;;  %4265 = vmatprep.subr.bf16.mxu0 %v4886_v57  ;;  %v1575_v51 = vpack.c.bf16 %v1571_v16, %v1570_v58  ;;  %v2293_v17 = vpack.c.bf16 %v6461_v38, %v6457_v15  ;;  %v6536_v16 = vld [vmem:[#allocation2 + $0x2f] sm:$0xff] }
 0x357   : > { %4308 = vmatpush3.bf16.msra.mxu1 %v4881_v40  ;;  %v6481_v42 = vmul.f32 %v6226_v19, %v6397_v37  ;;  %v2032_v40 = vld [vmem:[#allocation2 + $0x17] sm:$0xff]  ;;  %v6494_v19 = vmul.f32 %v6232_v22, %v6433_v4  ;;  %v6498_v3 = vmul.f32 %v6230_v21, %v6451_v46  ;;  %v6509_v48 = vmul.f32 %v6234_v23, %v6385_v9 }
 0x358   : > { %4309 = vmatprep.subr.bf16.mxu1 %v4883_v6  ;;  %v1884_v43 = vpack.c.bf16 %v1879_v2, %v1878_v0  ;;  %4254 = vmatmul.mubr.bf16.gmra.mrb[36].mxu0 %v1575_v51  ;;  %v6513_v22 = vmul.f32 %v6238_v25, %v6437_v62  ;;  %v6521_v58 = vmul.f32 %v6240_v26, %v6400_v5  ;;  %v4892_v51 = vld [vmem:[%s7055_s10 + $0x38] sm:$0xff]  }
 0x359   : > { %4266 = vmatpush3.bf16.msra.mxu0 %v4886_v57  ;;  %4273 = vmatprep.mubr.bf16.mxu0 %v1488_v39  ;;  %v6505_v57 = vmul.f32 %v6236_v24, %v6356_v63  ;;  %v6524_v63 = vmul.f32 %v6252_v32, %v2032_v40  ;;  %v6528_v23 = vmul.f32 %v6250_v31, %v6486_v10  ;;  %v4887_v24 = vld [vmem:[%s7055_s10 + $0xe0] sm:$0xff]   ;;  %v1468_v32 = vpop.permute.xlu1 %1467  ;;  %v6542_v31 = vld [vmem:[#allocation2 + $0x37] sm:$0xff]  ;;  %v1463_v59 = vpop.permute.xlu0 %1462 }
 0x35a   : > { %4301 = vmatprep.mubr.bf16.mxu1 %v1884_v43  ;;  %4267 = vmatprep.subr.bf16.mxu0 %v4888_v50  ;;  %v2080_v25 = vmul.f32 %v6154_v56, %v2032_v40  ;;  %v6550_v56 = vmul.f32 %v6244_v28, %v6453_v13  ;;  %v1483_v28 = vmul.f32 %v6421_v29, %v6486_v10  ;;  %v4889_v29 = vld [vmem:[%s7055_s10 + $0xe8] sm:$0xff]  }
 0x35b   : > { %4310 = vmatpush3.bf16.msra.mxu1 %v4883_v6  ;;  %v6515_v21 = vld [vmem:[#allocation2 + $0x39] sm:$0xff]  ;;  %v6534_v6 = vld [vmem:[#allocation2 + $0x27] sm:$0xff]  ;;  %v7184_v15 = vpack.c.bf16 %v6498_v3, %v6494_v19  ;;  %v7185_v38 = vpack.c.bf16 %v6509_v48, %v6505_v57 }
 0x35c   : > { %4311 = vmatprep.subr.bf16.mxu1 %v4885_v30  ;;  %v6544_v2 = vld [vmem:[#allocation2 + $0x3f] sm:$0xff]  ;;  %v6554_v39 = vmul.f32 %v6242_v27, %v6515_v21  ;;  %v2079_v27 = vmul.f32 %v6165_v60, %v6419_v12  ;;  %v6585_v60 = vmul.f32 %v6260_v36, %v6542_v31  ;;  %v6592_v12 = vmul.f32 0.0, %v6320_v1  ;;  %v7170_v1 = vld [vmem:[#allocation50_spill] sm:$0xff] }
 0x35d   : > { %v6540_v0 = vld [vmem:[#allocation2 + $0x41] sm:$0xff]  ;;  %4268 = vmatpush3.bf16.msra.mxu0 %v4888_v50  ;;  %v1880_v50 = vmul.f32 %v6128_v49, %v6515_v21  ;;  %v6573_v49 = vmul.f32 %v6256_v34, %v6534_v6  ;;  %v6589_v34 = vmul.f32 %v6258_v35, %v6544_v2  ;;  %v1485_v35 = vmul.f32 %v1468_v32, %v6536_v16  ;;  %v4909_v19 = vld [vmem:[%s7055_s10 + $0x178] sm:$0xff]   ;;  %v6745_v48 = vld [vmem:[#allocation2 + $0x49] sm:$0xff] }
 0x35e   : > { %v1881_v26 = vmul.f32 %v6123_v47, %v6540_v0  ;;  %4269 = vmatprep.subr.bf16.mxu0 %v4890_v55  ;;  %v2499_v43 = vpack.c.bf16 %v6554_v39, %v6550_v56  ;;  %v6577_v47 = vmul.f32 %v6254_v33, %v6536_v16  ;;  %v2087_v33 = vpack.c.bf16 %v2080_v25, %v2079_v27  ;;  %v4910_v3 = vld [vmem:[%s7055_s10 + $0x180] sm:$0xff]   ;;  %v4911_v57 = vld [vmem:[%s7055_s10 + $0x188] sm:$0xff]   ;;  %v4916_v39 = vld [vmem:[%s7055_s10 + $0x1b0] sm:$0xff]  }
 0x35f   : > { %4312 = vmatpush3.bf16.msra.mxu1 %v4885_v30  ;;  %v1482_v30 = vmul.f32 %v2032_v40, %v6431_v54  ;;  %v1484_v54 = vmul.f32 %v1463_v59, %v6534_v6  ;;  %v2704_v36 = vpack.c.bf16 %v6589_v34, %v6585_v60  ;;  %v3092_v40 = vpop.permute.xlu1 %3091  ;;  %v6602_v25 = vmul.f32 %v7170_v1, %v6353_v7  ;;  %v7172_v59 = vld [vmem:[#allocation52_spill] sm:$0xff]  ;;  %v4915_v56 = vld [vmem:[%s7055_s10 + $0x1a8] sm:$0xff]  }
 0x360   : > { %4313 = vmatprep.subr.bf16.mxu1 %v4887_v24  ;;  %v1885_v20 = vpack.c.bf16 %v1881_v26, %v1880_v50  ;;  %v2703_v26 = vpack.c.bf16 %v6577_v47, %v6573_v49  ;;  %v6621_v7 = vmul.f32 %v6332_v11, %v6451_v46  ;;  %v6639_v11 = vmul.f32 %v6471_v18, %v6453_v13  ;;  %v4893_v18 = vld [vmem:[%s7055_s10 + $0xf8] sm:$0xff]   ;;  %v7193_v47 = vld [vmem:[#allocation47_spill] sm:$0xff] }
 0x361   : > { %4270 = vmatpush3.bf16.msra.mxu0 %v4890_v55  ;;  %v1489_v50 = vpack.c.bf16 %v1483_v28, %v1482_v30  ;;  %v7171_v55 = vld [vmem:[#allocation49_spill] sm:$0xff]  ;;  %v6613_v28 = vmul.f32 %v7172_v59, %v6397_v37  ;;  %v3087_v30 = vpop.permute.xlu0 %3086  ;;  %v6631_v37 = vmul.f32 %v6380_v44, %v6400_v5  ;;  %v6649_v5 = vmul.f32 %v3092_v40, %v6540_v0  ;;  %v7176_v59 = vld [vmem:[#allocation38_spill] sm:$0xff]  ;;  %v4921_v34 = vld [vmem:[%s7055_s10 + $0x1d8] sm:$0xff]  }
 0x362   : > { %4302 = vmatmul.mubr.bf16.gmra.mrb[4].mxu1 %v1885_v20  ;;  %4271 = vmatprep.subr.bf16.mxu0 %v4892_v51  ;;  %v6606_v27 = vmul.f32 %v7171_v55, %v6382_v45  ;;  %v4891_v20 = vld [vmem:[%s7055_s10 + $0xf0] sm:$0xff]   ;;  %v6625_v45 = vmul.f32 %v6395_v41, %v6385_v9  ;;  %v2910_v41 = vpack.c.bf16 %v6592_v12, %v6621_v7 }
 0x363   : > { %4314 = vmatpush3.bf16.msra.mxu1 %v4887_v24  ;;  %4321 = vmatprep.mubr.bf16.mxu1 %v2087_v33  ;;  %v7173_v24 = vld [vmem:[#allocation51_spill] sm:$0xff]  ;;  %v6646_v46 = vmul.f32 %v3087_v30, %v6515_v21  ;;  %v1490_v44 = vpack.c.bf16 %v1485_v35, %v1484_v54  ;;  %v1478_v21 = vpop.permute.xlu1 %1477  ;;  %v7174_v54 = vld [vmem:[#allocation37_spill] sm:$0xff] }
 0x364   : > { %4315 = vmatprep.subr.bf16.mxu1 %v4889_v29  ;;  %v6617_v32 = vmul.f32 %v7173_v24, %v6433_v4  ;;  %v2908_v33 = vpack.c.bf16 %v6606_v27, %v6602_v25  ;;  %v6635_v4 = vmul.f32 %v6488_v8, %v6437_v62  ;;  %v3112_v62 = vpack.c.bf16 %v6631_v37, %v6625_v45  ;;  %v4894_v35 = vld [vmem:[%s7055_s10 + $0x100] sm:$0xff]   ;;  %v4931_v27 = vld [vmem:[%s7055_s10 + $0x228] sm:$0xff]   ;;  %v4932_v12 = vld [vmem:[%s7055_s10 + $0x230] sm:$0xff]  }
 0x365   : > { %4272 = vmatpush3.bf16.msra.mxu0 %v4892_v51  ;;  %v3114_v8 = vpack.c.bf16 %v6649_v5, %v6646_v46  ;;  %v1487_v51 = vmul.f32 %v1478_v21, %v6544_v2  ;;  %v2082_v40 = vmul.f32 %v7174_v54, %v6534_v6  ;;  %v2081_v24 = vmul.f32 %v7176_v59, %v6486_v10  ;;  %v4895_v6 = vld [vmem:[%s7055_s10 + $0x108] sm:$0xff]   ;;  %v7178_v10 = vld [vmem:[#allocation41_spill] sm:$0xff]  ;;  %v3063_v45 = vld [vmem:[#allocation2 + $0x51] sm:$0xff] }
 0x366   : > { %v2909_v9 = vpack.c.bf16 %v6617_v32, %v6613_v28  ;;  %v3113_v13 = vpack.c.bf16 %v6639_v11, %v6635_v4  ;;  %v4898_v59 = vld [vmem:[%s7055_s10 + $0x120] sm:$0xff]   ;;  %v4933_v28 = vld [vmem:[%s7055_s10 + $0x238] sm:$0xff]   ;;  %v4941_v5 = vld [vmem:[#allocation15 + $0x38] sm:$0xff]  }
 0x367   : > { %4316 = vmatpush3.bf16.msra.mxu1 %v4889_v29  ;;  %v1473_v29 = vpop.permute.xlu0 %1472  ;;  %v2088_v21 = vpack.c.bf16 %v2082_v40, %v2081_v24  ;;  %v4900_v24 = vld [vmem:[%s7055_s10 + $0x130] sm:$0xff]   ;;  %v4930_v25 = vld [vmem:[%s7055_s10 + $0x220] sm:$0xff]   ;;  %v3102_v7 = vpop.permute.xlu1 %3101 }
 0x368   : > { %4317 = vmatprep.subr.bf16.mxu1 %v4891_v20  ;;  %4274 = vmatmul.mubr.bf16.vlgmr.msra.gmra.mrb[32].mxu0 %v1489_v50  ;;  %v1486_v1 = vmul.f32 %v6542_v31, %v1473_v29  ;;  %v7175_v50 = vld [vmem:[#allocation39_spill] sm:$0xff]  ;;  %v6676_v29 = vld [vmem:[#allocation2 + $0x47] sm:$0xff]  ;;  %v3111_v37 = vmul.f32 %v3102_v7, %v3063_v45 }
 0x369   : > { %4277 = vmatprep.mubr.bf16.mxu0 %v1490_v44  ;;  %v2084_v55 = vmul.f32 %v7175_v50, %v6542_v31  ;;  %v2086_v31 = vmul.f32 %v7178_v10, %v6676_v29  ;;  %v7181_v50 = vld [vmem:[#allocation55_spill] sm:$0xff]  ;;  %v7186_v10 = vpack.c.bf16 %v6513_v22, %v6521_v58  ;;  %v4913_v22 = vld [vmem:[%s7055_s10 + $0x198] sm:$0xff]   ;;  %v7189_v58 = vpack.c.bf16 %v6528_v23, %v6524_v63  ;;  %v4940_v46 = vld [vmem:[#allocation15 + $0x30] sm:$0xff]  }
 0x36a   : > { %v1491_v30 = vpack.c.bf16 %v1487_v51, %v1486_v1  ;;  %v4897_v1 = vld [vmem:[%s7055_s10 + $0x118] sm:$0xff]  }
 0x36b   : > { %4318 = vmatpush3.bf16.msra.mxu1 %v4891_v20  ;;  %v7177_v20 = vld [vmem:[#allocation40_spill] sm:$0xff]  ;;  %v3097_v32 = vpop.permute.xlu0 %3096 }
 0x36c   : > { %4319 = vmatprep.subr.bf16.mxu1 %v4893_v18  ;;  %v2083_v44 = vmul.f32 %v7177_v20, %v6536_v16  ;;  %v4896_v16 = vld [vmem:[%s7055_s10 + $0x110] sm:$0xff]   ;;  %v4902_v20 = vld [vmem:[%s7055_s10 + $0x140] sm:$0xff]   ;;  %v4917_v23 = vld [vmem:[%s7055_s10 + $0x1b8] sm:$0xff]  }
 0x36d   : > { %v4935_v63 = vld [vmem:[#allocation15 + $0x8] sm:$0xff]  }
 0x36e   : > { %v2089_v54 = vpack.c.bf16 %v2084_v55, %v2083_v44  ;;  %v4903_v44 = vld [vmem:[%s7055_s10 + $0x148] sm:$0xff]  }
 0x36f   : > { %4320 = vmatpush3.bf16.msra.mxu1 %v4893_v18  ;;  %v7179_v18 = vld [vmem:[#allocation42_spill] sm:$0xff] }
 0x370   : > { %4329 = vmatprep.subr.bf16.mxu1 %v4894_v35  ;;  %4278 = vmatmul.mubr.bf16.gmra.mrb[36].mxu0 %v1491_v30  ;;  %v2085_v51 = vmul.f32 %v7179_v18, %v6544_v2  ;;  %v4899_v2 = vld [vmem:[%s7055_s10 + $0x128] sm:$0xff]   ;;  %v4901_v30 = vld [vmem:[%s7055_s10 + $0x138] sm:$0xff]   ;;  %v7188_v18 = vld [vmem:[#allocation43_spill] sm:$0xff] }
 0x372   : > { %4322 = vmatmul.mubr.bf16.vlgmr.msra.gmra.mrb[0].mxu1 %v2088_v21  ;;  %v2090_v40 = vpack.c.bf16 %v2086_v31, %v2085_v51  ;;  %v7183_v21 = vpack.c.bf16 %v6481_v42, %v6477_v52  ;;  %v4907_v52 = vld [vmem:[%s7055_s10 + $0x168] sm:$0xff]   ;;  %v4908_v42 = vld [vmem:[%s7055_s10 + $0x170] sm:$0xff]   ;;  %v7187_v31 = vld [vmem:[#allocation44_spill] sm:$0xff]  ;;  %v2496_v51 = vmul.f32 %v7188_v18, %v6745_v48 }
 0x373   : > { %4325 = vmatprep.mubr.bf16.mxu1 %v2089_v54  ;;  %4330 = vmatpush3.bf16.msra.mxu1 %v4894_v35  ;;  %v7180_v35 = vld [vmem:[#allocation56_spill] sm:$0xff] }
 0x374   : > { %4331 = vmatprep.subr.bf16.mxu1 %v4895_v6  ;;  %v7182_v55 = vpack.c.bf16 %v7180_v35, %v7181_v50  ;;  %v4905_v54 = vld [vmem:[%s7055_s10 + $0x158] sm:$0xff]   ;;  %v4936_v35 = vld [vmem:[#allocation15 + $0x10] sm:$0xff]  }
 0x375   : > { %v4918_v50 = vld [vmem:[%s7055_s10 + $0x1c0] sm:$0xff]  }
 0x377   : > { %4332 = vmatpush3.bf16.msra.mxu1 %v4895_v6  ;;  %v4904_v6 = vld [vmem:[%s7055_s10 + $0x150] sm:$0xff]  }
 0x378   : > { %4333 = vmatprep.subr.bf16.mxu1 %v4896_v16 }
 0x37a   : > { %4326 = vmatmul.mubr.bf16.gmra.mrb[4].mxu1 %v2090_v40  ;;  %v4912_v40 = vld [vmem:[%s7055_s10 + $0x190] sm:$0xff]  }
 0x37b   : > { %4334 = vmatpush3.bf16.msra.mxu1 %v4896_v16  ;;  %4345 = vmatprep.mubr.bf16.mxu1 %v7182_v55  ;;  %v2495_v16 = vmul.f32 %v7187_v31, %v6540_v0  ;;  %v4914_v0 = vld [vmem:[%s7055_s10 + $0x1a0] sm:$0xff]   ;;  %v4937_v55 = vld [vmem:[#allocation15 + $0x18] sm:$0xff]  }
 0x37c   : > { %4335 = vmatprep.subr.bf16.mxu1 %v4897_v1 }
 0x37f   : > { %4336 = vmatpush3.bf16.msra.mxu1 %v4897_v1  ;;  %v2500_v1 = vpack.c.bf16 %v2496_v51, %v2495_v16  ;;  %v4939_v16 = vld [vmem:[#allocation15 + $0x28] sm:$0xff]  }
 0x380   : > { %4337 = vmatprep.subr.bf16.mxu1 %v4898_v59 }
 0x383   : > { %4338 = vmatpush3.bf16.msra.mxu1 %v4898_v59  ;;  %v4919_v59 = vld [vmem:[%s7055_s10 + $0x1c8] sm:$0xff]  }
 0x384   : > { %4339 = vmatprep.subr.bf16.mxu1 %v4899_v2 }
 0x387   : > { %4340 = vmatpush3.bf16.msra.mxu1 %v4899_v2  ;;  %v2653_v2 = vld [vmem:[#allocation2 + $0x4f] sm:$0xff] }
 0x388   : > { %4341 = vmatprep.subr.bf16.mxu1 %v4900_v24 }
 0x38b   : > { %4342 = vmatpush3.bf16.msra.mxu1 %v4900_v24  ;;  %v2851_v24 = vld [vmem:[#allocation2 + $0x18] sm:$0xff] }
 0x38c   : > { %4343 = vmatprep.subr.bf16.mxu1 %v4901_v30 }
 0x38f   : > { %4344 = vmatpush3.bf16.msra.mxu1 %v4901_v30  ;;  %v7190_v30 = vld [vmem:[#allocation46_spill] sm:$0xff] }
 0x390   : > { %4353 = vmatprep.subr.bf16.mxu1 %v4902_v20 }
 0x392   : > { %4346 = vmatmul.mubr.bf16.vlgmr.msra.gmra.mrb[0].mxu1 %v2293_v17  ;;  %v4906_v17 = vld [vmem:[%s7055_s10 + $0x160] sm:$0xff]  }
 0x393   : > { %4349 = vmatprep.mubr.bf16.mxu1 %v7183_v21  ;;  %4354 = vmatpush3.bf16.msra.mxu1 %v4902_v20  ;;  %v2700_v20 = vmul.f32 %v7190_v30, %v6676_v29  ;;  %v4922_v29 = vld [vmem:[%s7055_s10 + $0x1e0] sm:$0xff]  }
 0x394   : > { %4355 = vmatprep.subr.bf16.mxu1 %v4903_v44 }
 0x397   : > { %4356 = vmatpush3.bf16.msra.mxu1 %v4903_v44  ;;  %v7191_v44 = vld [vmem:[#allocation45_spill] sm:$0xff] }
 0x398   : > { %4357 = vmatprep.subr.bf16.mxu1 %v4904_v6  ;;  %v2701_v21 = vmul.f32 %v7191_v44, %v2653_v2 }
 0x39a   : > { %4350 = vmatmul.mubr.bf16.gmra.mrb[4].mxu1 %v7184_v15  ;;  %v2705_v60 = vpack.c.bf16 %v2701_v21, %v2700_v20  ;;  %v4924_v15 = vld [vmem:[%s7055_s10 + $0x1f0] sm:$0xff]  }
 0x39b   : > { %4358 = vmatpush3.bf16.msra.mxu1 %v4904_v6  ;;  %4369 = vmatprep.mubr.bf16.mxu1 %v7185_v38  ;;  %v4920_v6 = vld [vmem:[%s7055_s10 + $0x1d0] sm:$0xff]   ;;  %v4925_v38 = vld [vmem:[%s7055_s10 + $0x1f8] sm:$0xff]  }
 0x39c   : > { %4359 = vmatprep.subr.bf16.mxu1 %v4905_v54 }
 0x39f   : > { %4360 = vmatpush3.bf16.msra.mxu1 %v4905_v54  ;;  %v7192_v54 = vld [vmem:[#allocation48_spill] sm:$0xff] }
 0x3a0   : > { %4361 = vmatprep.subr.bf16.mxu1 %v4906_v17  ;;  %v2899_v49 = vmul.f32 %v7192_v54, %v2851_v24 }
 0x3a3   : > { %4362 = vmatpush3.bf16.msra.mxu1 %v4906_v17  ;;  %v4926_v17 = vld [vmem:[%s7055_s10 + $0x200] sm:$0xff]  }
 0x3a4   : > { %4363 = vmatprep.subr.bf16.mxu1 %v4907_v52 }
 0x3a7   : > { %4364 = vmatpush3.bf16.msra.mxu1 %v4907_v52  ;;  %v4927_v52 = vld [vmem:[%s7055_s10 + $0x208] sm:$0xff]  }
 0x3a8   : > { %4365 = vmatprep.subr.bf16.mxu1 %v4908_v42 }
 0x3ab   : > { %4366 = vmatpush3.bf16.msra.mxu1 %v4908_v42  ;;  %v4928_v42 = vld [vmem:[%s7055_s10 + $0x210] sm:$0xff]  }
 0x3ac   : > { %4367 = vmatprep.subr.bf16.mxu1 %v4909_v19 }
 0x3af   : > { %4368 = vmatpush3.bf16.msra.mxu1 %v4909_v19  ;;  %v4929_v19 = vld [vmem:[%s7055_s10 + $0x218] sm:$0xff]  }
 0x3b0   : > { %4377 = vmatprep.subr.bf16.mxu1 %v4910_v3 }
 0x3b2   : > { %4370 = vmatmul.mubr.bf16.vlgmr.msra.gmra.mrb[0].mxu1 %v7186_v10 }
 0x3b3   : > { %4373 = vmatprep.mubr.bf16.mxu1 %v2499_v43  ;;  %4378 = vmatpush3.bf16.msra.mxu1 %v4910_v3  ;;  %v4934_v43 = vld [vmem:[#allocation15] sm:$0xff]  }
 0x3b4   : > { %4379 = vmatprep.subr.bf16.mxu1 %v4911_v57  ;;  %4449 = vmatprep.subr.bf16.mxu0 %v4934_v43 }
 0x3b5   : > { %4450 = vmatpush3.bf16.msra.mxu0 %v4934_v43 }
 0x3b6   : > { %4451 = vmatprep.subr.bf16.mxu0 %v4935_v63 }
 0x3b7   : > { %4380 = vmatpush3.bf16.msra.mxu1 %v4911_v57 }
 0x3b8   : > { %4381 = vmatprep.subr.bf16.mxu1 %v4912_v40 }
 0x3b9   : > { %4452 = vmatpush3.bf16.msra.mxu0 %v4935_v63 }
 0x3ba   : > { %4374 = vmatmul.mubr.bf16.gmra.mrb[4].mxu1 %v2500_v1  ;;  %4453 = vmatprep.subr.bf16.mxu0 %v4936_v35 }
 0x3bb   : > { %4382 = vmatpush3.bf16.msra.mxu1 %v4912_v40  ;;  %4393 = vmatprep.mubr.bf16.mxu1 %v7189_v58  ;;  %v4059_v40 = vld [vmem:[#allocation12] ss:$0 sm:$0xff] }
 0x3bc   : > { %4383 = vmatprep.subr.bf16.mxu1 %v4913_v22 }
 0x3bd   : > { %4454 = vmatpush3.bf16.msra.mxu0 %v4936_v35 }
 0x3be   : > { %4455 = vmatprep.subr.bf16.mxu0 %v4937_v55 }
 0x3bf   : > { %4384 = vmatpush3.bf16.msra.mxu1 %v4913_v22 }
 0x3c0   : > { %4385 = vmatprep.subr.bf16.mxu1 %v4914_v0 }
 0x3c1   : > { %4456 = vmatpush3.bf16.msra.mxu0 %v4937_v55 }
 0x3c3   : > { %4386 = vmatpush3.bf16.msra.mxu1 %v4914_v0 }
 0x3c4   : > { %4387 = vmatprep.subr.bf16.mxu1 %v4915_v56 }
 0x3c7   : > { %4388 = vmatpush3.bf16.msra.mxu1 %v4915_v56 }
 0x3c8   : > { %4389 = vmatprep.subr.bf16.mxu1 %v4916_v39 }
 0x3cb   : > { %4390 = vmatpush3.bf16.msra.mxu1 %v4916_v39  ;;  %v4060_v39 = vld [vmem:[#allocation14] ss:$0 sm:$0xff] }
 0x3cc   : > { %4391 = vmatprep.subr.bf16.mxu1 %v4917_v23 }
 0x3cf   : > { %4392 = vmatpush3.bf16.msra.mxu1 %v4917_v23 }
 0x3d0   : > { %4401 = vmatprep.subr.bf16.mxu1 %v4918_v50 }
 0x3d2   : > { %4394 = vmatmul.mubr.bf16.vlgmr.msra.gmra.mrb[0].mxu1 %v2703_v26  ;;  %v2900_v26 = vmul.f32 %v7193_v47, %v6341_v53  ;;  %v4923_v53 = vld [vmem:[%s7055_s10 + $0x1e8] sm:$0xff]  }
 0x3d3   : > { %4397 = vmatprep.mubr.bf16.mxu1 %v2704_v36  ;;  %4402 = vmatpush3.bf16.msra.mxu1 %v4918_v50 }
 0x3d4   : > { %4403 = vmatprep.subr.bf16.mxu1 %v4919_v59  ;;  %v2907_v36 = vpack.c.bf16 %v2900_v26, %v2899_v49 }
 0x3d7   : > { %4404 = vmatpush3.bf16.msra.mxu1 %v4919_v59 }
 0x3d8   : > { %4405 = vmatprep.subr.bf16.mxu1 %v4920_v6 }
 0x3da   : > { %4398 = vmatmul.mubr.bf16.gmra.mrb[4].mxu1 %v2705_v60 }
 0x3db   : > { %4406 = vmatpush3.bf16.msra.mxu1 %v4920_v6  ;;  %4417 = vmatprep.mubr.bf16.mxu1 %v2907_v36 }
 0x3dc   : > { %4407 = vmatprep.subr.bf16.mxu1 %v4921_v34 }
 0x3df   : > { %4408 = vmatpush3.bf16.msra.mxu1 %v4921_v34 }
 0x3e0   : > { %4409 = vmatprep.subr.bf16.mxu1 %v4922_v29 }
 0x3e3   : > { %4410 = vmatpush3.bf16.msra.mxu1 %v4922_v29 }
 0x3e4   : > { %4411 = vmatprep.subr.bf16.mxu1 %v4923_v53 }
 0x3e7   : > { %4412 = vmatpush3.bf16.msra.mxu1 %v4923_v53 }
 0x3e8   : > { %4413 = vmatprep.subr.bf16.mxu1 %v4924_v15 }
 0x3eb   : > { %4414 = vmatpush3.bf16.msra.mxu1 %v4924_v15 }
 0x3ec   : > { %4415 = vmatprep.subr.bf16.mxu1 %v4925_v38 }
 0x3ef   : > { %4416 = vmatpush3.bf16.msra.mxu1 %v4925_v38 }
 0x3f0   : > { %4425 = vmatprep.subr.bf16.mxu1 %v4926_v17 }
 0x3f2   : > { %4418 = vmatmul.mubr.bf16.vlgmr.msra.gmra.mrb[0].mxu1 %v2908_v33  ;;  %v3110_v33 = vmul.f32 %v3097_v32, %v6745_v48  ;;  %v4058_v48 = vld [vmem:[#allocation11] ss:$0 sm:$0xff] }
 0x3f3   : > { %4421 = vmatprep.mubr.bf16.mxu1 %v2909_v9  ;;  %4426 = vmatpush3.bf16.msra.mxu1 %v4926_v17 }
 0x3f4   : > { %4427 = vmatprep.subr.bf16.mxu1 %v4927_v52  ;;  %v3115_v9 = vpack.c.bf16 %v3111_v37, %v3110_v33 }
 0x3f7   : > { %4428 = vmatpush3.bf16.msra.mxu1 %v4927_v52 }
 0x3f8   : > { %4429 = vmatprep.subr.bf16.mxu1 %v4928_v42 }
 0x3fa   : > { %4422 = vmatmul.mubr.bf16.gmra.mrb[4].mxu1 %v2910_v41 }
 0x3fb   : > { %4430 = vmatpush3.bf16.msra.mxu1 %v4928_v42  ;;  %4441 = vmatprep.mubr.bf16.mxu1 %v3112_v62 }
 0x3fc   : > { %4431 = vmatprep.subr.bf16.mxu1 %v4929_v19 }
 0x3ff   : > { %4432 = vmatpush3.bf16.msra.mxu1 %v4929_v19 }
 0x400   : > { %4433 = vmatprep.subr.bf16.mxu1 %v4930_v25 }
 0x403   : > { %4434 = vmatpush3.bf16.msra.mxu1 %v4930_v25 }
 0x404   : > { %4435 = vmatprep.subr.bf16.mxu1 %v4931_v27 }
 0x407   : > { %4436 = vmatpush3.bf16.msra.mxu1 %v4931_v27 }
 0x408   : > { %4437 = vmatprep.subr.bf16.mxu1 %v4932_v12 }
 0x40b   : > { %4438 = vmatpush3.bf16.msra.mxu1 %v4932_v12 }
 0x40c   : > { %4439 = vmatprep.subr.bf16.mxu1 %v4933_v28 }
 0x40f   : > { %4440 = vmatpush3.bf16.msra.mxu1 %v4933_v28 }
 0x412   : > { %4442 = vmatmul.mubr.bf16.vlgmr.msra.gmra.mrb[0].mxu1 %v3113_v13  ;;  %v4938_v13 = vld [vmem:[#allocation15 + $0x20] sm:$0xff]  }
 0x413   : > { %4445 = vmatprep.mubr.bf16.mxu1 %v3114_v8  ;;  %4457 = vmatprep.subr.bf16.mxu0 %v4938_v13 }
 0x414   : > { %4458 = vmatpush3.bf16.msra.mxu0 %v4938_v13 }
 0x415   : > { %4459 = vmatprep.subr.bf16.mxu0 %v4939_v16 }
 0x418   : > { %4460 = vmatpush3.bf16.msra.mxu0 %v4939_v16  ;;  %v3493_v16 = vld [vmem:[%s7062_s17 + $0x10] sm:$0xff] }
 0x419   : > { %4461 = vmatprep.subr.bf16.mxu0 %v4940_v46 }
 0x41a   : > { %4446 = vmatmul.mubr.bf16.gmra.mrb[4].mxu1 %v3115_v9 }
 0x41c   : > { %4462 = vmatpush3.bf16.msra.mxu0 %v4940_v46  ;;  %v3494_v46 = vld [vmem:[%s7062_s17 + $0x18] sm:$0xff] }
 0x41d   : > { %4463 = vmatprep.subr.bf16.mxu0 %v4941_v5 }
 0x420   : > { %4464 = vmatpush3.bf16.msra.mxu0 %v4941_v5  ;;  %v4547_v5 = vpack.c.bf16 %v3494_v46, %v3493_v16  ;;  %v3583_v16 = vld [vmem:[#allocation20 + $0x8] sm:$0xff] }
 0x43b   : > { %v4275_v41 = vpop.f32.mrb[32].mxu0 }
 0x43c   : > { %v1787_v62 = vpop.f32.mrb[33].mxu0 }
 0x43d   : > { %v4276_v3 = vpop.f32.mrb[34].mxu0 }
 0x43e   : > { %v1790_v57 = vpop.f32.mrb[35].mxu0 }
 0x443   : > { %v4279_v10 = vpop.f32.mrb[36].mxu0 }
 0x444   : > { %v1803_v31 = vpop.f32.mrb[37].mxu0 }
 0x445   : > { %v4280_v4 = vpop.f32.mrb[38].mxu0 }
 0x446   : > { %v1806_v11 = vpop.f32.mrb[39].mxu0 }
 0x4e5   : > { %v4443_v8 = vpop.f32.mrb[0].mxu1 }
 0x4e6   : > { %v4591_v18 = vadd.f32 %v4443_v8, %v4275_v41  ;;  %v3214_v51 = vpop.f32.mrb[1].mxu1  ;;  %v3495_v8 = vld [vmem:[%s7062_s17 + $0x20] sm:$0xff] }
 0x4e7   : > { %v4592_v1 = vadd.f32 %v3214_v51, %v1787_v62  ;;  %v4444_v22 = vpop.f32.mrb[2].mxu1 }
 0x4e8   : > { %v3262_v58 = vmul.f32 %v4591_v18, %v4058_v48  ;;  %v4593_v0 = vadd.f32 %v4444_v22, %v4276_v3  ;;  %v3217_v56 = vpop.f32.mrb[3].mxu1  ;;  %v3497_v18 = vld [vmem:[%s7062_s17 + $0x30] sm:$0xff] }
 0x4e9   : > { %v3260_v43 = vmul.f32 %v4592_v1, %v4058_v48  ;;  %v4594_v63 = vadd.f32 %v3217_v56, %v1790_v57  ;;  %v6884_v1 = vld [vmem:[#allocation2 + $0x8] sm:$0xff] }
 0x4ea   : > { %v3277_v23 = vadd.f32 %v4059_v40, %v3262_v58  ;;  %v3263_v35 = vmul.f32 %v4593_v0, %v4058_v48  ;;  %v3499_v58 = vld [vmem:[%s7062_s17 + $0x40] sm:$0xff]  ;;  %v3500_v0 = vld [vmem:[%s7062_s17 + $0x48] sm:$0xff] }
 0x4eb   : > { %v3275_v50 = vadd.f32 %v4059_v40, %v3260_v43  ;;  %v3261_v55 = vmul.f32 %v4594_v63, %v4058_v48  ;;  %v4556_v56 = vpack.c.bf16 %v3500_v0, %v3499_v58  ;;  %v3502_v43 = vld [vmem:[%s7062_s17 + $0x58] sm:$0xff]  ;;  %v3588_v0 = vld [vmem:[#allocation20 + $0x30] sm:$0xff] }
 0x4ec   : > { %vm3285_vm9 = vcmp.gt.f32.partialorder %v3277_v23, 0.0  ;;  %v3300_v59 = vmul.f32 %v4060_v39, %v3277_v23  ;;  %v3278_v2 = vadd.f32 %v4059_v40, %v3263_v35  ;;  %v3504_v35 = vld [vmem:[%s7062_s17 + $0x68] sm:$0xff] }
 0x4ed   : > { %v3298_v24 = vmul.f32 %v4060_v39, %v3275_v50  ;;  %v3276_v30 = vadd.f32 %v4059_v40, %v3261_v55  ;;  %v4447_v20 = vpop.f32.mrb[4].mxu1  ;;  %vm3283_vm10 = vcmp.gt.f32.partialorder %v3275_v50, 0.0  ;;  %v3505_v55 = vld [vmem:[%s7062_s17 + $0x70] sm:$0xff] }
 0x4ee   : > { %vm3286_vm11 = vcmp.gt.f32.partialorder %v3278_v2, 0.0  ;;  %v3301_v44 = vmul.f32 %v4060_v39, %v3278_v2  ;;  %v4595_v21 = vadd.f32 %v4447_v20, %v4279_v10  ;;  %v3230_v6 = vpop.f32.mrb[5].mxu1  ;;  %v3308_v54 = vsel %vm3285_vm9, %v3277_v23, %v3300_v59  ;;  %v3503_v23 = vld [vmem:[%s7062_s17 + $0x60] sm:$0xff]  ;;  %v3506_v59 = vld [vmem:[%s7062_s17 + $0x78] sm:$0xff] }
 0x4ef   : > { %v3299_v49 = vmul.f32 %v4060_v39, %v3276_v30  ;;  %v4596_v47 = vadd.f32 %v3230_v6, %v1803_v31  ;;  %v4448_v26 = vpop.f32.mrb[6].mxu1  ;;  %vm3284_vm12 = vcmp.gt.f32.partialorder %v3276_v30, 0.0  ;;  %v3306_v53 = vsel %vm3283_vm10, %v3275_v50, %v3298_v24  ;;  %v3491_v31 = vld [vmem:[%s7062_s17] sm:$0xff]  ;;  %v4069_v24 = vld [vmem:[#allocation17] ss:$0 sm:$0xff] }
 0x4f0   : > { %v3309_v60 = vsel %vm3286_vm11, %v3278_v2, %v3301_v44  ;;  %v3266_v34 = vmul.f32 %v4595_v21, %v4058_v48  ;;  %v4597_v36 = vadd.f32 %v4448_v26, %v4280_v4  ;;  %v3233_v29 = vpop.f32.mrb[7].mxu1  ;;  %v3492_v4 = vld [vmem:[%s7062_s17 + $0x8] sm:$0xff]  ;;  %v4562_v50 = vpack.c.bf16 %v3504_v35, %v3503_v23  ;;  %v4070_v6 = vld [vmem:[#allocation18] ss:$0 sm:$0xff] }
 0x4f1   : > { %v3315_v15 = vpack.c.bf16 %v3309_v60, %v3308_v54  ;;  %v3264_v38 = vmul.f32 %v4596_v47, %v4058_v48  ;;  %v4598_v17 = vadd.f32 %v3233_v29, %v1806_v11  ;;  %v3307_v52 = vsel %vm3284_vm12, %v3276_v30, %v3299_v49  ;;  %v3593_v35 = vld [vmem:[#allocation20 + $0x58] sm:$0xff] }
 0x4f2   : > { %v3281_v42 = vadd.f32 %v4059_v40, %v3266_v34  ;;  %v3267_v19 = vmul.f32 %v4597_v36, %v4058_v48  ;;  %v3314_v25 = vpack.c.bf16 %v3307_v52, %v3306_v53  ;;  %v5360_v11 = vmov 0.0|0.0  }
 0x4f3   : > { %v3279_v27 = vadd.f32 %v4059_v40, %v3264_v38  ;;  %v3265_v12 = vmul.f32 %v4598_v17, %v4058_v48  ;;  %4543 = vmatprep.subr.bf16.mxu0 %v5360_v11  ;;  %v4544_v13 = vpack.c.bf16 %v3492_v4, %v3491_v31  ;;  %v3496_v48 = vld [vmem:[%s7062_s17 + $0x28] sm:$0xff]  ;;  %v4565_v2 = vpack.c.bf16 %v3506_v59, %v3505_v55  ;;  %v3594_v55 = vld [vmem:[#allocation20 + $0x60] sm:$0xff]  ;;  %v3595_v59 = vld [vmem:[#allocation20 + $0x68] sm:$0xff] }
 0x4f4   : > { %v3304_v28 = vmul.f32 %v4060_v39, %v3281_v42  ;;  %v3282_v32 = vadd.f32 %v4059_v40, %v3267_v19  ;;  %4465 = vmatprep.mubr.bf16.mxu0 %v3314_v25  ;;  %vm3289_vm13 = vcmp.gt.f32.partialorder %v3281_v42, 0.0  ;;  %v4550_v51 = vpack.c.bf16 %v3496_v48, %v3495_v8  ;;  %v3584_v48 = vld [vmem:[#allocation20 + $0x10] sm:$0xff] }
 0x4f5   : > { %v3302_v7 = vmul.f32 %v4060_v39, %v3279_v27  ;;  %v3280_v45 = vadd.f32 %v4059_v40, %v3265_v12  ;;  %4466 = vmatmul.mubr.bf16.vlgmr.msra.gmra.mrb[40].mxu0 %v3315_v15  ;;  %vm3287_vm14 = vcmp.gt.f32.partialorder %v3279_v27, 0.0  ;;  %v3498_v40 = vld [vmem:[%s7062_s17 + $0x38] sm:$0xff] }
 0x4f6   : > { %v3305_v33 = vmul.f32 %v4060_v39, %v3282_v32  ;;  %vm3290_vm15 = vcmp.gt.f32.partialorder %v3282_v32, 0.0  ;;  %v3312_v9 = vsel %vm3289_vm13, %v3281_v42, %v3304_v28  ;;  %4545 = vmatpush3.bf16.msra.mxu0 %v4544_v13  ;;  %v4553_v22 = vpack.c.bf16 %v3498_v40, %v3497_v18  ;;  %v3582_v13 = vld [vmem:[#allocation20] sm:$0xff]  ;;  %v3585_v18 = vld [vmem:[#allocation20 + $0x18] sm:$0xff] }
 0x4f7   : > { %v3303_v37 = vmul.f32 %v4060_v39, %v3280_v45  ;;  %vm3288_vm0 = vcmp.gt.f32.partialorder %v3280_v45, 0.0  ;;  %v3310_v62 = vsel %vm3287_vm14, %v3279_v27, %v3302_v7  ;;  %4546 = vmatprep.subr.bf16.mxu0 %v5360_v11  ;;  %v3501_v39 = vld [vmem:[%s7062_s17 + $0x50] sm:$0xff]  ;;  %v3586_v40 = vld [vmem:[#allocation20 + $0x20] sm:$0xff] }
 0x4f8   : > { %v3313_v41 = vsel %vm3290_vm15, %v3282_v32, %v3305_v33  ;;  %v4559_v63 = vpack.c.bf16 %v3502_v43, %v3501_v39  ;;  %v3590_v43 = vld [vmem:[#allocation20 + $0x40] sm:$0xff] }
 0x4f9   : > { %v3311_v3 = vsel %vm3288_vm0, %v3280_v45, %v3303_v37  ;;  %v3317_v57 = vpack.c.bf16 %v3313_v41, %v3312_v9 }
 0x4fa   : > { %v3316_v10 = vpack.c.bf16 %v3311_v3, %v3310_v62  ;;  %4548 = vmatpush3.bf16.msra.mxu0 %v4547_v5  ;;  %v4568_v5 = vpack.c.bf16 %v3583_v16, %v3582_v13 }
 0x4fb   : > { %4549 = vmatprep.subr.bf16.mxu0 %v5360_v11 }
 0x4fc   : > { %4469 = vmatprep.mubr.bf16.mxu0 %v3316_v10 }
 0x4fd   : > { %4470 = vmatmul.mubr.bf16.gmra.mrb[44].mxu0 %v3317_v57 }
 0x4fe   : > { %4505 = vmatprep.mubr.msk.f32.mxu0 %vm5361_vm1, %v6884_v1  ;;  %4551 = vmatpush3.bf16.msra.mxu0 %v4550_v51  ;;  %v4571_v51 = vpack.c.bf16 %v3585_v18, %v3584_v48 }
 0x4ff   : > { %4552 = vmatprep.subr.bf16.mxu0 %v5360_v11 }
 0x502   : > { %4554 = vmatpush3.bf16.msra.mxu0 %v4553_v22  ;;  %v3587_v22 = vld [vmem:[#allocation20 + $0x28] sm:$0xff] }
 0x503   : > { %4555 = vmatprep.subr.bf16.mxu0 %v5360_v11  ;;  %v4574_v58 = vpack.c.bf16 %v3587_v22, %v3586_v40 }
 0x506   : > { %4557 = vmatpush3.bf16.msra.mxu0 %v4556_v56  ;;  %v3589_v56 = vld [vmem:[#allocation20 + $0x38] sm:$0xff] }
 0x507   : > { %4558 = vmatprep.subr.bf16.mxu0 %v5360_v11  ;;  %v4577_v39 = vpack.c.bf16 %v3589_v56, %v3588_v0 }
 0x50a   : > { %4560 = vmatpush3.bf16.msra.mxu0 %v4559_v63  ;;  %v3591_v63 = vld [vmem:[#allocation20 + $0x48] sm:$0xff] }
 0x50b   : > { %4561 = vmatprep.subr.bf16.mxu0 %v5360_v11  ;;  %v4580_v23 = vpack.c.bf16 %v3591_v63, %v3590_v43 }
 0x50e   : > { %4563 = vmatpush3.bf16.msra.mxu0 %v4562_v50 }
 0x50f   : > { %4564 = vmatprep.subr.bf16.mxu0 %v5360_v11 }
 0x512   : > { %4566 = vmatpush3.bf16.msra.mxu0 %v4565_v2  ;;  %v4586_v2 = vpack.c.bf16 %v3595_v59, %v3594_v55 }
 0x513   : > { %4567 = vmatprep.subr.bf16.mxu0 %v5360_v11 }
 0x5c8   : > { %v4467_v30 = vpop.f32.mrb[40].mxu0 }
 0x5c9   : > { %v3416_v20 = vpop.f32.mrb[41].mxu0  ;;  %v3456_v49 = vmul.f32 %v4467_v30, %v4069_v24  ;;  %v3597_v30 = vld [vmem:[#allocation20 + $0x78] sm:$0xff] }
 0x5ca   : > { %v3454_v44 = vmul.f32 %v4069_v24, %v3416_v20  ;;  %v4468_v21 = vpop.f32.mrb[42].mxu0 }
 0x5cb   : > { %v3419_v54 = vpop.f32.mrb[43].mxu0  ;;  %v3457_v60 = vmul.f32 %v4468_v21, %v4069_v24  ;;  %v6922_v36 = vadd.f32 %v4070_v6, %v3456_v49 }
 0x5cc   : > { %v3455_v47 = vmul.f32 %v4069_v24, %v3419_v54  ;;  %v6918_v26 = vadd.f32 %v4070_v6, %v3454_v44  ;;  %v3507_v44 = vld [vmem:[%s7063_s18] sm:$0x1] }
 0x5cd   : > { %v6926_v38 = vadd.f32 %v4070_v6, %v3457_v60  ;;  %v3598_v60 = vld [vmem:[%s7194_s27] sm:$0x1]  ;;  %s5362_s27 = smov [#allocation21]  }
 0x5ce   : > { %v6920_v34 = vadd.f32 %v4070_v6, %v3455_v47  ;;  %s5259_s6 = sshll.u32 %s5362_s27, 4  ;;  %s5260_s6 = int_to_ptr.vmem [resolvable:$false] %s5259_s6 }
 0x5cf   : > { %s5261_s7 = scalar_lea.vmem %s5260_s6, 2048  ;;  %p5262_p5 = scmp.lt.s32.totalorder %s6992_s28, %s5260_s6 }
 0x5d0   : > { %v3477_v29 = vadd.f32 %v6920_v34, %v6918_v26  ;;  %v4471_v53 = vpop.f32.mrb[44].mxu0  ;;  %p5263_p9 = scmp.lt.s32.totalorder %s5261_s7, %s5255_s0 }
 0x5d1   : > { %v3432_v15 = vpop.f32.mrb[45].mxu0  ;;  %v3460_v25 = vmul.f32 %v4471_v53, %v4069_v24 }
 0x5d2   : > { %v3478_v17 = vadd.f32 %v3477_v29, %v6922_v36  ;;  %v3458_v52 = vmul.f32 %v4069_v24, %v3432_v15  ;;  %v4472_v42 = vpop.f32.mrb[46].mxu0  ;;  %p5264_p12 = por %p5263_p9, %p5262_p5 }
 0x5d3   : > { %v3435_v19 = vpop.f32.mrb[47].mxu0  ;;  %v3461_v7 = vmul.f32 %v4472_v42, %v4069_v24  ;;  %v6935_v33 = vadd.f32 %v4070_v6, %v3460_v25 }
 0x5d4   : > { %v6929_v27 = vadd.f32 %v4070_v6, %v3458_v52  ;;  %v3479_v12 = vadd.f32 %v3478_v17, %v6926_v38  ;;  %v3459_v28 = vmul.f32 %v4069_v24, %v3435_v19  ;;  %v3596_v24 = vld [vmem:[#allocation20 + $0x70] sm:$0xff]  ;;  %p5265_p10 = pnand %p5264_p12, %p5258_p6 }
 0x5d5   : > { %v6938_v9 = vadd.f32 %v4070_v6, %v3461_v7  ;;  %v4589_v20 = vpack.c.bf16 %v3597_v30, %v3596_v24 }
 0x5d6   : > { %v3480_v32 = vadd.f32 %v3479_v12, %v6929_v27  ;;  %v6933_v45 = vadd.f32 %v4070_v6, %v3459_v28  ;;  %v3579_v6 = vld [vmem:[%s7064_s19] sm:$0x1]  ;;  %v7195_v12 = vld [vmem:[#allocation36_spill] sm:$0xff] }
 0x5d8   : > { %v3481_v37 = vadd.f32 %v3480_v32, %v6933_v45 }
 0x5da   : > { %v3482_v41 = vadd.f32 %v3481_v37, %v6935_v33 }
 0x5dc   : > { %v3483_v62 = vadd.f32 %v3482_v41, %v6938_v9 }
 0x5de   : > { %v3484_v3 = vrot.slane %v3483_v62, 4 }
 0x5e0   : > { %v3485_v57 = vadd.f32 %v3484_v3, %v3483_v62 }
 0x5e2   : > { %v3486_v10 = vrot.slane %v3485_v57, 2 }
 0x5e4   : > { %v3487_v31 = vadd.f32 %v3486_v10, %v3485_v57 }
 0x5e6   : > { %v3488_v4 = vrot.slane %v3487_v31, 1 }
 0x5e8   : > { %v3489_v46 = vadd.f32 %v3488_v4, %v3487_v31  ;;  %v4071_v31 = vld [vmem:[%s7196_s21] ss:$0 sm:$0xff] }
 0x5ea   : > { %v3490_v8 = vmul.f32 0.015625, %v3489_v46 }
 0x5ec   : > { %4506 = vmatmul.mubr.f32.vlgmr.msra.gmra.mrb[48].mxu0 %v3490_v8 }
 0x5ed   : > { %4569 = vmatpush3.bf16.msra.mxu0 %v4568_v5  ;;  %4540 = vmatprep.mubr.msk.f32.mxu0 %vm5361_vm1, %v6884_v1  ;;  %v3592_v1 = vld [vmem:[#allocation20 + $0x50] sm:$0xff] }
 0x5ee   : > { %4570 = vmatprep.subr.bf16.mxu0 %v5360_v11  ;;  %v4583_v50 = vpack.c.bf16 %v3593_v35, %v3592_v1 }
 0x5f1   : > { %4572 = vmatpush3.bf16.msra.mxu0 %v4571_v51 }
 0x5f2   : > { %4573 = vmatprep.subr.bf16.mxu0 %v5360_v11 }
 0x5f5   : > { %4575 = vmatpush3.bf16.msra.mxu0 %v4574_v58 }
 0x5f6   : > { %4576 = vmatprep.subr.bf16.mxu0 %v5360_v11 }
 0x5f9   : > { %4578 = vmatpush3.bf16.msra.mxu0 %v4577_v39 }
 0x5fa   : > { %4579 = vmatprep.subr.bf16.mxu0 %v5360_v11 }
 0x5fd   : > { %4581 = vmatpush3.bf16.msra.mxu0 %v4580_v23 }
 0x5fe   : > { %4582 = vmatprep.subr.bf16.mxu0 %v5360_v11 }
 0x601   : > { %4584 = vmatpush3.bf16.msra.mxu0 %v4583_v50 }
 0x602   : > { %4585 = vmatprep.subr.bf16.mxu0 %v5360_v11 }
 0x605   : > { %4587 = vmatpush3.bf16.msra.mxu0 %v4586_v2 }
 0x606   : > { %4588 = vmatprep.subr.bf16.mxu0 %v5360_v11 }
 0x609   : > { %4590 = vmatpush3.bf16.msra.mxu0 %v4589_v20 }
 0x6bf   : > { %v3574_v21 = vpop.f32.mrb[48].mxu0 }
 0x6c0   : > { %v3575_v54 = vadd.f32 %v3574_v21, %v3507_v44  ;;  %v4507_v49 = vpop.f32.mrb[49].mxu0 }
 0x6c2   : > { %vm3578_vm2 = vcmp.gt.f32.partialorder %v3575_v54, 0.0  ;;  %v3580_v47 = vmul.f32 %v3579_v6, %v3575_v54 }
 0x6c4   : > { %v3581_v11 = vsel %vm3578_vm2, %v3575_v54, %v3580_v47 }
 0x6c5   : > { %4541 = vmatmul.mubr.f32.vlgmr.msra.gmra.mrb[50].mxu0 %v3581_v11 }
 0x798   : > { %v3665_v29 = vpop.f32.mrb[50].mxu0 }
 0x799   : > { %v3666_v53 = vadd.f32 %v3665_v29, %v3598_v60  ;;  %v4542_v15 = vpop.f32.mrb[51].mxu0 }
 0x79b   : > { %v3669_v17 = vsub.f32 0.0, %v3666_v53 }
 0x79d   : > { %v3670_v52 = vmul.f32 1.442695, %v3669_v17 }
 0x79f   : > { %4942 = vpow2.f32 %v3670_v52 }
 0x7a9   : > { %v4943_v42 = vpop.eup %4942 }
 0x7aa   : > { %v3672_v19 = vadd.f32 1.0, %v4943_v42 }
 0x7ac   : > { %4944 = vrcp.f32 %v3672_v19 }
 0x7b6   : > { %v4945_v25 = vpop.eup %4944 }
 0x7b7   : > { %v3677_v28 = vrot.slane %v4945_v25, %v7195_v12 }
 0x7b9   : > { %v3678_v32 = vmul.f32 %v3677_v28, %v6918_v26  ;;  %v3679_v7 = vmul.f32 %v3677_v28, %v6920_v34  ;;  %v3680_v37 = vmul.f32 %v3677_v28, %v6922_v36  ;;  %v3681_v41 = vmul.f32 %v3677_v28, %v6926_v38  ;;  %v7197_v26 = vld [vmem:[#allocation53_spill] sm:$0xff]  ;;  %v7198_v34 = vld [vmem:[#allocation54_spill] sm:$0xff] }
 0x7ba   : > { %v3682_v62 = vmul.f32 %v3677_v28, %v6929_v27  ;;  %v3683_v3 = vmul.f32 %v3677_v28, %v6933_v45  ;;  %v3684_v57 = vmul.f32 %v3677_v28, %v6935_v33  ;;  %v3685_v10 = vmul.f32 %v3677_v28, %v6938_v9  ;;  %v7199_v36 = vld [vmem:[#allocation57_spill] sm:$0xff]  ;;  %v7200_v38 = vld [vmem:[#allocation58_spill] sm:$0xff]  ;;  %v7201_v27 = vld [vmem:[#allocation59_spill] sm:$0xff] }
 0x7bb   : > { %v3686_v4 = vadd.f32 %v3678_v32, %v7197_v26  ;;  %v3687_v13 = vadd.f32 %v3679_v7, %v7198_v34  ;;  %v3688_v16 = vadd.f32 %v3680_v37, %v7199_v36  ;;  %v3689_v46 = vadd.f32 %v3681_v41, %v7200_v38  ;;  %v7202_v45 = vld [vmem:[#allocation60_spill] sm:$0xff] }
 0x7bc   : > { %v3690_v5 = vadd.f32 %v3682_v62, %v7201_v27  ;;  %v3691_v8 = vadd.f32 %v3683_v3, %v7202_v45  ;;  %v3692_v33 = vadd.f32 %v3684_v57, %v6425_v14  ;;  %v3693_v9 = vadd.f32 %v3685_v10, %v6442_v61 }
 0x7bd   : > { %v3709_v48 = vmul.f32 %v4071_v31, %v3686_v4  ;;  %v3710_v18 = vmul.f32 %v4071_v31, %v3687_v13  ;;  %v3711_v51 = vmul.f32 %v4071_v31, %v3688_v16  ;;  %v3712_v40 = vmul.f32 %v4071_v31, %v3689_v46 }
 0x7be   : > { %v3713_v22 = vmul.f32 %v4071_v31, %v3690_v5  ;;  %v3714_v58 = vmul.f32 %v4071_v31, %v3691_v8  ;;  %v3715_v0 = vmul.f32 %v4071_v31, %v3692_v33  ;;  %v3716_v56 = vmul.f32 %v4071_v31, %v3693_v9 }
 0x7bf   : > { %vm3694_vm3 = vcmp.gt.f32.partialorder %v3686_v4, 0.0  ;;  %vm3695_vm4 = vcmp.gt.f32.partialorder %v3687_v13, 0.0  ;;  %vm3696_vm5 = vcmp.gt.f32.partialorder %v3688_v16, 0.0  ;;  %vm3697_vm6 = vcmp.gt.f32.partialorder %v3689_v46, 0.0 }
 0x7c0   : > { %vm3698_vm7 = vcmp.gt.f32.partialorder %v3690_v5, 0.0  ;;  %vm3699_vm8 = vcmp.gt.f32.partialorder %v3691_v8, 0.0  ;;  %vm3700_vm9 = vcmp.gt.f32.partialorder %v3692_v33, 0.0  ;;  %vm3701_vm10 = vcmp.gt.f32.partialorder %v3693_v9, 0.0 }
 0x7c1   : > { %v3717_v14 = vsel %vm3694_vm3, %v3686_v4, %v3709_v48  ;;  %v3718_v61 = vsel %vm3695_vm4, %v3687_v13, %v3710_v18  ;;  %v3719_v39 = vsel %vm3696_vm5, %v3688_v16, %v3711_v51  ;;  %v3720_v43 = vsel %vm3697_vm6, %v3689_v46, %v3712_v40 }
 0x7c2   : > { %v3721_v63 = vsel %vm3698_vm7, %v3690_v5, %v3713_v22  ;;  %v3722_v23 = vsel %vm3699_vm8, %v3691_v8, %v3714_v58  ;;  %v3723_v1 = vsel %vm3700_vm9, %v3692_v33, %v3715_v0  ;;  %v3724_v35 = vsel %vm3701_vm10, %v3693_v9, %v3716_v56  ;;  %3725 = vst [vmem:[%s6984_s24] sm:$0xff] %v3717_v14 }
 0x7c3   : > { %3726 = vst [vmem:[%s6984_s24 + $0x8] sm:$0xff] %v3718_v61  ;;  %3727 = vst [vmem:[%s6984_s24 + $0x10] sm:$0xff] %v3719_v39 }
 0x7c4   : > { %3728 = vst [vmem:[%s6984_s24 + $0x18] sm:$0xff] %v3720_v43  ;;  %3729 = vst [vmem:[%s6984_s24 + $0x20] sm:$0xff] %v3721_v63 }
 0x7c5   : > { %3730 = vst [vmem:[%s6984_s24 + $0x28] sm:$0xff] %v3722_v23  ;;  %3731 = vst [vmem:[%s6984_s24 + $0x30] sm:$0xff] %v3723_v1 }
 0x7c6   : > { %3732 = vst [vmem:[%s6984_s24 + $0x38] sm:$0xff] %v3724_v35 }
 0x7c7   : > { %5268 = shalt.err (!%p5265_p10)
}
 0x7c8   : > { %s5269_s29 = scalar_lea.hbm %s6990_s25, 1024  ;;  %s5273_s26 = scalar_lea.hbm %s7203_s9, 2048 }
 0x7c9   : > { %p5270_p2 = scmp.ne.s32.totalorder %s6990_s25, %s5269_s29  ;;  %p5274_p7 = scmp.lt.u32.totalorder %s6990_s25, %s7203_s9 }
 0x7ca   : > { %p5275_p8 = scmp.lt.u32.totalorder %s5273_s26, %s5269_s29  ;;  %p5277_p13 = scmp.lt.u32.totalorder %s5269_s29, %s6990_s25 }
 0x7cb   : > { %p5271_p3 = pnand %p5270_p2, %p7205_p1 }
 0x7cc   : > { %p5276_p11 = por %p5275_p8, %p5274_p7 }
 0x7cd   : > { %p5272_p4 = pneg %p5271_p3 }
 0x7ce   : > { %p5278_p0 = por %p5277_p13, %p5276_p11 }
 0x7d0   : > { %p5279_p6 = pnand %p5278_p0, %p5272_p4 }
 0x7d2   : > { %5282 = shalt.err (!%p5279_p6)
}
 0x7d3   : > { %s5363_s4 = smov 128   ;;  %s5364_s0 = smov 8  }
 0x7d4   : > { %4699 = dma.vmem_to_hbm [thread:$0]  (%p7205_p1), %s6992_s28, 1024, %s6990_s25, %s7004_s12, %s5363_s4, %s5363_s4, %s5364_s0  }
 0x7d5 PF: > { %s7206_s27 = sld [smem:[#allocation31_spill]]  ;;  %s7207_s6 = sld [smem:[#allocation29_spill]] }
 0x7d6   : > { %s7208_s7 = sld [smem:[#allocation35_spill]] }
 0x7db   : > { %p4761_p5 = scmp.ge.s32.totalorder %s7206_s27, 2  ;;  %s3762_s1 = sand.u32 1, %s7207_s6  }
 0x7dc   : > { %p7209_p9 = scmp.ne.s32.totalorder %s7208_s7, 0  ;;  %s3763_s29 = scalar_lea.sflag [#allocation5], %s3762_s1 }
 0x7de   : > { %p4736_p12 = pnand %p4761_p5, %p7209_p9 }
 0x7e0   : > { %5324 = dma.done.wait (!%p4736_p12), %s3763_s29, 1024  }
 0x7e1   : > { %5326 = vsyncadd (!%p4736_p12), %s3763_s29, 4294966272  ;;  %s7210_s25 = sld [smem:[#allocation32_spill]]  ;;  %s7211_s21 = sld [smem:[#allocation30_spill]] }
 0x7e2   : > { %s7212_s24 = sld [smem:[#allocation33_spill]]  ;;  %s7213_s4 = smov %s5333_s30 }
 0x7e7   : > { %p39_p10 = scmp.ge.s32.totalorder %s7210_s25, 4   ;;  %s7214_s30 = smov %s7211_s21 }
 0x7e9   :  { %41 = sbr.rel (!%p39_p10) target bundleno = 24 (0x18), region = 192 }
 0x7f0   :  { %3768 = vsyncpa [#allocation4], 1 }
 0x7f1   :  { %3770 = vsyncpa [#allocation4 + $0x1], 1 }
 0x7f2   :  { %3771 = vsyncpa [#allocation7], 1 }
 0x7f3   :  { %3772 = vsyncpa [#allocation10], 1 }
 0x7f4   :  { %3773 = vsyncpa [#allocation13], 1 }
 0x7f5   :  { %3774 = vsyncpa [#allocation16], 1 }
 0x7f6   :  { %3775 = vsyncpa [#allocation19], 1 }
 0x7f7   :  { %3776 = vsyncpa [#allocation5], 1 }
 0x7f8   :  { %3778 = vsyncpa [#allocation5 + $0x1], 1 }

</bundles_post_ra>
